<compile_context>
chip_gen: v7x
topology: tpu7x:2x2x1
jax: 0.10.0
libtpu: 0.0.40
codegen_flags: <defaults>
</compile_context>

<pallas_src>
import random

import numpy as np
import jax
import jax.numpy as jnp
from jax import lax
from jax.experimental import pallas as pl
from jax.experimental.pallas import tpu as pltpu

# ---- model sizes (small, synthetic) ----------------------------------------
B, S, T = 8, 8, 6          # batch, source length, target length
E, H = 32, 32              # embedding dim, hidden dim
V_SRC, V_TRG = 64, 64      # vocab sizes (decoder.output_dim == V_TRG)
VPAD = 128                 # lane-dense padded vocab width for logits
NEG = -1e9                 # bias for padded logit lanes (never wins argmax)
F32 = jnp.float32


# ---------------------------------------------------------------------------
# Fused kernel: encoder GRU over source, then decoder loop with additive
# attention + GRU cell + vocab projection + argmax / teacher-forcing select.
# ---------------------------------------------------------------------------
def seq2seq_kernel(tf_ref,                 # SMEM (T,) int32 teacher-force flags
                   semb_ref,               # (S, B, E) source embeddings
                   temb_ref,               # (T, B, E) teacher-forced trg embeddings
                   e_wih_ref, e_whh_ref,   # (E, 3H), (H, 3H)  encoder GRU
                   e_bih_ref, e_bhh_ref,   # (1, 3H), (1, 3H)
                   wa_h_ref, wa_e_ref,     # (H, H), (H, H)    attention projections
                   ba_ref, va_mat_ref,     # (1, H), (H, H)    bias / lane-broadcast v
                   d_wih_ref, d_whh_ref,   # (E+H, 3H), (H, 3H) decoder GRU
                   d_bih_ref, d_bhh_ref,   # (1, 3H), (1, 3H)
                   wo_ref, bo_ref,         # (2H+E, VPAD), (1, VPAD)  fc_out (padded)
                   emb_pad_ref,            # (VPAD, E) padded target embedding table
                   out_ref,                # (T, B, VPAD) logits (padded lanes ~ NEG)
                   enc_scr,                # VMEM scratch (S, B, H) encoder outputs
                   emb_scr):               # VMEM scratch (B, E) current decoder input emb
    s_len, b, e_dim = semb_ref.shape
    t_len = temb_ref.shape[0]
    h_dim = wa_h_ref.shape[0]
    v_pad = out_ref.shape[2]
    h2 = 2 * h_dim
    h3 = 3 * h_dim

    def mm(a, w):
        return jnp.dot(a, w, preferred_element_type=jnp.float32)

    # ---- encoder ------------------------------------------------------------
    # Input gates have no dependence on h: ONE batched (S*B,E)x(E,3H) matmul.
    src2d = semb_ref[...].reshape(s_len * b, e_dim)
    gi_all = (mm(src2d, e_wih_ref[...]) + e_bih_ref[...]).reshape(s_len, b, h3)

    e_whh = e_whh_ref[...]                  # (H, 3H) — needed every step, small
    e_bhh = e_bhh_ref[...]

    h = jnp.zeros((b, h_dim), F32)
    for t in range(s_len):                  # fully unrolled (S is static)
        gi = gi_all[t]                      # (B, 3H)
        gh = mm(h, e_whh) + e_bhh           # (B, 3H) — single recurrent MXU push
        rz = jax.nn.sigmoid(gi[:, :h2] + gh[:, :h2])   # r|z together (64 lanes)
        r = rz[:, :h_dim]
        z = rz[:, h_dim:]
        n = jnp.tanh(gi[:, h2:] + r * gh[:, h2:])
        h = (1.0 - z) * n + z * h
        enc_scr[t] = h                      # static-index store

    # ---- attention loop invariants ------------------------------------------
    wa_h = wa_h_ref[...]                    # (H, H) small, needed every step
    va_mat = va_mat_ref[...]                # (H, H) lane-broadcast attention vector
    e_enc = (mm(enc_scr[...].reshape(s_len * b, h_dim), wa_e_ref[...])
             + ba_ref[...]).reshape(s_len, b, h_dim)   # (S, B, H)

    lane_ids = lax.broadcasted_iota(jnp.int32, (b, v_pad), 1)

    # outputs[:, 0] stays zero (like torch.zeros(...)); only row 0 is zeroed
    out_ref[0] = jnp.zeros((b, v_pad), F32)
    emb_scr[...] = temb_ref[0]              # input = emb(trg[:, 0])

    # ---- decoder ------------------------------------------------------------
    for t in range(1, t_len):               # fully unrolled (T is static)
        embedded = emb_scr[...]             # (B, E)

        # --- additive attention over encoder outputs ------------------------
        e_hid = mm(h, wa_h)                                     # (B, H)
        energy = jnp.tanh(e_enc + e_hid[None, :, :])            # (S, B, H)
        # score reduction via MXU; va_mat is va broadcast across H columns so
        # scores come out lane-broadcast -> softmax/context are leading-axis ops
        scores = mm(energy.reshape(s_len * b, h_dim),
                    va_mat).reshape(s_len, b, h_dim)            # (S, B, H)
        m = jnp.max(scores, axis=0, keepdims=True)
        w = jnp.exp(scores - m)
        attn = w * pl.reciprocal(jnp.sum(w, axis=0, keepdims=True), approx=True)
        context = jnp.sum(attn * enc_scr[...], axis=0)          # (B, H)

        # --- GRU cell on cat(embedded, context): 2 fused matmuls ------------
        xcat = jnp.concatenate([embedded, context], axis=1)     # (B, E+H)
        gi = mm(xcat, d_wih_ref[...]) + d_bih_ref[...]          # (B, 3H)
        gh = mm(h, d_whh_ref[...]) + d_bhh_ref[...]             # (B, 3H)
        rz = jax.nn.sigmoid(gi[:, :h2] + gh[:, :h2])
        r = rz[:, :h_dim]
        z = rz[:, h_dim:]
        n = jnp.tanh(gi[:, h2:] + r * gh[:, h2:])
        h = (1.0 - z) * n + z * h                               # (B, H)

        # --- fused vocab projection on cat(h, context, embedded) ------------
        ocat = jnp.concatenate([h, context, embedded], axis=1)  # (B, 2H+E)
        logits = mm(ocat, wo_ref[...]) + bo_ref[...]            # (B, VPAD) lane-dense
        out_ref[t] = logits

        # --- next input: teacher forcing vs greedy argmax --------------------
        if t < t_len - 1:                   # last step's next input is unused
            tf = tf_ref[t]

            @pl.when(tf > 0)
            def _():
                emb_scr[...] = temb_ref[t]

            @pl.when(tf == 0)
            def _():
                # argmax + one-hot + embedding gather only when actually needed
                pred = jnp.argmax(logits, axis=1)                    # padded lanes ~ NEG
                pred_oh = (lane_ids == pred[:, None]).astype(F32)    # (B, VPAD)
                emb_scr[...] = mm(pred_oh, emb_pad_ref[...])         # (B, E)


# ---------------------------------------------------------------------------
# Wrapper (glue in plain JAX: embedding gathers, padding, transposes)
# ---------------------------------------------------------------------------
def rnn_seq2seq_forward(params, src, src_len, trg, tf_flags):
    # TODO(synk): pack_padded_sequence / src_len masking is not reproduced;
    # the encoder GRU and attention run over the full padded source length.
    del src_len

    semb = jnp.transpose(params["emb_src"][src], (1, 0, 2))    # (S, B, E)
    temb = jnp.transpose(params["emb_trg"][trg], (1, 0, 2))    # (T, B, E)

    # lane-dense (VPAD) vocab projection: zero-pad weight columns, large
    # negative bias in padded lanes so argmax never selects them.
    wo_pad = jnp.pad(params["wo"], ((0, 0), (0, VPAD - V_TRG)))
    bo_pad = jnp.pad(params["bo"], ((0, 0), (0, VPAD - V_TRG)),
                     constant_values=NEG)
    emb_pad = jnp.pad(params["emb_trg"], ((0, VPAD - V_TRG), (0, 0)))
    # attention vector broadcast across H columns (MXU-friendly score reduce)
    va_mat = jnp.broadcast_to(jnp.reshape(params["va"], (H, 1)), (H, H))

    vmem = pl.BlockSpec(memory_space=pltpu.MemorySpace.VMEM)
    smem = pl.BlockSpec(memory_space=pltpu.MemorySpace.SMEM)

    # NOTE: no grid -> single TensorCore. The recurrence is serial and B=8 fits
    # one vreg's sublanes; a batch-split grid only pays off for batch >= 16.
    out_tm = pl.pallas_call(
        seq2seq_kernel,
        out_shape=jax.ShapeDtypeStruct((T, B, VPAD), F32),
        in_specs=[smem] + [vmem] * 17,
        out_specs=vmem,
        scratch_shapes=[pltpu.VMEM((S, B, H), F32),
                        pltpu.VMEM((B, E), F32)],
    )(tf_flags, semb, temb,
      params["enc_w_ih"], params["enc_w_hh"], params["enc_b_ih"], params["enc_b_hh"],
      params["wa_h"], params["wa_e"], params["ba"], va_mat,
      params["dec_w_ih"], params["dec_w_hh"], params["dec_b_ih"], params["dec_b_hh"],
      wo_pad, bo_pad, emb_pad)

    # back to PyTorch's batch-first (B, T, V_trg), dropping padded lanes
    return jnp.transpose(out_tm, (1, 0, 2))[:, :, :V_TRG]


def init_params(key):
    ks = jax.random.split(key, 16)
    s = 0.1
    p = {
        "emb_src": s * jax.random.normal(ks[0], (V_SRC, E), F32),
        "emb_trg": s * jax.random.normal(ks[1], (V_TRG, E), F32),
        # encoder GRU (gate order along columns: r | z | n)
        "enc_w_ih": s * jax.random.normal(ks[2], (E, 3 * H), F32),
        "enc_w_hh": s * jax.random.normal(ks[3], (H, 3 * H), F32),
        "enc_b_ih": s * jax.random.normal(ks[4], (1, 3 * H), F32),
        "enc_b_hh": s * jax.random.normal(ks[5], (1, 3 * H), F32),
        # additive attention
        "wa_h": s * jax.random.normal(ks[6], (H, H), F32),
        "wa_e": s * jax.random.normal(ks[7], (H, H), F32),
        "ba": s * jax.random.normal(ks[8], (1, H), F32),
        "va": s * jax.random.normal(ks[9], (1, H), F32),
        # decoder GRU (input = cat(embedded, context) -> E + H)
        "dec_w_ih": s * jax.random.normal(ks[10], (E + H, 3 * H), F32),
        "dec_w_hh": s * jax.random.normal(ks[11], (H, 3 * H), F32),
        "dec_b_ih": s * jax.random.normal(ks[12], (1, 3 * H), F32),
        "dec_b_hh": s * jax.random.normal(ks[13], (1, 3 * H), F32),
        # fc_out (input = cat(hidden, context, embedded) -> 2H + E)
        "wo": s * jax.random.normal(ks[14], (2 * H + E, V_TRG), F32),
        "bo": s * jax.random.normal(ks[15], (1, V_TRG), F32),
    }
    return p


if __name__ == "__main__":
    key = jax.random.PRNGKey(0)
    kp, ks, kt = jax.random.split(key, 3)

    params = init_params(kp)
    src = jax.random.randint(ks, (B, S), 0, V_SRC, dtype=jnp.int32)
    trg = jax.random.randint(kt, (B, T), 0, V_TRG, dtype=jnp.int32)
    src_len = jnp.full((B,), S, dtype=jnp.int32)

    # teacher-forcing draws (random.random() < 0.5 per decoding step),
    # precomputed host-side for determinism; index 0 is unused.
    random.seed(0)
    tf_flags = np.zeros((T,), dtype=np.int32)
    for t in range(1, T):
        tf_flags[t] = 1 if random.random() < 0.5 else 0
    tf_flags = jnp.asarray(tf_flags)

    fwd = jax.jit(rnn_seq2seq_forward)
    outputs = fwd(params, src, src_len, trg, tf_flags)
    outputs = jax.block_until_ready(outputs)

    assert outputs.shape == (B, T, V_TRG)
    assert bool(jnp.all(jnp.isfinite(outputs)))
    assert bool(jnp.all(outputs[:, 0, :] == 0.0))  # t=0 slot stays zero
    print("KERNEL_OK")
</pallas_src>

<mosaic_0001>
module attributes {stable_mosaic.version = 11 : i64} {
  func.func @seq2seq_kernel(%arg0: memref<6xi32, #tpu.memory_space<smem>>, %arg1: memref<8x8x32xf32, #tpu.memory_space<vmem>>, %arg2: memref<6x8x32xf32, #tpu.memory_space<vmem>>, %arg3: memref<32x96xf32, #tpu.memory_space<vmem>>, %arg4: memref<32x96xf32, #tpu.memory_space<vmem>>, %arg5: memref<1x96xf32, #tpu.memory_space<vmem>>, %arg6: memref<1x96xf32, #tpu.memory_space<vmem>>, %arg7: memref<32x32xf32, #tpu.memory_space<vmem>>, %arg8: memref<32x32xf32, #tpu.memory_space<vmem>>, %arg9: memref<1x32xf32, #tpu.memory_space<vmem>>, %arg10: memref<32x32xf32, #tpu.memory_space<vmem>>, %arg11: memref<64x96xf32, #tpu.memory_space<vmem>>, %arg12: memref<32x96xf32, #tpu.memory_space<vmem>>, %arg13: memref<1x96xf32, #tpu.memory_space<vmem>>, %arg14: memref<1x96xf32, #tpu.memory_space<vmem>>, %arg15: memref<96x128xf32, #tpu.memory_space<vmem>>, %arg16: memref<1x128xf32, #tpu.memory_space<vmem>>, %arg17: memref<128x32xf32, #tpu.memory_space<vmem>>, %arg18: memref<6x8x128xf32, #tpu.memory_space<vmem>>, %arg19: memref<8x8x32xf32, #tpu.memory_space<vmem>>, %arg20: memref<8x32xf32, #tpu.memory_space<vmem>>) attributes {dimension_semantics = [], scalar_prefetch = 0 : i64, scratch_operands = 2 : i64, tpu.core_type = #tpu.core_type<tc>} {
    %c0 = arith.constant 0 : index
    %c0_0 = arith.constant 0 : index
    %c0_1 = arith.constant 0 : index
    %0 = vector.load %arg1[%c0, %c0_0, %c0_1] : memref<8x8x32xf32, #tpu.memory_space<vmem>>, vector<8x8x32xf32>
    %1 = vector.shape_cast %0 : vector<8x8x32xf32> to vector<64x32xf32>
    %c0_2 = arith.constant 0 : index
    %c0_3 = arith.constant 0 : index
    %2 = vector.load %arg3[%c0_2, %c0_3] : memref<32x96xf32, #tpu.memory_space<vmem>>, vector<32x96xf32>
    %cst = arith.constant dense<0.000000e+00> : vector<64x96xf32>
    %3 = tpu.matmul %1, %2, %cst {dimension_numbers = #tpu.dot_dimension_numbers<[1], [0], [0], [1], [0, 0, 1, 1], [], []>} : vector<64x32xf32>, vector<32x96xf32>, vector<64x96xf32> -> vector<64x96xf32>
    %c0_4 = arith.constant 0 : index
    %c0_5 = arith.constant 0 : index
    %4 = vector.load %arg5[%c0_4, %c0_5] : memref<1x96xf32, #tpu.memory_space<vmem>>, vector<1x96xf32>
    %5 = vector.broadcast %4 : vector<1x96xf32> to vector<64x96xf32>
    %6 = arith.addf %3, %5 : vector<64x96xf32>
    %7 = vector.shape_cast %6 : vector<64x96xf32> to vector<8x8x96xf32>
    %c0_6 = arith.constant 0 : index
    %c0_7 = arith.constant 0 : index
    %8 = vector.load %arg4[%c0_6, %c0_7] : memref<32x96xf32, #tpu.memory_space<vmem>>, vector<32x96xf32>
    %c0_8 = arith.constant 0 : index
    %c0_9 = arith.constant 0 : index
    %9 = vector.load %arg6[%c0_8, %c0_9] : memref<1x96xf32, #tpu.memory_space<vmem>>, vector<1x96xf32>
    %cst_10 = arith.constant 0.000000e+00 : f32
    %10 = vector.broadcast %cst_10 : f32 to vector<8x32xf32>
    %11 = vector.extract_strided_slice %7 {offsets = [0, 0, 0], sizes = [1, 8, 96], strides = [1, 1, 1]} : vector<8x8x96xf32> to vector<1x8x96xf32>
    %12 = vector.shape_cast %11 : vector<1x8x96xf32> to vector<8x96xf32>
    %cst_11 = arith.constant dense<0.000000e+00> : vector<8x96xf32>
    %13 = tpu.matmul %10, %8, %cst_11 {dimension_numbers = #tpu.dot_dimension_numbers<[1], [0], [0], [1], [0, 0, 1, 1], [], []>} : vector<8x32xf32>, vector<32x96xf32>, vector<8x96xf32> -> vector<8x96xf32>
    %14 = vector.broadcast %9 : vector<1x96xf32> to vector<8x96xf32>
    %15 = arith.addf %13, %14 : vector<8x96xf32>
    %16 = vector.extract_strided_slice %12 {offsets = [0, 0], sizes = [8, 64], strides = [1, 1]} : vector<8x96xf32> to vector<8x64xf32>
    %17 = vector.extract_strided_slice %15 {offsets = [0, 0], sizes = [8, 64], strides = [1, 1]} : vector<8x96xf32> to vector<8x64xf32>
    %18 = arith.addf %16, %17 : vector<8x64xf32>
    %19 = arith.negf %18 : vector<8x64xf32>
    %20 = math.exp %19 : vector<8x64xf32>
    %cst_12 = arith.constant 1.000000e+00 : f32
    %21 = vector.broadcast %cst_12 : f32 to vector<8x64xf32>
    %22 = arith.addf %21, %20 : vector<8x64xf32>
    %23 = arith.divf %21, %22 : vector<8x64xf32>
    %24 = vector.extract_strided_slice %23 {offsets = [0, 0], sizes = [8, 32], strides = [1, 1]} : vector<8x64xf32> to vector<8x32xf32>
    %25 = vector.extract_strided_slice %23 {offsets = [0, 32], sizes = [8, 32], strides = [1, 1]} : vector<8x64xf32> to vector<8x32xf32>
    %26 = vector.extract_strided_slice %12 {offsets = [0, 64], sizes = [8, 32], strides = [1, 1]} : vector<8x96xf32> to vector<8x32xf32>
    %27 = vector.extract_strided_slice %15 {offsets = [0, 64], sizes = [8, 32], strides = [1, 1]} : vector<8x96xf32> to vector<8x32xf32>
    %28 = arith.mulf %24, %27 : vector<8x32xf32>
    %29 = arith.addf %26, %28 : vector<8x32xf32>
    %30 = math.tanh %29 : vector<8x32xf32>
    %cst_13 = arith.constant 1.000000e+00 : f32
    %31 = vector.broadcast %cst_13 : f32 to vector<8x32xf32>
    %32 = arith.subf %31, %25 : vector<8x32xf32>
    %33 = arith.mulf %32, %30 : vector<8x32xf32>
    %34 = arith.mulf %25, %10 : vector<8x32xf32>
    %35 = arith.addf %33, %34 : vector<8x32xf32>
    %c0_14 = arith.constant 0 : index
    %c0_15 = arith.constant 0 : index
    %c0_16 = arith.constant 0 : index
    %36 = vector.load %arg19[%c0_14, %c0_15, %c0_16] : memref<8x8x32xf32, #tpu.memory_space<vmem>>, vector<1x8x32xf32>
    %37 = vector.shape_cast %36 : vector<1x8x32xf32> to vector<8x32xf32>
    %38 = vector.shape_cast %35 : vector<8x32xf32> to vector<1x8x32xf32>
    tpu.vector_store %arg19[%c0_14, %c0_15, %c0_16], %38 {strides = array<i32>} : memref<8x8x32xf32, #tpu.memory_space<vmem>>, vector<1x8x32xf32>,
    %39 = vector.extract_strided_slice %7 {offsets = [1, 0, 0], sizes = [1, 8, 96], strides = [1, 1, 1]} : vector<8x8x96xf32> to vector<1x8x96xf32>
    %40 = vector.shape_cast %39 : vector<1x8x96xf32> to vector<8x96xf32>
    %cst_17 = arith.constant dense<0.000000e+00> : vector<8x96xf32>
    %41 = tpu.matmul %35, %8, %cst_17 {dimension_numbers = #tpu.dot_dimension_numbers<[1], [0], [0], [1], [0, 0, 1, 1], [], []>} : vector<8x32xf32>, vector<32x96xf32>, vector<8x96xf32> -> vector<8x96xf32>
    %42 = vector.broadcast %9 : vector<1x96xf32> to vector<8x96xf32>
    %43 = arith.addf %41, %42 : vector<8x96xf32>
    %44 = vector.extract_strided_slice %40 {offsets = [0, 0], sizes = [8, 64], strides = [1, 1]} : vector<8x96xf32> to vector<8x64xf32>
    %45 = vector.extract_strided_slice %43 {offsets = [0, 0], sizes = [8, 64], strides = [1, 1]} : vector<8x96xf32> to vector<8x64xf32>
    %46 = arith.addf %44, %45 : vector<8x64xf32>
    %47 = arith.negf %46 : vector<8x64xf32>
    %48 = math.exp %47 : vector<8x64xf32>
    %cst_18 = arith.constant 1.000000e+00 : f32
    %49 = vector.broadcast %cst_18 : f32 to vector<8x64xf32>
    %50 = arith.addf %49, %48 : vector<8x64xf32>
    %51 = arith.divf %49, %50 : vector<8x64xf32>
    %52 = vector.extract_strided_slice %51 {offsets = [0, 0], sizes = [8, 32], strides = [1, 1]} : vector<8x64xf32> to vector<8x32xf32>
    %53 = vector.extract_strided_slice %51 {offsets = [0, 32], sizes = [8, 32], strides = [1, 1]} : vector<8x64xf32> to vector<8x32xf32>
    %54 = vector.extract_strided_slice %40 {offsets = [0, 64], sizes = [8, 32], strides = [1, 1]} : vector<8x96xf32> to vector<8x32xf32>
    %55 = vector.extract_strided_slice %43 {offsets = [0, 64], sizes = [8, 32], strides = [1, 1]} : vector<8x96xf32> to vector<8x32xf32>
    %56 = arith.mulf %52, %55 : vector<8x32xf32>
    %57 = arith.addf %54, %56 : vector<8x32xf32>
    %58 = math.tanh %57 : vector<8x32xf32>
    %cst_19 = arith.constant 1.000000e+00 : f32
    %59 = vector.broadcast %cst_19 : f32 to vector<8x32xf32>
    %60 = arith.subf %59, %53 : vector<8x32xf32>
    %61 = arith.mulf %60, %58 : vector<8x32xf32>
    %62 = arith.mulf %53, %35 : vector<8x32xf32>
    %63 = arith.addf %61, %62 : vector<8x32xf32>
    %c1 = arith.constant 1 : index
    %c0_20 = arith.constant 0 : index
    %c0_21 = arith.constant 0 : index
    %64 = vector.load %arg19[%c1, %c0_20, %c0_21] : memref<8x8x32xf32, #tpu.memory_space<vmem>>, vector<1x8x32xf32>
    %65 = vector.shape_cast %64 : vector<1x8x32xf32> to vector<8x32xf32>
    %66 = vector.shape_cast %63 : vector<8x32xf32> to vector<1x8x32xf32>
    tpu.vector_store %arg19[%c1, %c0_20, %c0_21], %66 {strides = array<i32>} : memref<8x8x32xf32, #tpu.memory_space<vmem>>, vector<1x8x32xf32>,
    %67 = vector.extract_strided_slice %7 {offsets = [2, 0, 0], sizes = [1, 8, 96], strides = [1, 1, 1]} : vector<8x8x96xf32> to vector<1x8x96xf32>
    %68 = vector.shape_cast %67 : vector<1x8x96xf32> to vector<8x96xf32>
    %cst_22 = arith.constant dense<0.000000e+00> : vector<8x96xf32>
    %69 = tpu.matmul %63, %8, %cst_22 {dimension_numbers = #tpu.dot_dimension_numbers<[1], [0], [0], [1], [0, 0, 1, 1], [], []>} : vector<8x32xf32>, vector<32x96xf32>, vector<8x96xf32> -> vector<8x96xf32>
    %70 = vector.broadcast %9 : vector<1x96xf32> to vector<8x96xf32>
    %71 = arith.addf %69, %70 : vector<8x96xf32>
    %72 = vector.extract_strided_slice %68 {offsets = [0, 0], sizes = [8, 64], strides = [1, 1]} : vector<8x96xf32> to vector<8x64xf32>
    %73 = vector.extract_strided_slice %71 {offsets = [0, 0], sizes = [8, 64], strides = [1, 1]} : vector<8x96xf32> to vector<8x64xf32>
    %74 = arith.addf %72, %73 : vector<8x64xf32>
    %75 = arith.negf %74 : vector<8x64xf32>
    %76 = math.exp %75 : vector<8x64xf32>
    %cst_23 = arith.constant 1.000000e+00 : f32
    %77 = vector.broadcast %cst_23 : f32 to vector<8x64xf32>
    %78 = arith.addf %77, %76 : vector<8x64xf32>
    %79 = arith.divf %77, %78 : vector<8x64xf32>
    %80 = vector.extract_strided_slice %79 {offsets = [0, 0], sizes = [8, 32], strides = [1, 1]} : vector<8x64xf32> to vector<8x32xf32>
    %81 = vector.extract_strided_slice %79 {offsets = [0, 32], sizes = [8, 32], strides = [1, 1]} : vector<8x64xf32> to vector<8x32xf32>
    %82 = vector.extract_strided_slice %68 {offsets = [0, 64], sizes = [8, 32], strides = [1, 1]} : vector<8x96xf32> to vector<8x32xf32>
    %83 = vector.extract_strided_slice %71 {offsets = [0, 64], sizes = [8, 32], strides = [1, 1]} : vector<8x96xf32> to vector<8x32xf32>
    %84 = arith.mulf %80, %83 : vector<8x32xf32>
    %85 = arith.addf %82, %84 : vector<8x32xf32>
    %86 = math.tanh %85 : vector<8x32xf32>
    %cst_24 = arith.constant 1.000000e+00 : f32
    %87 = vector.broadcast %cst_24 : f32 to vector<8x32xf32>
    %88 = arith.subf %87, %81 : vector<8x32xf32>
    %89 = arith.mulf %88, %86 : vector<8x32xf32>
    %90 = arith.mulf %81, %63 : vector<8x32xf32>
    %91 = arith.addf %89, %90 : vector<8x32xf32>
    %c2 = arith.constant 2 : index
    %c0_25 = arith.constant 0 : index
    %c0_26 = arith.constant 0 : index
    %92 = vector.load %arg19[%c2, %c0_25, %c0_26] : memref<8x8x32xf32, #tpu.memory_space<vmem>>, vector<1x8x32xf32>
    %93 = vector.shape_cast %92 : vector<1x8x32xf32> to vector<8x32xf32>
    %94 = vector.shape_cast %91 : vector<8x32xf32> to vector<1x8x32xf32>
    tpu.vector_store %arg19[%c2, %c0_25, %c0_26], %94 {strides = array<i32>} : memref<8x8x32xf32, #tpu.memory_space<vmem>>, vector<1x8x32xf32>,
    %95 = vector.extract_strided_slice %7 {offsets = [3, 0, 0], sizes = [1, 8, 96], strides = [1, 1, 1]} : vector<8x8x96xf32> to vector<1x8x96xf32>
    %96 = vector.shape_cast %95 : vector<1x8x96xf32> to vector<8x96xf32>
    %cst_27 = arith.constant dense<0.000000e+00> : vector<8x96xf32>
    %97 = tpu.matmul %91, %8, %cst_27 {dimension_numbers = #tpu.dot_dimension_numbers<[1], [0], [0], [1], [0, 0, 1, 1], [], []>} : vector<8x32xf32>, vector<32x96xf32>, vector<8x96xf32> -> vector<8x96xf32>
    %98 = vector.broadcast %9 : vector<1x96xf32> to vector<8x96xf32>
    %99 = arith.addf %97, %98 : vector<8x96xf32>
    %100 = vector.extract_strided_slice %96 {offsets = [0, 0], sizes = [8, 64], strides = [1, 1]} : vector<8x96xf32> to vector<8x64xf32>
    %101 = vector.extract_strided_slice %99 {offsets = [0, 0], sizes = [8, 64], strides = [1, 1]} : vector<8x96xf32> to vector<8x64xf32>
    %102 = arith.addf %100, %101 : vector<8x64xf32>
    %103 = arith.negf %102 : vector<8x64xf32>
    %104 = math.exp %103 : vector<8x64xf32>
    %cst_28 = arith.constant 1.000000e+00 : f32
    %105 = vector.broadcast %cst_28 : f32 to vector<8x64xf32>
    %106 = arith.addf %105, %104 : vector<8x64xf32>
    %107 = arith.divf %105, %106 : vector<8x64xf32>
    %108 = vector.extract_strided_slice %107 {offsets = [0, 0], sizes = [8, 32], strides = [1, 1]} : vector<8x64xf32> to vector<8x32xf32>
    %109 = vector.extract_strided_slice %107 {offsets = [0, 32], sizes = [8, 32], strides = [1, 1]} : vector<8x64xf32> to vector<8x32xf32>
    %110 = vector.extract_strided_slice %96 {offsets = [0, 64], sizes = [8, 32], strides = [1, 1]} : vector<8x96xf32> to vector<8x32xf32>
    %111 = vector.extract_strided_slice %99 {offsets = [0, 64], sizes = [8, 32], strides = [1, 1]} : vector<8x96xf32> to vector<8x32xf32>
    %112 = arith.mulf %108, %111 : vector<8x32xf32>
    %113 = arith.addf %110, %112 : vector<8x32xf32>
    %114 = math.tanh %113 : vector<8x32xf32>
    %cst_29 = arith.constant 1.000000e+00 : f32
    %115 = vector.broadcast %cst_29 : f32 to vector<8x32xf32>
    %116 = arith.subf %115, %109 : vector<8x32xf32>
    %117 = arith.mulf %116, %114 : vector<8x32xf32>
    %118 = arith.mulf %109, %91 : vector<8x32xf32>
    %119 = arith.addf %117, %118 : vector<8x32xf32>
    %c3 = arith.constant 3 : index
    %c0_30 = arith.constant 0 : index
    %c0_31 = arith.constant 0 : index
    %120 = vector.load %arg19[%c3, %c0_30, %c0_31] : memref<8x8x32xf32, #tpu.memory_space<vmem>>, vector<1x8x32xf32>
    %121 = vector.shape_cast %120 : vector<1x8x32xf32> to vector<8x32xf32>
    %122 = vector.shape_cast %119 : vector<8x32xf32> to vector<1x8x32xf32>
    tpu.vector_store %arg19[%c3, %c0_30, %c0_31], %122 {strides = array<i32>} : memref<8x8x32xf32, #tpu.memory_space<vmem>>, vector<1x8x32xf32>,
    %123 = vector.extract_strided_slice %7 {offsets = [4, 0, 0], sizes = [1, 8, 96], strides = [1, 1, 1]} : vector<8x8x96xf32> to vector<1x8x96xf32>
    %124 = vector.shape_cast %123 : vector<1x8x96xf32> to vector<8x96xf32>
    %cst_32 = arith.constant dense<0.000000e+00> : vector<8x96xf32>
    %125 = tpu.matmul %119, %8, %cst_32 {dimension_numbers = #tpu.dot_dimension_numbers<[1], [0], [0], [1], [0, 0, 1, 1], [], []>} : vector<8x32xf32>, vector<32x96xf32>, vector<8x96xf32> -> vector<8x96xf32>
    %126 = vector.broadcast %9 : vector<1x96xf32> to vector<8x96xf32>
    %127 = arith.addf %125, %126 : vector<8x96xf32>
    %128 = vector.extract_strided_slice %124 {offsets = [0, 0], sizes = [8, 64], strides = [1, 1]} : vector<8x96xf32> to vector<8x64xf32>
    %129 = vector.extract_strided_slice %127 {offsets = [0, 0], sizes = [8, 64], strides = [1, 1]} : vector<8x96xf32> to vector<8x64xf32>
    %130 = arith.addf %128, %129 : vector<8x64xf32>
    %131 = arith.negf %130 : vector<8x64xf32>
    %132 = math.exp %131 : vector<8x64xf32>
    %cst_33 = arith.constant 1.000000e+00 : f32
    %133 = vector.broadcast %cst_33 : f32 to vector<8x64xf32>
    %134 = arith.addf %133, %132 : vector<8x64xf32>
    %135 = arith.divf %133, %134 : vector<8x64xf32>
    %136 = vector.extract_strided_slice %135 {offsets = [0, 0], sizes = [8, 32], strides = [1, 1]} : vector<8x64xf32> to vector<8x32xf32>
    %137 = vector.extract_strided_slice %135 {offsets = [0, 32], sizes = [8, 32], strides = [1, 1]} : vector<8x64xf32> to vector<8x32xf32>
    %138 = vector.extract_strided_slice %124 {offsets = [0, 64], sizes = [8, 32], strides = [1, 1]} : vector<8x96xf32> to vector<8x32xf32>
    %139 = vector.extract_strided_slice %127 {offsets = [0, 64], sizes = [8, 32], strides = [1, 1]} : vector<8x96xf32> to vector<8x32xf32>
    %140 = arith.mulf %136, %139 : vector<8x32xf32>
    %141 = arith.addf %138, %140 : vector<8x32xf32>
    %142 = math.tanh %141 : vector<8x32xf32>
    %cst_34 = arith.constant 1.000000e+00 : f32
    %143 = vector.broadcast %cst_34 : f32 to vector<8x32xf32>
    %144 = arith.subf %143, %137 : vector<8x32xf32>
    %145 = arith.mulf %144, %142 : vector<8x32xf32>
    %146 = arith.mulf %137, %119 : vector<8x32xf32>
    %147 = arith.addf %145, %146 : vector<8x32xf32>
    %c4 = arith.constant 4 : index
    %c0_35 = arith.constant 0 : index
    %c0_36 = arith.constant 0 : index
    %148 = vector.load %arg19[%c4, %c0_35, %c0_36] : memref<8x8x32xf32, #tpu.memory_space<vmem>>, vector<1x8x32xf32>
    %149 = vector.shape_cast %148 : vector<1x8x32xf32> to vector<8x32xf32>
    %150 = vector.shape_cast %147 : vector<8x32xf32> to vector<1x8x32xf32>
    tpu.vector_store %arg19[%c4, %c0_35, %c0_36], %150 {strides = array<i32>} : memref<8x8x32xf32, #tpu.memory_space<vmem>>, vector<1x8x32xf32>,
    %151 = vector.extract_strided_slice %7 {offsets = [5, 0, 0], sizes = [1, 8, 96], strides = [1, 1, 1]} : vector<8x8x96xf32> to vector<1x8x96xf32>
    %152 = vector.shape_cast %151 : vector<1x8x96xf32> to vector<8x96xf32>
    %cst_37 = arith.constant dense<0.000000e+00> : vector<8x96xf32>
    %153 = tpu.matmul %147, %8, %cst_37 {dimension_numbers = #tpu.dot_dimension_numbers<[1], [0], [0], [1], [0, 0, 1, 1], [], []>} : vector<8x32xf32>, vector<32x96xf32>, vector<8x96xf32> -> vector<8x96xf32>
    %154 = vector.broadcast %9 : vector<1x96xf32> to vector<8x96xf32>
    %155 = arith.addf %153, %154 : vector<8x96xf32>
    %156 = vector.extract_strided_slice %152 {offsets = [0, 0], sizes = [8, 64], strides = [1, 1]} : vector<8x96xf32> to vector<8x64xf32>
    %157 = vector.extract_strided_slice %155 {offsets = [0, 0], sizes = [8, 64], strides = [1, 1]} : vector<8x96xf32> to vector<8x64xf32>
    %158 = arith.addf %156, %157 : vector<8x64xf32>
    %159 = arith.negf %158 : vector<8x64xf32>
    %160 = math.exp %159 : vector<8x64xf32>
    %cst_38 = arith.constant 1.000000e+00 : f32
    %161 = vector.broadcast %cst_38 : f32 to vector<8x64xf32>
    %162 = arith.addf %161, %160 : vector<8x64xf32>
    %163 = arith.divf %161, %162 : vector<8x64xf32>
    %164 = vector.extract_strided_slice %163 {offsets = [0, 0], sizes = [8, 32], strides = [1, 1]} : vector<8x64xf32> to vector<8x32xf32>
    %165 = vector.extract_strided_slice %163 {offsets = [0, 32], sizes = [8, 32], strides = [1, 1]} : vector<8x64xf32> to vector<8x32xf32>
    %166 = vector.extract_strided_slice %152 {offsets = [0, 64], sizes = [8, 32], strides = [1, 1]} : vector<8x96xf32> to vector<8x32xf32>
    %167 = vector.extract_strided_slice %155 {offsets = [0, 64], sizes = [8, 32], strides = [1, 1]} : vector<8x96xf32> to vector<8x32xf32>
    %168 = arith.mulf %164, %167 : vector<8x32xf32>
    %169 = arith.addf %166, %168 : vector<8x32xf32>
    %170 = math.tanh %169 : vector<8x32xf32>
    %cst_39 = arith.constant 1.000000e+00 : f32
    %171 = vector.broadcast %cst_39 : f32 to vector<8x32xf32>
    %172 = arith.subf %171, %165 : vector<8x32xf32>
    %173 = arith.mulf %172, %170 : vector<8x32xf32>
    %174 = arith.mulf %165, %147 : vector<8x32xf32>
    %175 = arith.addf %173, %174 : vector<8x32xf32>
    %c5 = arith.constant 5 : index
    %c0_40 = arith.constant 0 : index
    %c0_41 = arith.constant 0 : index
    %176 = vector.load %arg19[%c5, %c0_40, %c0_41] : memref<8x8x32xf32, #tpu.memory_space<vmem>>, vector<1x8x32xf32>
    %177 = vector.shape_cast %176 : vector<1x8x32xf32> to vector<8x32xf32>
    %178 = vector.shape_cast %175 : vector<8x32xf32> to vector<1x8x32xf32>
    tpu.vector_store %arg19[%c5, %c0_40, %c0_41], %178 {strides = array<i32>} : memref<8x8x32xf32, #tpu.memory_space<vmem>>, vector<1x8x32xf32>,
    %179 = vector.extract_strided_slice %7 {offsets = [6, 0, 0], sizes = [1, 8, 96], strides = [1, 1, 1]} : vector<8x8x96xf32> to vector<1x8x96xf32>
    %180 = vector.shape_cast %179 : vector<1x8x96xf32> to vector<8x96xf32>
    %cst_42 = arith.constant dense<0.000000e+00> : vector<8x96xf32>
    %181 = tpu.matmul %175, %8, %cst_42 {dimension_numbers = #tpu.dot_dimension_numbers<[1], [0], [0], [1], [0, 0, 1, 1], [], []>} : vector<8x32xf32>, vector<32x96xf32>, vector<8x96xf32> -> vector<8x96xf32>
    %182 = vector.broadcast %9 : vector<1x96xf32> to vector<8x96xf32>
    %183 = arith.addf %181, %182 : vector<8x96xf32>
    %184 = vector.extract_strided_slice %180 {offsets = [0, 0], sizes = [8, 64], strides = [1, 1]} : vector<8x96xf32> to vector<8x64xf32>
    %185 = vector.extract_strided_slice %183 {offsets = [0, 0], sizes = [8, 64], strides = [1, 1]} : vector<8x96xf32> to vector<8x64xf32>
    %186 = arith.addf %184, %185 : vector<8x64xf32>
    %187 = arith.negf %186 : vector<8x64xf32>
    %188 = math.exp %187 : vector<8x64xf32>
    %cst_43 = arith.constant 1.000000e+00 : f32
    %189 = vector.broadcast %cst_43 : f32 to vector<8x64xf32>
    %190 = arith.addf %189, %188 : vector<8x64xf32>
    %191 = arith.divf %189, %190 : vector<8x64xf32>
    %192 = vector.extract_strided_slice %191 {offsets = [0, 0], sizes = [8, 32], strides = [1, 1]} : vector<8x64xf32> to vector<8x32xf32>
    %193 = vector.extract_strided_slice %191 {offsets = [0, 32], sizes = [8, 32], strides = [1, 1]} : vector<8x64xf32> to vector<8x32xf32>
    %194 = vector.extract_strided_slice %180 {offsets = [0, 64], sizes = [8, 32], strides = [1, 1]} : vector<8x96xf32> to vector<8x32xf32>
    %195 = vector.extract_strided_slice %183 {offsets = [0, 64], sizes = [8, 32], strides = [1, 1]} : vector<8x96xf32> to vector<8x32xf32>
    %196 = arith.mulf %192, %195 : vector<8x32xf32>
    %197 = arith.addf %194, %196 : vector<8x32xf32>
    %198 = math.tanh %197 : vector<8x32xf32>
    %cst_44 = arith.constant 1.000000e+00 : f32
    %199 = vector.broadcast %cst_44 : f32 to vector<8x32xf32>
    %200 = arith.subf %199, %193 : vector<8x32xf32>
    %201 = arith.mulf %200, %198 : vector<8x32xf32>
    %202 = arith.mulf %193, %175 : vector<8x32xf32>
    %203 = arith.addf %201, %202 : vector<8x32xf32>
    %c6 = arith.constant 6 : index
    %c0_45 = arith.constant 0 : index
    %c0_46 = arith.constant 0 : index
    %204 = vector.load %arg19[%c6, %c0_45, %c0_46] : memref<8x8x32xf32, #tpu.memory_space<vmem>>, vector<1x8x32xf32>
    %205 = vector.shape_cast %204 : vector<1x8x32xf32> to vector<8x32xf32>
    %206 = vector.shape_cast %203 : vector<8x32xf32> to vector<1x8x32xf32>
    tpu.vector_store %arg19[%c6, %c0_45, %c0_46], %206 {strides = array<i32>} : memref<8x8x32xf32, #tpu.memory_space<vmem>>, vector<1x8x32xf32>,
    %207 = vector.extract_strided_slice %7 {offsets = [7, 0, 0], sizes = [1, 8, 96], strides = [1, 1, 1]} : vector<8x8x96xf32> to vector<1x8x96xf32>
    %208 = vector.shape_cast %207 : vector<1x8x96xf32> to vector<8x96xf32>
    %cst_47 = arith.constant dense<0.000000e+00> : vector<8x96xf32>
    %209 = tpu.matmul %203, %8, %cst_47 {dimension_numbers = #tpu.dot_dimension_numbers<[1], [0], [0], [1], [0, 0, 1, 1], [], []>} : vector<8x32xf32>, vector<32x96xf32>, vector<8x96xf32> -> vector<8x96xf32>
    %210 = vector.broadcast %9 : vector<1x96xf32> to vector<8x96xf32>
    %211 = arith.addf %209, %210 : vector<8x96xf32>
    %212 = vector.extract_strided_slice %208 {offsets = [0, 0], sizes = [8, 64], strides = [1, 1]} : vector<8x96xf32> to vector<8x64xf32>
    %213 = vector.extract_strided_slice %211 {offsets = [0, 0], sizes = [8, 64], strides = [1, 1]} : vector<8x96xf32> to vector<8x64xf32>
    %214 = arith.addf %212, %213 : vector<8x64xf32>
    %215 = arith.negf %214 : vector<8x64xf32>
    %216 = math.exp %215 : vector<8x64xf32>
    %cst_48 = arith.constant 1.000000e+00 : f32
    %217 = vector.broadcast %cst_48 : f32 to vector<8x64xf32>
    %218 = arith.addf %217, %216 : vector<8x64xf32>
    %219 = arith.divf %217, %218 : vector<8x64xf32>
    %220 = vector.extract_strided_slice %219 {offsets = [0, 0], sizes = [8, 32], strides = [1, 1]} : vector<8x64xf32> to vector<8x32xf32>
    %221 = vector.extract_strided_slice %219 {offsets = [0, 32], sizes = [8, 32], strides = [1, 1]} : vector<8x64xf32> to vector<8x32xf32>
    %222 = vector.extract_strided_slice %208 {offsets = [0, 64], sizes = [8, 32], strides = [1, 1]} : vector<8x96xf32> to vector<8x32xf32>
    %223 = vector.extract_strided_slice %211 {offsets = [0, 64], sizes = [8, 32], strides = [1, 1]} : vector<8x96xf32> to vector<8x32xf32>
    %224 = arith.mulf %220, %223 : vector<8x32xf32>
    %225 = arith.addf %222, %224 : vector<8x32xf32>
    %226 = math.tanh %225 : vector<8x32xf32>
    %cst_49 = arith.constant 1.000000e+00 : f32
    %227 = vector.broadcast %cst_49 : f32 to vector<8x32xf32>
    %228 = arith.subf %227, %221 : vector<8x32xf32>
    %229 = arith.mulf %228, %226 : vector<8x32xf32>
    %230 = arith.mulf %221, %203 : vector<8x32xf32>
    %231 = arith.addf %229, %230 : vector<8x32xf32>
    %c7 = arith.constant 7 : index
    %c0_50 = arith.constant 0 : index
    %c0_51 = arith.constant 0 : index
    %232 = vector.load %arg19[%c7, %c0_50, %c0_51] : memref<8x8x32xf32, #tpu.memory_space<vmem>>, vector<1x8x32xf32>
    %233 = vector.shape_cast %232 : vector<1x8x32xf32> to vector<8x32xf32>
    %234 = vector.shape_cast %231 : vector<8x32xf32> to vector<1x8x32xf32>
    tpu.vector_store %arg19[%c7, %c0_50, %c0_51], %234 {strides = array<i32>} : memref<8x8x32xf32, #tpu.memory_space<vmem>>, vector<1x8x32xf32>,
    %c0_52 = arith.constant 0 : index
    %c0_53 = arith.constant 0 : index
    %235 = vector.load %arg7[%c0_52, %c0_53] : memref<32x32xf32, #tpu.memory_space<vmem>>, vector<32x32xf32>
    %c0_54 = arith.constant 0 : index
    %c0_55 = arith.constant 0 : index
    %236 = vector.load %arg10[%c0_54, %c0_55] : memref<32x32xf32, #tpu.memory_space<vmem>>, vector<32x32xf32>
    %c0_56 = arith.constant 0 : index
    %c0_57 = arith.constant 0 : index
    %c0_58 = arith.constant 0 : index
    %237 = vector.load %arg19[%c0_56, %c0_57, %c0_58] : memref<8x8x32xf32, #tpu.memory_space<vmem>>, vector<8x8x32xf32>
    %238 = vector.shape_cast %237 : vector<8x8x32xf32> to vector<64x32xf32>
    %c0_59 = arith.constant 0 : index
    %c0_60 = arith.constant 0 : index
    %239 = vector.load %arg8[%c0_59, %c0_60] : memref<32x32xf32, #tpu.memory_space<vmem>>, vector<32x32xf32>
    %cst_61 = arith.constant dense<0.000000e+00> : vector<64x32xf32>
    %240 = tpu.matmul %238, %239, %cst_61 {dimension_numbers = #tpu.dot_dimension_numbers<[1], [0], [0], [1], [0, 0, 1, 1], [], []>} : vector<64x32xf32>, vector<32x32xf32>, vector<64x32xf32> -> vector<64x32xf32>
    %c0_62 = arith.constant 0 : index
    %c0_63 = arith.constant 0 : index
    %241 = vector.load %arg9[%c0_62, %c0_63] : memref<1x32xf32, #tpu.memory_space<vmem>>, vector<1x32xf32>
    %242 = vector.broadcast %241 : vector<1x32xf32> to vector<64x32xf32>
    %243 = arith.addf %240, %242 : vector<64x32xf32>
    %244 = vector.shape_cast %243 : vector<64x32xf32> to vector<8x8x32xf32>
    %245 = tpu.iota {dimensions = array<i32: 1>} : vector<8x128xi32>
    %cst_64 = arith.constant 0.000000e+00 : f32
    %246 = vector.broadcast %cst_64 : f32 to vector<8x128xf32>
    %c0_65 = arith.constant 0 : index
    %c0_66 = arith.constant 0 : index
    %c0_67 = arith.constant 0 : index
    %247 = vector.load %arg18[%c0_65, %c0_66, %c0_67] : memref<6x8x128xf32, #tpu.memory_space<vmem>>, vector<1x8x128xf32>
    %248 = vector.shape_cast %247 : vector<1x8x128xf32> to vector<8x128xf32>
    %249 = vector.shape_cast %246 : vector<8x128xf32> to vector<1x8x128xf32>
    tpu.vector_store %arg18[%c0_65, %c0_66, %c0_67], %249 {strides = array<i32>} : memref<6x8x128xf32, #tpu.memory_space<vmem>>, vector<1x8x128xf32>,
    %c0_68 = arith.constant 0 : index
    %c0_69 = arith.constant 0 : index
    %c0_70 = arith.constant 0 : index
    %250 = vector.load %arg2[%c0_68, %c0_69, %c0_70] : memref<6x8x32xf32, #tpu.memory_space<vmem>>, vector<1x8x32xf32>
    %251 = vector.shape_cast %250 : vector<1x8x32xf32> to vector<8x32xf32>
    %c0_71 = arith.constant 0 : index
    %c0_72 = arith.constant 0 : index
    %252 = vector.load %arg20[%c0_71, %c0_72] : memref<8x32xf32, #tpu.memory_space<vmem>>, vector<8x32xf32>
    tpu.vector_store %arg20[%c0_71, %c0_72], %251 {strides = array<i32>} : memref<8x32xf32, #tpu.memory_space<vmem>>, vector<8x32xf32>,
    %c0_73 = arith.constant 0 : index
    %c0_74 = arith.constant 0 : index
    %253 = vector.load %arg20[%c0_73, %c0_74] : memref<8x32xf32, #tpu.memory_space<vmem>>, vector<8x32xf32>
    %cst_75 = arith.constant dense<0.000000e+00> : vector<8x32xf32>
    %254 = tpu.matmul %231, %235, %cst_75 {dimension_numbers = #tpu.dot_dimension_numbers<[1], [0], [0], [1], [0, 0, 1, 1], [], []>} : vector<8x32xf32>, vector<32x32xf32>, vector<8x32xf32> -> vector<8x32xf32>
    %255 = vector.shape_cast %254 : vector<8x32xf32> to vector<1x8x32xf32>
    %256 = vector.broadcast %255 : vector<1x8x32xf32> to vector<8x8x32xf32>
    %257 = arith.addf %244, %256 : vector<8x8x32xf32>
    %258 = math.tanh %257 : vector<8x8x32xf32>
    %259 = vector.shape_cast %258 : vector<8x8x32xf32> to vector<64x32xf32>
    %cst_76 = arith.constant dense<0.000000e+00> : vector<64x32xf32>
    %260 = tpu.matmul %259, %236, %cst_76 {dimension_numbers = #tpu.dot_dimension_numbers<[1], [0], [0], [1], [0, 0, 1, 1], [], []>} : vector<64x32xf32>, vector<32x32xf32>, vector<64x32xf32> -> vector<64x32xf32>
    %261 = vector.shape_cast %260 : vector<64x32xf32> to vector<8x8x32xf32>
    %cst_77 = arith.constant dense<0xFF800000> : vector<8x32xf32>
    %262 = vector.multi_reduction <maximumf>, %261, %cst_77 [0] : vector<8x8x32xf32> to vector<8x32xf32>
    %263 = vector.shape_cast %262 : vector<8x32xf32> to vector<1x8x32xf32>
    %264 = vector.broadcast %263 : vector<1x8x32xf32> to vector<8x8x32xf32>
    %265 = arith.subf %261, %264 : vector<8x8x32xf32>
    %266 = math.exp %265 : vector<8x8x32xf32>
    %cst_78 = arith.constant dense<0.000000e+00> : vector<8x32xf32>
    %267 = vector.multi_reduction <add>, %266, %cst_78 [0] : vector<8x8x32xf32> to vector<8x32xf32>
    %268 = vector.shape_cast %267 : vector<8x32xf32> to vector<1x8x32xf32>
    %269 = tpu.reciprocal %268 {approx = true} : vector<1x8x32xf32> -> vector<1x8x32xf32>
    %270 = vector.broadcast %269 : vector<1x8x32xf32> to vector<8x8x32xf32>
    %271 = arith.mulf %266, %270 : vector<8x8x32xf32>
    %c0_79 = arith.constant 0 : index
    %c0_80 = arith.constant 0 : index
    %c0_81 = arith.constant 0 : index
    %272 = vector.load %arg19[%c0_79, %c0_80, %c0_81] : memref<8x8x32xf32, #tpu.memory_space<vmem>>, vector<8x8x32xf32>
    %273 = arith.mulf %271, %272 : vector<8x8x32xf32>
    %cst_82 = arith.constant dense<0.000000e+00> : vector<8x32xf32>
    %274 = vector.multi_reduction <add>, %273, %cst_82 [0] : vector<8x8x32xf32> to vector<8x32xf32>
    %275 = tpu.concatenate %253, %274 in 1 : vector<8x32xf32>, vector<8x32xf32> -> vector<8x64xf32>
    %c0_83 = arith.constant 0 : index
    %c0_84 = arith.constant 0 : index
    %276 = vector.load %arg11[%c0_83, %c0_84] : memref<64x96xf32, #tpu.memory_space<vmem>>, vector<64x96xf32>
    %cst_85 = arith.constant dense<0.000000e+00> : vector<8x96xf32>
    %277 = tpu.matmul %275, %276, %cst_85 {dimension_numbers = #tpu.dot_dimension_numbers<[1], [0], [0], [1], [0, 0, 1, 1], [], []>} : vector<8x64xf32>, vector<64x96xf32>, vector<8x96xf32> -> vector<8x96xf32>
    %c0_86 = arith.constant 0 : index
    %c0_87 = arith.constant 0 : index
    %278 = vector.load %arg13[%c0_86, %c0_87] : memref<1x96xf32, #tpu.memory_space<vmem>>, vector<1x96xf32>
    %279 = vector.broadcast %278 : vector<1x96xf32> to vector<8x96xf32>
    %280 = arith.addf %277, %279 : vector<8x96xf32>
    %c0_88 = arith.constant 0 : index
    %c0_89 = arith.constant 0 : index
    %281 = vector.load %arg12[%c0_88, %c0_89] : memref<32x96xf32, #tpu.memory_space<vmem>>, vector<32x96xf32>
    %cst_90 = arith.constant dense<0.000000e+00> : vector<8x96xf32>
    %282 = tpu.matmul %231, %281, %cst_90 {dimension_numbers = #tpu.dot_dimension_numbers<[1], [0], [0], [1], [0, 0, 1, 1], [], []>} : vector<8x32xf32>, vector<32x96xf32>, vector<8x96xf32> -> vector<8x96xf32>
    %c0_91 = arith.constant 0 : index
    %c0_92 = arith.constant 0 : index
    %283 = vector.load %arg14[%c0_91, %c0_92] : memref<1x96xf32, #tpu.memory_space<vmem>>, vector<1x96xf32>
    %284 = vector.broadcast %283 : vector<1x96xf32> to vector<8x96xf32>
    %285 = arith.addf %282, %284 : vector<8x96xf32>
    %286 = vector.extract_strided_slice %280 {offsets = [0, 0], sizes = [8, 64], strides = [1, 1]} : vector<8x96xf32> to vector<8x64xf32>
    %287 = vector.extract_strided_slice %285 {offsets = [0, 0], sizes = [8, 64], strides = [1, 1]} : vector<8x96xf32> to vector<8x64xf32>
    %288 = arith.addf %286, %287 : vector<8x64xf32>
    %289 = arith.negf %288 : vector<8x64xf32>
    %290 = math.exp %289 : vector<8x64xf32>
    %cst_93 = arith.constant 1.000000e+00 : f32
    %291 = vector.broadcast %cst_93 : f32 to vector<8x64xf32>
    %292 = arith.addf %291, %290 : vector<8x64xf32>
    %293 = arith.divf %291, %292 : vector<8x64xf32>
    %294 = vector.extract_strided_slice %293 {offsets = [0, 0], sizes = [8, 32], strides = [1, 1]} : vector<8x64xf32> to vector<8x32xf32>
    %295 = vector.extract_strided_slice %293 {offsets = [0, 32], sizes = [8, 32], strides = [1, 1]} : vector<8x64xf32> to vector<8x32xf32>
    %296 = vector.extract_strided_slice %280 {offsets = [0, 64], sizes = [8, 32], strides = [1, 1]} : vector<8x96xf32> to vector<8x32xf32>
    %297 = vector.extract_strided_slice %285 {offsets = [0, 64], sizes = [8, 32], strides = [1, 1]} : vector<8x96xf32> to vector<8x32xf32>
    %298 = arith.mulf %294, %297 : vector<8x32xf32>
    %299 = arith.addf %296, %298 : vector<8x32xf32>
    %300 = math.tanh %299 : vector<8x32xf32>
    %cst_94 = arith.constant 1.000000e+00 : f32
    %301 = vector.broadcast %cst_94 : f32 to vector<8x32xf32>
    %302 = arith.subf %301, %295 : vector<8x32xf32>
    %303 = arith.mulf %302, %300 : vector<8x32xf32>
    %304 = arith.mulf %295, %231 : vector<8x32xf32>
    %305 = arith.addf %303, %304 : vector<8x32xf32>
    %306 = tpu.concatenate %305, %274, %253 in 1 : vector<8x32xf32>, vector<8x32xf32>, vector<8x32xf32> -> vector<8x96xf32>
    %c0_95 = arith.constant 0 : index
    %c0_96 = arith.constant 0 : index
    %307 = vector.load %arg15[%c0_95, %c0_96] : memref<96x128xf32, #tpu.memory_space<vmem>>, vector<96x128xf32>
    %cst_97 = arith.constant dense<0.000000e+00> : vector<8x128xf32>
    %308 = tpu.matmul %306, %307, %cst_97 {dimension_numbers = #tpu.dot_dimension_numbers<[1], [0], [0], [1], [0, 0, 1, 1], [], []>} : vector<8x96xf32>, vector<96x128xf32>, vector<8x128xf32> -> vector<8x128xf32>
    %c0_98 = arith.constant 0 : index
    %c0_99 = arith.constant 0 : index
    %309 = vector.load %arg16[%c0_98, %c0_99] : memref<1x128xf32, #tpu.memory_space<vmem>>, vector<1x128xf32>
    %310 = vector.broadcast %309 : vector<1x128xf32> to vector<8x128xf32>
    %311 = arith.addf %308, %310 : vector<8x128xf32>
    %c1_100 = arith.constant 1 : index
    %c0_101 = arith.constant 0 : index
    %c0_102 = arith.constant 0 : index
    %312 = vector.load %arg18[%c1_100, %c0_101, %c0_102] : memref<6x8x128xf32, #tpu.memory_space<vmem>>, vector<1x8x128xf32>
    %313 = vector.shape_cast %312 : vector<1x8x128xf32> to vector<8x128xf32>
    %314 = vector.shape_cast %311 : vector<8x128xf32> to vector<1x8x128xf32>
    tpu.vector_store %arg18[%c1_100, %c0_101, %c0_102], %314 {strides = array<i32>} : memref<6x8x128xf32, #tpu.memory_space<vmem>>, vector<1x8x128xf32>,
    %c1_103 = arith.constant 1 : index
    %315 = memref.load %arg0[%c1_103] : memref<6xi32, #tpu.memory_space<smem>>
    %c0_i32 = arith.constant 0 : i32
    %316 = arith.cmpi sgt, %315, %c0_i32 : i32
    %317 = arith.extui %316 : i1 to i32
    %c0_i32_104 = arith.constant 0 : i32
    %318 = arith.cmpi ne, %317, %c0_i32_104 : i32
    scf.if %318 {
      %c1_242 = arith.constant 1 : index
      %c0_243 = arith.constant 0 : index
      %c0_244 = arith.constant 0 : index
      %591 = vector.load %arg2[%c1_242, %c0_243, %c0_244] : memref<6x8x32xf32, #tpu.memory_space<vmem>>, vector<1x8x32xf32>
      %592 = vector.shape_cast %591 : vector<1x8x32xf32> to vector<8x32xf32>
      %c0_245 = arith.constant 0 : index
      %c0_246 = arith.constant 0 : index
      %593 = vector.load %arg20[%c0_245, %c0_246] : memref<8x32xf32, #tpu.memory_space<vmem>>, vector<8x32xf32>
      tpu.vector_store %arg20[%c0_245, %c0_246], %592 {strides = array<i32>} : memref<8x32xf32, #tpu.memory_space<vmem>>, vector<8x32xf32>,
    } else {
    }
    %c0_i32_105 = arith.constant 0 : i32
    %319 = arith.cmpi eq, %315, %c0_i32_105 : i32
    %320 = arith.extui %319 : i1 to i32
    %c0_i32_106 = arith.constant 0 : i32
    %321 = arith.cmpi ne, %320, %c0_i32_106 : i32
    scf.if %321 {
      %591 = tpu.reduce_index %311 {axis = 1 : i32, kind = #tpu.reduction_kind<arg_max>} : vector<8x128xf32> -> vector<8xi32>
      %592 = vector.shape_cast %591 : vector<8xi32> to vector<8x1xi32>
      %593 = vector.broadcast %592 : vector<8x1xi32> to vector<8x128xi32>
      %594 = arith.cmpi eq, %245, %593 : vector<8x128xi32>
      %595 = arith.extui %594 : vector<8x128xi1> to vector<8x128xi32>
      %596 = arith.sitofp %595 : vector<8x128xi32> to vector<8x128xf32>
      %c0_242 = arith.constant 0 : index
      %c0_243 = arith.constant 0 : index
      %597 = vector.load %arg17[%c0_242, %c0_243] : memref<128x32xf32, #tpu.memory_space<vmem>>, vector<128x32xf32>
      %cst_244 = arith.constant dense<0.000000e+00> : vector<8x32xf32>
      %598 = tpu.matmul %596, %597, %cst_244 {dimension_numbers = #tpu.dot_dimension_numbers<[1], [0], [0], [1], [0, 0, 1, 1], [], []>} : vector<8x128xf32>, vector<128x32xf32>, vector<8x32xf32> -> vector<8x32xf32>
      %c0_245 = arith.constant 0 : index
      %c0_246 = arith.constant 0 : index
      %599 = vector.load %arg20[%c0_245, %c0_246] : memref<8x32xf32, #tpu.memory_space<vmem>>, vector<8x32xf32>
      tpu.vector_store %arg20[%c0_245, %c0_246], %598 {strides = array<i32>} : memref<8x32xf32, #tpu.memory_space<vmem>>, vector<8x32xf32>,
    } else {
    }
    %c0_107 = arith.constant 0 : index
    %c0_108 = arith.constant 0 : index
    %322 = vector.load %arg20[%c0_107, %c0_108] : memref<8x32xf32, #tpu.memory_space<vmem>>, vector<8x32xf32>
    %cst_109 = arith.constant dense<0.000000e+00> : vector<8x32xf32>
    %323 = tpu.matmul %305, %235, %cst_109 {dimension_numbers = #tpu.dot_dimension_numbers<[1], [0], [0], [1], [0, 0, 1, 1], [], []>} : vector<8x32xf32>, vector<32x32xf32>, vector<8x32xf32> -> vector<8x32xf32>
    %324 = vector.shape_cast %323 : vector<8x32xf32> to vector<1x8x32xf32>
    %325 = vector.broadcast %324 : vector<1x8x32xf32> to vector<8x8x32xf32>
    %326 = arith.addf %244, %325 : vector<8x8x32xf32>
    %327 = math.tanh %326 : vector<8x8x32xf32>
    %328 = vector.shape_cast %327 : vector<8x8x32xf32> to vector<64x32xf32>
    %cst_110 = arith.constant dense<0.000000e+00> : vector<64x32xf32>
    %329 = tpu.matmul %328, %236, %cst_110 {dimension_numbers = #tpu.dot_dimension_numbers<[1], [0], [0], [1], [0, 0, 1, 1], [], []>} : vector<64x32xf32>, vector<32x32xf32>, vector<64x32xf32> -> vector<64x32xf32>
    %330 = vector.shape_cast %329 : vector<64x32xf32> to vector<8x8x32xf32>
    %cst_111 = arith.constant dense<0xFF800000> : vector<8x32xf32>
    %331 = vector.multi_reduction <maximumf>, %330, %cst_111 [0] : vector<8x8x32xf32> to vector<8x32xf32>
    %332 = vector.shape_cast %331 : vector<8x32xf32> to vector<1x8x32xf32>
    %333 = vector.broadcast %332 : vector<1x8x32xf32> to vector<8x8x32xf32>
    %334 = arith.subf %330, %333 : vector<8x8x32xf32>
    %335 = math.exp %334 : vector<8x8x32xf32>
    %cst_112 = arith.constant dense<0.000000e+00> : vector<8x32xf32>
    %336 = vector.multi_reduction <add>, %335, %cst_112 [0] : vector<8x8x32xf32> to vector<8x32xf32>
    %337 = vector.shape_cast %336 : vector<8x32xf32> to vector<1x8x32xf32>
    %338 = tpu.reciprocal %337 {approx = true} : vector<1x8x32xf32> -> vector<1x8x32xf32>
    %339 = vector.broadcast %338 : vector<1x8x32xf32> to vector<8x8x32xf32>
    %340 = arith.mulf %335, %339 : vector<8x8x32xf32>
    %c0_113 = arith.constant 0 : index
    %c0_114 = arith.constant 0 : index
    %c0_115 = arith.constant 0 : index
    %341 = vector.load %arg19[%c0_113, %c0_114, %c0_115] : memref<8x8x32xf32, #tpu.memory_space<vmem>>, vector<8x8x32xf32>
    %342 = arith.mulf %340, %341 : vector<8x8x32xf32>
    %cst_116 = arith.constant dense<0.000000e+00> : vector<8x32xf32>
    %343 = vector.multi_reduction <add>, %342, %cst_116 [0] : vector<8x8x32xf32> to vector<8x32xf32>
    %344 = tpu.concatenate %322, %343 in 1 : vector<8x32xf32>, vector<8x32xf32> -> vector<8x64xf32>
    %c0_117 = arith.constant 0 : index
    %c0_118 = arith.constant 0 : index
    %345 = vector.load %arg11[%c0_117, %c0_118] : memref<64x96xf32, #tpu.memory_space<vmem>>, vector<64x96xf32>
    %cst_119 = arith.constant dense<0.000000e+00> : vector<8x96xf32>
    %346 = tpu.matmul %344, %345, %cst_119 {dimension_numbers = #tpu.dot_dimension_numbers<[1], [0], [0], [1], [0, 0, 1, 1], [], []>} : vector<8x64xf32>, vector<64x96xf32>, vector<8x96xf32> -> vector<8x96xf32>
    %c0_120 = arith.constant 0 : index
    %c0_121 = arith.constant 0 : index
    %347 = vector.load %arg13[%c0_120, %c0_121] : memref<1x96xf32, #tpu.memory_space<vmem>>, vector<1x96xf32>
    %348 = vector.broadcast %347 : vector<1x96xf32> to vector<8x96xf32>
    %349 = arith.addf %346, %348 : vector<8x96xf32>
    %c0_122 = arith.constant 0 : index
    %c0_123 = arith.constant 0 : index
    %350 = vector.load %arg12[%c0_122, %c0_123] : memref<32x96xf32, #tpu.memory_space<vmem>>, vector<32x96xf32>
    %cst_124 = arith.constant dense<0.000000e+00> : vector<8x96xf32>
    %351 = tpu.matmul %305, %350, %cst_124 {dimension_numbers = #tpu.dot_dimension_numbers<[1], [0], [0], [1], [0, 0, 1, 1], [], []>} : vector<8x32xf32>, vector<32x96xf32>, vector<8x96xf32> -> vector<8x96xf32>
    %c0_125 = arith.constant 0 : index
    %c0_126 = arith.constant 0 : index
    %352 = vector.load %arg14[%c0_125, %c0_126] : memref<1x96xf32, #tpu.memory_space<vmem>>, vector<1x96xf32>
    %353 = vector.broadcast %352 : vector<1x96xf32> to vector<8x96xf32>
    %354 = arith.addf %351, %353 : vector<8x96xf32>
    %355 = vector.extract_strided_slice %349 {offsets = [0, 0], sizes = [8, 64], strides = [1, 1]} : vector<8x96xf32> to vector<8x64xf32>
    %356 = vector.extract_strided_slice %354 {offsets = [0, 0], sizes = [8, 64], strides = [1, 1]} : vector<8x96xf32> to vector<8x64xf32>
    %357 = arith.addf %355, %356 : vector<8x64xf32>
    %358 = arith.negf %357 : vector<8x64xf32>
    %359 = math.exp %358 : vector<8x64xf32>
    %cst_127 = arith.constant 1.000000e+00 : f32
    %360 = vector.broadcast %cst_127 : f32 to vector<8x64xf32>
    %361 = arith.addf %360, %359 : vector<8x64xf32>
    %362 = arith.divf %360, %361 : vector<8x64xf32>
    %363 = vector.extract_strided_slice %362 {offsets = [0, 0], sizes = [8, 32], strides = [1, 1]} : vector<8x64xf32> to vector<8x32xf32>
    %364 = vector.extract_strided_slice %362 {offsets = [0, 32], sizes = [8, 32], strides = [1, 1]} : vector<8x64xf32> to vector<8x32xf32>
    %365 = vector.extract_strided_slice %349 {offsets = [0, 64], sizes = [8, 32], strides = [1, 1]} : vector<8x96xf32> to vector<8x32xf32>
    %366 = vector.extract_strided_slice %354 {offsets = [0, 64], sizes = [8, 32], strides = [1, 1]} : vector<8x96xf32> to vector<8x32xf32>
    %367 = arith.mulf %363, %366 : vector<8x32xf32>
    %368 = arith.addf %365, %367 : vector<8x32xf32>
    %369 = math.tanh %368 : vector<8x32xf32>
    %cst_128 = arith.constant 1.000000e+00 : f32
    %370 = vector.broadcast %cst_128 : f32 to vector<8x32xf32>
    %371 = arith.subf %370, %364 : vector<8x32xf32>
    %372 = arith.mulf %371, %369 : vector<8x32xf32>
    %373 = arith.mulf %364, %305 : vector<8x32xf32>
    %374 = arith.addf %372, %373 : vector<8x32xf32>
    %375 = tpu.concatenate %374, %343, %322 in 1 : vector<8x32xf32>, vector<8x32xf32>, vector<8x32xf32> -> vector<8x96xf32>
    %c0_129 = arith.constant 0 : index
    %c0_130 = arith.constant 0 : index
    %376 = vector.load %arg15[%c0_129, %c0_130] : memref<96x128xf32, #tpu.memory_space<vmem>>, vector<96x128xf32>
    %cst_131 = arith.constant dense<0.000000e+00> : vector<8x128xf32>
    %377 = tpu.matmul %375, %376, %cst_131 {dimension_numbers = #tpu.dot_dimension_numbers<[1], [0], [0], [1], [0, 0, 1, 1], [], []>} : vector<8x96xf32>, vector<96x128xf32>, vector<8x128xf32> -> vector<8x128xf32>
    %c0_132 = arith.constant 0 : index
    %c0_133 = arith.constant 0 : index
    %378 = vector.load %arg16[%c0_132, %c0_133] : memref<1x128xf32, #tpu.memory_space<vmem>>, vector<1x128xf32>
    %379 = vector.broadcast %378 : vector<1x128xf32> to vector<8x128xf32>
    %380 = arith.addf %377, %379 : vector<8x128xf32>
    %c2_134 = arith.constant 2 : index
    %c0_135 = arith.constant 0 : index
    %c0_136 = arith.constant 0 : index
    %381 = vector.load %arg18[%c2_134, %c0_135, %c0_136] : memref<6x8x128xf32, #tpu.memory_space<vmem>>, vector<1x8x128xf32>
    %382 = vector.shape_cast %381 : vector<1x8x128xf32> to vector<8x128xf32>
    %383 = vector.shape_cast %380 : vector<8x128xf32> to vector<1x8x128xf32>
    tpu.vector_store %arg18[%c2_134, %c0_135, %c0_136], %383 {strides = array<i32>} : memref<6x8x128xf32, #tpu.memory_space<vmem>>, vector<1x8x128xf32>,
    %c2_137 = arith.constant 2 : index
    %384 = memref.load %arg0[%c2_137] : memref<6xi32, #tpu.memory_space<smem>>
    %c0_i32_138 = arith.constant 0 : i32
    %385 = arith.cmpi sgt, %384, %c0_i32_138 : i32
    %386 = arith.extui %385 : i1 to i32
    %c0_i32_139 = arith.constant 0 : i32
    %387 = arith.cmpi ne, %386, %c0_i32_139 : i32
    scf.if %387 {
      %c2_242 = arith.constant 2 : index
      %c0_243 = arith.constant 0 : index
      %c0_244 = arith.constant 0 : index
      %591 = vector.load %arg2[%c2_242, %c0_243, %c0_244] : memref<6x8x32xf32, #tpu.memory_space<vmem>>, vector<1x8x32xf32>
      %592 = vector.shape_cast %591 : vector<1x8x32xf32> to vector<8x32xf32>
      %c0_245 = arith.constant 0 : index
      %c0_246 = arith.constant 0 : index
      %593 = vector.load %arg20[%c0_245, %c0_246] : memref<8x32xf32, #tpu.memory_space<vmem>>, vector<8x32xf32>
      tpu.vector_store %arg20[%c0_245, %c0_246], %592 {strides = array<i32>} : memref<8x32xf32, #tpu.memory_space<vmem>>, vector<8x32xf32>,
    } else {
    }
    %c0_i32_140 = arith.constant 0 : i32
    %388 = arith.cmpi eq, %384, %c0_i32_140 : i32
    %389 = arith.extui %388 : i1 to i32
    %c0_i32_141 = arith.constant 0 : i32
    %390 = arith.cmpi ne, %389, %c0_i32_141 : i32
    scf.if %390 {
      %591 = tpu.reduce_index %380 {axis = 1 : i32, kind = #tpu.reduction_kind<arg_max>} : vector<8x128xf32> -> vector<8xi32>
      %592 = vector.shape_cast %591 : vector<8xi32> to vector<8x1xi32>
      %593 = vector.broadcast %592 : vector<8x1xi32> to vector<8x128xi32>
      %594 = arith.cmpi eq, %245, %593 : vector<8x128xi32>
      %595 = arith.extui %594 : vector<8x128xi1> to vector<8x128xi32>
      %596 = arith.sitofp %595 : vector<8x128xi32> to vector<8x128xf32>
      %c0_242 = arith.constant 0 : index
      %c0_243 = arith.constant 0 : index
      %597 = vector.load %arg17[%c0_242, %c0_243] : memref<128x32xf32, #tpu.memory_space<vmem>>, vector<128x32xf32>
      %cst_244 = arith.constant dense<0.000000e+00> : vector<8x32xf32>
      %598 = tpu.matmul %596, %597, %cst_244 {dimension_numbers = #tpu.dot_dimension_numbers<[1], [0], [0], [1], [0, 0, 1, 1], [], []>} : vector<8x128xf32>, vector<128x32xf32>, vector<8x32xf32> -> vector<8x32xf32>
      %c0_245 = arith.constant 0 : index
      %c0_246 = arith.constant 0 : index
      %599 = vector.load %arg20[%c0_245, %c0_246] : memref<8x32xf32, #tpu.memory_space<vmem>>, vector<8x32xf32>
      tpu.vector_store %arg20[%c0_245, %c0_246], %598 {strides = array<i32>} : memref<8x32xf32, #tpu.memory_space<vmem>>, vector<8x32xf32>,
    } else {
    }
    %c0_142 = arith.constant 0 : index
    %c0_143 = arith.constant 0 : index
    %391 = vector.load %arg20[%c0_142, %c0_143] : memref<8x32xf32, #tpu.memory_space<vmem>>, vector<8x32xf32>
    %cst_144 = arith.constant dense<0.000000e+00> : vector<8x32xf32>
    %392 = tpu.matmul %374, %235, %cst_144 {dimension_numbers = #tpu.dot_dimension_numbers<[1], [0], [0], [1], [0, 0, 1, 1], [], []>} : vector<8x32xf32>, vector<32x32xf32>, vector<8x32xf32> -> vector<8x32xf32>
    %393 = vector.shape_cast %392 : vector<8x32xf32> to vector<1x8x32xf32>
    %394 = vector.broadcast %393 : vector<1x8x32xf32> to vector<8x8x32xf32>
    %395 = arith.addf %244, %394 : vector<8x8x32xf32>
    %396 = math.tanh %395 : vector<8x8x32xf32>
    %397 = vector.shape_cast %396 : vector<8x8x32xf32> to vector<64x32xf32>
    %cst_145 = arith.constant dense<0.000000e+00> : vector<64x32xf32>
    %398 = tpu.matmul %397, %236, %cst_145 {dimension_numbers = #tpu.dot_dimension_numbers<[1], [0], [0], [1], [0, 0, 1, 1], [], []>} : vector<64x32xf32>, vector<32x32xf32>, vector<64x32xf32> -> vector<64x32xf32>
    %399 = vector.shape_cast %398 : vector<64x32xf32> to vector<8x8x32xf32>
    %cst_146 = arith.constant dense<0xFF800000> : vector<8x32xf32>
    %400 = vector.multi_reduction <maximumf>, %399, %cst_146 [0] : vector<8x8x32xf32> to vector<8x32xf32>
    %401 = vector.shape_cast %400 : vector<8x32xf32> to vector<1x8x32xf32>
    %402 = vector.broadcast %401 : vector<1x8x32xf32> to vector<8x8x32xf32>
    %403 = arith.subf %399, %402 : vector<8x8x32xf32>
    %404 = math.exp %403 : vector<8x8x32xf32>
    %cst_147 = arith.constant dense<0.000000e+00> : vector<8x32xf32>
    %405 = vector.multi_reduction <add>, %404, %cst_147 [0] : vector<8x8x32xf32> to vector<8x32xf32>
    %406 = vector.shape_cast %405 : vector<8x32xf32> to vector<1x8x32xf32>
    %407 = tpu.reciprocal %406 {approx = true} : vector<1x8x32xf32> -> vector<1x8x32xf32>
    %408 = vector.broadcast %407 : vector<1x8x32xf32> to vector<8x8x32xf32>
    %409 = arith.mulf %404, %408 : vector<8x8x32xf32>
    %c0_148 = arith.constant 0 : index
    %c0_149 = arith.constant 0 : index
    %c0_150 = arith.constant 0 : index
    %410 = vector.load %arg19[%c0_148, %c0_149, %c0_150] : memref<8x8x32xf32, #tpu.memory_space<vmem>>, vector<8x8x32xf32>
    %411 = arith.mulf %409, %410 : vector<8x8x32xf32>
    %cst_151 = arith.constant dense<0.000000e+00> : vector<8x32xf32>
    %412 = vector.multi_reduction <add>, %411, %cst_151 [0] : vector<8x8x32xf32> to vector<8x32xf32>
    %413 = tpu.concatenate %391, %412 in 1 : vector<8x32xf32>, vector<8x32xf32> -> vector<8x64xf32>
    %c0_152 = arith.constant 0 : index
    %c0_153 = arith.constant 0 : index
    %414 = vector.load %arg11[%c0_152, %c0_153] : memref<64x96xf32, #tpu.memory_space<vmem>>, vector<64x96xf32>
    %cst_154 = arith.constant dense<0.000000e+00> : vector<8x96xf32>
    %415 = tpu.matmul %413, %414, %cst_154 {dimension_numbers = #tpu.dot_dimension_numbers<[1], [0], [0], [1], [0, 0, 1, 1], [], []>} : vector<8x64xf32>, vector<64x96xf32>, vector<8x96xf32> -> vector<8x96xf32>
    %c0_155 = arith.constant 0 : index
    %c0_156 = arith.constant 0 : index
    %416 = vector.load %arg13[%c0_155, %c0_156] : memref<1x96xf32, #tpu.memory_space<vmem>>, vector<1x96xf32>
    %417 = vector.broadcast %416 : vector<1x96xf32> to vector<8x96xf32>
    %418 = arith.addf %415, %417 : vector<8x96xf32>
    %c0_157 = arith.constant 0 : index
    %c0_158 = arith.constant 0 : index
    %419 = vector.load %arg12[%c0_157, %c0_158] : memref<32x96xf32, #tpu.memory_space<vmem>>, vector<32x96xf32>
    %cst_159 = arith.constant dense<0.000000e+00> : vector<8x96xf32>
    %420 = tpu.matmul %374, %419, %cst_159 {dimension_numbers = #tpu.dot_dimension_numbers<[1], [0], [0], [1], [0, 0, 1, 1], [], []>} : vector<8x32xf32>, vector<32x96xf32>, vector<8x96xf32> -> vector<8x96xf32>
    %c0_160 = arith.constant 0 : index
    %c0_161 = arith.constant 0 : index
    %421 = vector.load %arg14[%c0_160, %c0_161] : memref<1x96xf32, #tpu.memory_space<vmem>>, vector<1x96xf32>
    %422 = vector.broadcast %421 : vector<1x96xf32> to vector<8x96xf32>
    %423 = arith.addf %420, %422 : vector<8x96xf32>
    %424 = vector.extract_strided_slice %418 {offsets = [0, 0], sizes = [8, 64], strides = [1, 1]} : vector<8x96xf32> to vector<8x64xf32>
    %425 = vector.extract_strided_slice %423 {offsets = [0, 0], sizes = [8, 64], strides = [1, 1]} : vector<8x96xf32> to vector<8x64xf32>
    %426 = arith.addf %424, %425 : vector<8x64xf32>
    %427 = arith.negf %426 : vector<8x64xf32>
    %428 = math.exp %427 : vector<8x64xf32>
    %cst_162 = arith.constant 1.000000e+00 : f32
    %429 = vector.broadcast %cst_162 : f32 to vector<8x64xf32>
    %430 = arith.addf %429, %428 : vector<8x64xf32>
    %431 = arith.divf %429, %430 : vector<8x64xf32>
    %432 = vector.extract_strided_slice %431 {offsets = [0, 0], sizes = [8, 32], strides = [1, 1]} : vector<8x64xf32> to vector<8x32xf32>
    %433 = vector.extract_strided_slice %431 {offsets = [0, 32], sizes = [8, 32], strides = [1, 1]} : vector<8x64xf32> to vector<8x32xf32>
    %434 = vector.extract_strided_slice %418 {offsets = [0, 64], sizes = [8, 32], strides = [1, 1]} : vector<8x96xf32> to vector<8x32xf32>
    %435 = vector.extract_strided_slice %423 {offsets = [0, 64], sizes = [8, 32], strides = [1, 1]} : vector<8x96xf32> to vector<8x32xf32>
    %436 = arith.mulf %432, %435 : vector<8x32xf32>
    %437 = arith.addf %434, %436 : vector<8x32xf32>
    %438 = math.tanh %437 : vector<8x32xf32>
    %cst_163 = arith.constant 1.000000e+00 : f32
    %439 = vector.broadcast %cst_163 : f32 to vector<8x32xf32>
    %440 = arith.subf %439, %433 : vector<8x32xf32>
    %441 = arith.mulf %440, %438 : vector<8x32xf32>
    %442 = arith.mulf %433, %374 : vector<8x32xf32>
    %443 = arith.addf %441, %442 : vector<8x32xf32>
    %444 = tpu.concatenate %443, %412, %391 in 1 : vector<8x32xf32>, vector<8x32xf32>, vector<8x32xf32> -> vector<8x96xf32>
    %c0_164 = arith.constant 0 : index
    %c0_165 = arith.constant 0 : index
    %445 = vector.load %arg15[%c0_164, %c0_165] : memref<96x128xf32, #tpu.memory_space<vmem>>, vector<96x128xf32>
    %cst_166 = arith.constant dense<0.000000e+00> : vector<8x128xf32>
    %446 = tpu.matmul %444, %445, %cst_166 {dimension_numbers = #tpu.dot_dimension_numbers<[1], [0], [0], [1], [0, 0, 1, 1], [], []>} : vector<8x96xf32>, vector<96x128xf32>, vector<8x128xf32> -> vector<8x128xf32>
    %c0_167 = arith.constant 0 : index
    %c0_168 = arith.constant 0 : index
    %447 = vector.load %arg16[%c0_167, %c0_168] : memref<1x128xf32, #tpu.memory_space<vmem>>, vector<1x128xf32>
    %448 = vector.broadcast %447 : vector<1x128xf32> to vector<8x128xf32>
    %449 = arith.addf %446, %448 : vector<8x128xf32>
    %c3_169 = arith.constant 3 : index
    %c0_170 = arith.constant 0 : index
    %c0_171 = arith.constant 0 : index
    %450 = vector.load %arg18[%c3_169, %c0_170, %c0_171] : memref<6x8x128xf32, #tpu.memory_space<vmem>>, vector<1x8x128xf32>
    %451 = vector.shape_cast %450 : vector<1x8x128xf32> to vector<8x128xf32>
    %452 = vector.shape_cast %449 : vector<8x128xf32> to vector<1x8x128xf32>
    tpu.vector_store %arg18[%c3_169, %c0_170, %c0_171], %452 {strides = array<i32>} : memref<6x8x128xf32, #tpu.memory_space<vmem>>, vector<1x8x128xf32>,
    %c3_172 = arith.constant 3 : index
    %453 = memref.load %arg0[%c3_172] : memref<6xi32, #tpu.memory_space<smem>>
    %c0_i32_173 = arith.constant 0 : i32
    %454 = arith.cmpi sgt, %453, %c0_i32_173 : i32
    %455 = arith.extui %454 : i1 to i32
    %c0_i32_174 = arith.constant 0 : i32
    %456 = arith.cmpi ne, %455, %c0_i32_174 : i32
    scf.if %456 {
      %c3_242 = arith.constant 3 : index
      %c0_243 = arith.constant 0 : index
      %c0_244 = arith.constant 0 : index
      %591 = vector.load %arg2[%c3_242, %c0_243, %c0_244] : memref<6x8x32xf32, #tpu.memory_space<vmem>>, vector<1x8x32xf32>
      %592 = vector.shape_cast %591 : vector<1x8x32xf32> to vector<8x32xf32>
      %c0_245 = arith.constant 0 : index
      %c0_246 = arith.constant 0 : index
      %593 = vector.load %arg20[%c0_245, %c0_246] : memref<8x32xf32, #tpu.memory_space<vmem>>, vector<8x32xf32>
      tpu.vector_store %arg20[%c0_245, %c0_246], %592 {strides = array<i32>} : memref<8x32xf32, #tpu.memory_space<vmem>>, vector<8x32xf32>,
    } else {
    }
    %c0_i32_175 = arith.constant 0 : i32
    %457 = arith.cmpi eq, %453, %c0_i32_175 : i32
    %458 = arith.extui %457 : i1 to i32
    %c0_i32_176 = arith.constant 0 : i32
    %459 = arith.cmpi ne, %458, %c0_i32_176 : i32
    scf.if %459 {
      %591 = tpu.reduce_index %449 {axis = 1 : i32, kind = #tpu.reduction_kind<arg_max>} : vector<8x128xf32> -> vector<8xi32>
      %592 = vector.shape_cast %591 : vector<8xi32> to vector<8x1xi32>
      %593 = vector.broadcast %592 : vector<8x1xi32> to vector<8x128xi32>
      %594 = arith.cmpi eq, %245, %593 : vector<8x128xi32>
      %595 = arith.extui %594 : vector<8x128xi1> to vector<8x128xi32>
      %596 = arith.sitofp %595 : vector<8x128xi32> to vector<8x128xf32>
      %c0_242 = arith.constant 0 : index
      %c0_243 = arith.constant 0 : index
      %597 = vector.load %arg17[%c0_242, %c0_243] : memref<128x32xf32, #tpu.memory_space<vmem>>, vector<128x32xf32>
      %cst_244 = arith.constant dense<0.000000e+00> : vector<8x32xf32>
      %598 = tpu.matmul %596, %597, %cst_244 {dimension_numbers = #tpu.dot_dimension_numbers<[1], [0], [0], [1], [0, 0, 1, 1], [], []>} : vector<8x128xf32>, vector<128x32xf32>, vector<8x32xf32> -> vector<8x32xf32>
      %c0_245 = arith.constant 0 : index
      %c0_246 = arith.constant 0 : index
      %599 = vector.load %arg20[%c0_245, %c0_246] : memref<8x32xf32, #tpu.memory_space<vmem>>, vector<8x32xf32>
      tpu.vector_store %arg20[%c0_245, %c0_246], %598 {strides = array<i32>} : memref<8x32xf32, #tpu.memory_space<vmem>>, vector<8x32xf32>,
    } else {
    }
    %c0_177 = arith.constant 0 : index
    %c0_178 = arith.constant 0 : index
    %460 = vector.load %arg20[%c0_177, %c0_178] : memref<8x32xf32, #tpu.memory_space<vmem>>, vector<8x32xf32>
    %cst_179 = arith.constant dense<0.000000e+00> : vector<8x32xf32>
    %461 = tpu.matmul %443, %235, %cst_179 {dimension_numbers = #tpu.dot_dimension_numbers<[1], [0], [0], [1], [0, 0, 1, 1], [], []>} : vector<8x32xf32>, vector<32x32xf32>, vector<8x32xf32> -> vector<8x32xf32>
    %462 = vector.shape_cast %461 : vector<8x32xf32> to vector<1x8x32xf32>
    %463 = vector.broadcast %462 : vector<1x8x32xf32> to vector<8x8x32xf32>
    %464 = arith.addf %244, %463 : vector<8x8x32xf32>
    %465 = math.tanh %464 : vector<8x8x32xf32>
    %466 = vector.shape_cast %465 : vector<8x8x32xf32> to vector<64x32xf32>
    %cst_180 = arith.constant dense<0.000000e+00> : vector<64x32xf32>
    %467 = tpu.matmul %466, %236, %cst_180 {dimension_numbers = #tpu.dot_dimension_numbers<[1], [0], [0], [1], [0, 0, 1, 1], [], []>} : vector<64x32xf32>, vector<32x32xf32>, vector<64x32xf32> -> vector<64x32xf32>
    %468 = vector.shape_cast %467 : vector<64x32xf32> to vector<8x8x32xf32>
    %cst_181 = arith.constant dense<0xFF800000> : vector<8x32xf32>
    %469 = vector.multi_reduction <maximumf>, %468, %cst_181 [0] : vector<8x8x32xf32> to vector<8x32xf32>
    %470 = vector.shape_cast %469 : vector<8x32xf32> to vector<1x8x32xf32>
    %471 = vector.broadcast %470 : vector<1x8x32xf32> to vector<8x8x32xf32>
    %472 = arith.subf %468, %471 : vector<8x8x32xf32>
    %473 = math.exp %472 : vector<8x8x32xf32>
    %cst_182 = arith.constant dense<0.000000e+00> : vector<8x32xf32>
    %474 = vector.multi_reduction <add>, %473, %cst_182 [0] : vector<8x8x32xf32> to vector<8x32xf32>
    %475 = vector.shape_cast %474 : vector<8x32xf32> to vector<1x8x32xf32>
    %476 = tpu.reciprocal %475 {approx = true} : vector<1x8x32xf32> -> vector<1x8x32xf32>
    %477 = vector.broadcast %476 : vector<1x8x32xf32> to vector<8x8x32xf32>
    %478 = arith.mulf %473, %477 : vector<8x8x32xf32>
    %c0_183 = arith.constant 0 : index
    %c0_184 = arith.constant 0 : index
    %c0_185 = arith.constant 0 : index
    %479 = vector.load %arg19[%c0_183, %c0_184, %c0_185] : memref<8x8x32xf32, #tpu.memory_space<vmem>>, vector<8x8x32xf32>
    %480 = arith.mulf %478, %479 : vector<8x8x32xf32>
    %cst_186 = arith.constant dense<0.000000e+00> : vector<8x32xf32>
    %481 = vector.multi_reduction <add>, %480, %cst_186 [0] : vector<8x8x32xf32> to vector<8x32xf32>
    %482 = tpu.concatenate %460, %481 in 1 : vector<8x32xf32>, vector<8x32xf32> -> vector<8x64xf32>
    %c0_187 = arith.constant 0 : index
    %c0_188 = arith.constant 0 : index
    %483 = vector.load %arg11[%c0_187, %c0_188] : memref<64x96xf32, #tpu.memory_space<vmem>>, vector<64x96xf32>
    %cst_189 = arith.constant dense<0.000000e+00> : vector<8x96xf32>
    %484 = tpu.matmul %482, %483, %cst_189 {dimension_numbers = #tpu.dot_dimension_numbers<[1], [0], [0], [1], [0, 0, 1, 1], [], []>} : vector<8x64xf32>, vector<64x96xf32>, vector<8x96xf32> -> vector<8x96xf32>
    %c0_190 = arith.constant 0 : index
    %c0_191 = arith.constant 0 : index
    %485 = vector.load %arg13[%c0_190, %c0_191] : memref<1x96xf32, #tpu.memory_space<vmem>>, vector<1x96xf32>
    %486 = vector.broadcast %485 : vector<1x96xf32> to vector<8x96xf32>
    %487 = arith.addf %484, %486 : vector<8x96xf32>
    %c0_192 = arith.constant 0 : index
    %c0_193 = arith.constant 0 : index
    %488 = vector.load %arg12[%c0_192, %c0_193] : memref<32x96xf32, #tpu.memory_space<vmem>>, vector<32x96xf32>
    %cst_194 = arith.constant dense<0.000000e+00> : vector<8x96xf32>
    %489 = tpu.matmul %443, %488, %cst_194 {dimension_numbers = #tpu.dot_dimension_numbers<[1], [0], [0], [1], [0, 0, 1, 1], [], []>} : vector<8x32xf32>, vector<32x96xf32>, vector<8x96xf32> -> vector<8x96xf32>
    %c0_195 = arith.constant 0 : index
    %c0_196 = arith.constant 0 : index
    %490 = vector.load %arg14[%c0_195, %c0_196] : memref<1x96xf32, #tpu.memory_space<vmem>>, vector<1x96xf32>
    %491 = vector.broadcast %490 : vector<1x96xf32> to vector<8x96xf32>
    %492 = arith.addf %489, %491 : vector<8x96xf32>
    %493 = vector.extract_strided_slice %487 {offsets = [0, 0], sizes = [8, 64], strides = [1, 1]} : vector<8x96xf32> to vector<8x64xf32>
    %494 = vector.extract_strided_slice %492 {offsets = [0, 0], sizes = [8, 64], strides = [1, 1]} : vector<8x96xf32> to vector<8x64xf32>
    %495 = arith.addf %493, %494 : vector<8x64xf32>
    %496 = arith.negf %495 : vector<8x64xf32>
    %497 = math.exp %496 : vector<8x64xf32>
    %cst_197 = arith.constant 1.000000e+00 : f32
    %498 = vector.broadcast %cst_197 : f32 to vector<8x64xf32>
    %499 = arith.addf %498, %497 : vector<8x64xf32>
    %500 = arith.divf %498, %499 : vector<8x64xf32>
    %501 = vector.extract_strided_slice %500 {offsets = [0, 0], sizes = [8, 32], strides = [1, 1]} : vector<8x64xf32> to vector<8x32xf32>
    %502 = vector.extract_strided_slice %500 {offsets = [0, 32], sizes = [8, 32], strides = [1, 1]} : vector<8x64xf32> to vector<8x32xf32>
    %503 = vector.extract_strided_slice %487 {offsets = [0, 64], sizes = [8, 32], strides = [1, 1]} : vector<8x96xf32> to vector<8x32xf32>
    %504 = vector.extract_strided_slice %492 {offsets = [0, 64], sizes = [8, 32], strides = [1, 1]} : vector<8x96xf32> to vector<8x32xf32>
    %505 = arith.mulf %501, %504 : vector<8x32xf32>
    %506 = arith.addf %503, %505 : vector<8x32xf32>
    %507 = math.tanh %506 : vector<8x32xf32>
    %cst_198 = arith.constant 1.000000e+00 : f32
    %508 = vector.broadcast %cst_198 : f32 to vector<8x32xf32>
    %509 = arith.subf %508, %502 : vector<8x32xf32>
    %510 = arith.mulf %509, %507 : vector<8x32xf32>
    %511 = arith.mulf %502, %443 : vector<8x32xf32>
    %512 = arith.addf %510, %511 : vector<8x32xf32>
    %513 = tpu.concatenate %512, %481, %460 in 1 : vector<8x32xf32>, vector<8x32xf32>, vector<8x32xf32> -> vector<8x96xf32>
    %c0_199 = arith.constant 0 : index
    %c0_200 = arith.constant 0 : index
    %514 = vector.load %arg15[%c0_199, %c0_200] : memref<96x128xf32, #tpu.memory_space<vmem>>, vector<96x128xf32>
    %cst_201 = arith.constant dense<0.000000e+00> : vector<8x128xf32>
    %515 = tpu.matmul %513, %514, %cst_201 {dimension_numbers = #tpu.dot_dimension_numbers<[1], [0], [0], [1], [0, 0, 1, 1], [], []>} : vector<8x96xf32>, vector<96x128xf32>, vector<8x128xf32> -> vector<8x128xf32>
    %c0_202 = arith.constant 0 : index
    %c0_203 = arith.constant 0 : index
    %516 = vector.load %arg16[%c0_202, %c0_203] : memref<1x128xf32, #tpu.memory_space<vmem>>, vector<1x128xf32>
    %517 = vector.broadcast %516 : vector<1x128xf32> to vector<8x128xf32>
    %518 = arith.addf %515, %517 : vector<8x128xf32>
    %c4_204 = arith.constant 4 : index
    %c0_205 = arith.constant 0 : index
    %c0_206 = arith.constant 0 : index
    %519 = vector.load %arg18[%c4_204, %c0_205, %c0_206] : memref<6x8x128xf32, #tpu.memory_space<vmem>>, vector<1x8x128xf32>
    %520 = vector.shape_cast %519 : vector<1x8x128xf32> to vector<8x128xf32>
    %521 = vector.shape_cast %518 : vector<8x128xf32> to vector<1x8x128xf32>
    tpu.vector_store %arg18[%c4_204, %c0_205, %c0_206], %521 {strides = array<i32>} : memref<6x8x128xf32, #tpu.memory_space<vmem>>, vector<1x8x128xf32>,
    %c4_207 = arith.constant 4 : index
    %522 = memref.load %arg0[%c4_207] : memref<6xi32, #tpu.memory_space<smem>>
    %c0_i32_208 = arith.constant 0 : i32
    %523 = arith.cmpi sgt, %522, %c0_i32_208 : i32
    %524 = arith.extui %523 : i1 to i32
    %c0_i32_209 = arith.constant 0 : i32
    %525 = arith.cmpi ne, %524, %c0_i32_209 : i32
    scf.if %525 {
      %c4_242 = arith.constant 4 : index
      %c0_243 = arith.constant 0 : index
      %c0_244 = arith.constant 0 : index
      %591 = vector.load %arg2[%c4_242, %c0_243, %c0_244] : memref<6x8x32xf32, #tpu.memory_space<vmem>>, vector<1x8x32xf32>
      %592 = vector.shape_cast %591 : vector<1x8x32xf32> to vector<8x32xf32>
      %c0_245 = arith.constant 0 : index
      %c0_246 = arith.constant 0 : index
      %593 = vector.load %arg20[%c0_245, %c0_246] : memref<8x32xf32, #tpu.memory_space<vmem>>, vector<8x32xf32>
      tpu.vector_store %arg20[%c0_245, %c0_246], %592 {strides = array<i32>} : memref<8x32xf32, #tpu.memory_space<vmem>>, vector<8x32xf32>,
    } else {
    }
    %c0_i32_210 = arith.constant 0 : i32
    %526 = arith.cmpi eq, %522, %c0_i32_210 : i32
    %527 = arith.extui %526 : i1 to i32
    %c0_i32_211 = arith.constant 0 : i32
    %528 = arith.cmpi ne, %527, %c0_i32_211 : i32
    scf.if %528 {
      %591 = tpu.reduce_index %518 {axis = 1 : i32, kind = #tpu.reduction_kind<arg_max>} : vector<8x128xf32> -> vector<8xi32>
      %592 = vector.shape_cast %591 : vector<8xi32> to vector<8x1xi32>
      %593 = vector.broadcast %592 : vector<8x1xi32> to vector<8x128xi32>
      %594 = arith.cmpi eq, %245, %593 : vector<8x128xi32>
      %595 = arith.extui %594 : vector<8x128xi1> to vector<8x128xi32>
      %596 = arith.sitofp %595 : vector<8x128xi32> to vector<8x128xf32>
      %c0_242 = arith.constant 0 : index
      %c0_243 = arith.constant 0 : index
      %597 = vector.load %arg17[%c0_242, %c0_243] : memref<128x32xf32, #tpu.memory_space<vmem>>, vector<128x32xf32>
      %cst_244 = arith.constant dense<0.000000e+00> : vector<8x32xf32>
      %598 = tpu.matmul %596, %597, %cst_244 {dimension_numbers = #tpu.dot_dimension_numbers<[1], [0], [0], [1], [0, 0, 1, 1], [], []>} : vector<8x128xf32>, vector<128x32xf32>, vector<8x32xf32> -> vector<8x32xf32>
      %c0_245 = arith.constant 0 : index
      %c0_246 = arith.constant 0 : index
      %599 = vector.load %arg20[%c0_245, %c0_246] : memref<8x32xf32, #tpu.memory_space<vmem>>, vector<8x32xf32>
      tpu.vector_store %arg20[%c0_245, %c0_246], %598 {strides = array<i32>} : memref<8x32xf32, #tpu.memory_space<vmem>>, vector<8x32xf32>,
    } else {
    }
    %c0_212 = arith.constant 0 : index
    %c0_213 = arith.constant 0 : index
    %529 = vector.load %arg20[%c0_212, %c0_213] : memref<8x32xf32, #tpu.memory_space<vmem>>, vector<8x32xf32>
    %cst_214 = arith.constant dense<0.000000e+00> : vector<8x32xf32>
    %530 = tpu.matmul %512, %235, %cst_214 {dimension_numbers = #tpu.dot_dimension_numbers<[1], [0], [0], [1], [0, 0, 1, 1], [], []>} : vector<8x32xf32>, vector<32x32xf32>, vector<8x32xf32> -> vector<8x32xf32>
    %531 = vector.shape_cast %530 : vector<8x32xf32> to vector<1x8x32xf32>
    %532 = vector.broadcast %531 : vector<1x8x32xf32> to vector<8x8x32xf32>
    %533 = arith.addf %244, %532 : vector<8x8x32xf32>
    %534 = math.tanh %533 : vector<8x8x32xf32>
    %535 = vector.shape_cast %534 : vector<8x8x32xf32> to vector<64x32xf32>
    %cst_215 = arith.constant dense<0.000000e+00> : vector<64x32xf32>
    %536 = tpu.matmul %535, %236, %cst_215 {dimension_numbers = #tpu.dot_dimension_numbers<[1], [0], [0], [1], [0, 0, 1, 1], [], []>} : vector<64x32xf32>, vector<32x32xf32>, vector<64x32xf32> -> vector<64x32xf32>
    %537 = vector.shape_cast %536 : vector<64x32xf32> to vector<8x8x32xf32>
    %cst_216 = arith.constant dense<0xFF800000> : vector<8x32xf32>
    %538 = vector.multi_reduction <maximumf>, %537, %cst_216 [0] : vector<8x8x32xf32> to vector<8x32xf32>
    %539 = vector.shape_cast %538 : vector<8x32xf32> to vector<1x8x32xf32>
    %540 = vector.broadcast %539 : vector<1x8x32xf32> to vector<8x8x32xf32>
    %541 = arith.subf %537, %540 : vector<8x8x32xf32>
    %542 = math.exp %541 : vector<8x8x32xf32>
    %cst_217 = arith.constant dense<0.000000e+00> : vector<8x32xf32>
    %543 = vector.multi_reduction <add>, %542, %cst_217 [0] : vector<8x8x32xf32> to vector<8x32xf32>
    %544 = vector.shape_cast %543 : vector<8x32xf32> to vector<1x8x32xf32>
    %545 = tpu.reciprocal %544 {approx = true} : vector<1x8x32xf32> -> vector<1x8x32xf32>
    %546 = vector.broadcast %545 : vector<1x8x32xf32> to vector<8x8x32xf32>
    %547 = arith.mulf %542, %546 : vector<8x8x32xf32>
    %c0_218 = arith.constant 0 : index
    %c0_219 = arith.constant 0 : index
    %c0_220 = arith.constant 0 : index
    %548 = vector.load %arg19[%c0_218, %c0_219, %c0_220] : memref<8x8x32xf32, #tpu.memory_space<vmem>>, vector<8x8x32xf32>
    %549 = arith.mulf %547, %548 : vector<8x8x32xf32>
    %cst_221 = arith.constant dense<0.000000e+00> : vector<8x32xf32>
    %550 = vector.multi_reduction <add>, %549, %cst_221 [0] : vector<8x8x32xf32> to vector<8x32xf32>
    %551 = tpu.concatenate %529, %550 in 1 : vector<8x32xf32>, vector<8x32xf32> -> vector<8x64xf32>
    %c0_222 = arith.constant 0 : index
    %c0_223 = arith.constant 0 : index
    %552 = vector.load %arg11[%c0_222, %c0_223] : memref<64x96xf32, #tpu.memory_space<vmem>>, vector<64x96xf32>
    %cst_224 = arith.constant dense<0.000000e+00> : vector<8x96xf32>
    %553 = tpu.matmul %551, %552, %cst_224 {dimension_numbers = #tpu.dot_dimension_numbers<[1], [0], [0], [1], [0, 0, 1, 1], [], []>} : vector<8x64xf32>, vector<64x96xf32>, vector<8x96xf32> -> vector<8x96xf32>
    %c0_225 = arith.constant 0 : index
    %c0_226 = arith.constant 0 : index
    %554 = vector.load %arg13[%c0_225, %c0_226] : memref<1x96xf32, #tpu.memory_space<vmem>>, vector<1x96xf32>
    %555 = vector.broadcast %554 : vector<1x96xf32> to vector<8x96xf32>
    %556 = arith.addf %553, %555 : vector<8x96xf32>
    %c0_227 = arith.constant 0 : index
    %c0_228 = arith.constant 0 : index
    %557 = vector.load %arg12[%c0_227, %c0_228] : memref<32x96xf32, #tpu.memory_space<vmem>>, vector<32x96xf32>
    %cst_229 = arith.constant dense<0.000000e+00> : vector<8x96xf32>
    %558 = tpu.matmul %512, %557, %cst_229 {dimension_numbers = #tpu.dot_dimension_numbers<[1], [0], [0], [1], [0, 0, 1, 1], [], []>} : vector<8x32xf32>, vector<32x96xf32>, vector<8x96xf32> -> vector<8x96xf32>
    %c0_230 = arith.constant 0 : index
    %c0_231 = arith.constant 0 : index
    %559 = vector.load %arg14[%c0_230, %c0_231] : memref<1x96xf32, #tpu.memory_space<vmem>>, vector<1x96xf32>
    %560 = vector.broadcast %559 : vector<1x96xf32> to vector<8x96xf32>
    %561 = arith.addf %558, %560 : vector<8x96xf32>
    %562 = vector.extract_strided_slice %556 {offsets = [0, 0], sizes = [8, 64], strides = [1, 1]} : vector<8x96xf32> to vector<8x64xf32>
    %563 = vector.extract_strided_slice %561 {offsets = [0, 0], sizes = [8, 64], strides = [1, 1]} : vector<8x96xf32> to vector<8x64xf32>
    %564 = arith.addf %562, %563 : vector<8x64xf32>
    %565 = arith.negf %564 : vector<8x64xf32>
    %566 = math.exp %565 : vector<8x64xf32>
    %cst_232 = arith.constant 1.000000e+00 : f32
    %567 = vector.broadcast %cst_232 : f32 to vector<8x64xf32>
    %568 = arith.addf %567, %566 : vector<8x64xf32>
    %569 = arith.divf %567, %568 : vector<8x64xf32>
    %570 = vector.extract_strided_slice %569 {offsets = [0, 0], sizes = [8, 32], strides = [1, 1]} : vector<8x64xf32> to vector<8x32xf32>
    %571 = vector.extract_strided_slice %569 {offsets = [0, 32], sizes = [8, 32], strides = [1, 1]} : vector<8x64xf32> to vector<8x32xf32>
    %572 = vector.extract_strided_slice %556 {offsets = [0, 64], sizes = [8, 32], strides = [1, 1]} : vector<8x96xf32> to vector<8x32xf32>
    %573 = vector.extract_strided_slice %561 {offsets = [0, 64], sizes = [8, 32], strides = [1, 1]} : vector<8x96xf32> to vector<8x32xf32>
    %574 = arith.mulf %570, %573 : vector<8x32xf32>
    %575 = arith.addf %572, %574 : vector<8x32xf32>
    %576 = math.tanh %575 : vector<8x32xf32>
    %cst_233 = arith.constant 1.000000e+00 : f32
    %577 = vector.broadcast %cst_233 : f32 to vector<8x32xf32>
    %578 = arith.subf %577, %571 : vector<8x32xf32>
    %579 = arith.mulf %578, %576 : vector<8x32xf32>
    %580 = arith.mulf %571, %512 : vector<8x32xf32>
    %581 = arith.addf %579, %580 : vector<8x32xf32>
    %582 = tpu.concatenate %581, %550, %529 in 1 : vector<8x32xf32>, vector<8x32xf32>, vector<8x32xf32> -> vector<8x96xf32>
    %c0_234 = arith.constant 0 : index
    %c0_235 = arith.constant 0 : index
    %583 = vector.load %arg15[%c0_234, %c0_235] : memref<96x128xf32, #tpu.memory_space<vmem>>, vector<96x128xf32>
    %cst_236 = arith.constant dense<0.000000e+00> : vector<8x128xf32>
    %584 = tpu.matmul %582, %583, %cst_236 {dimension_numbers = #tpu.dot_dimension_numbers<[1], [0], [0], [1], [0, 0, 1, 1], [], []>} : vector<8x96xf32>, vector<96x128xf32>, vector<8x128xf32> -> vector<8x128xf32>
    %c0_237 = arith.constant 0 : index
    %c0_238 = arith.constant 0 : index
    %585 = vector.load %arg16[%c0_237, %c0_238] : memref<1x128xf32, #tpu.memory_space<vmem>>, vector<1x128xf32>
    %586 = vector.broadcast %585 : vector<1x128xf32> to vector<8x128xf32>
    %587 = arith.addf %584, %586 : vector<8x128xf32>
    %c5_239 = arith.constant 5 : index
    %c0_240 = arith.constant 0 : index
    %c0_241 = arith.constant 0 : index
    %588 = vector.load %arg18[%c5_239, %c0_240, %c0_241] : memref<6x8x128xf32, #tpu.memory_space<vmem>>, vector<1x8x128xf32>
    %589 = vector.shape_cast %588 : vector<1x8x128xf32> to vector<8x128xf32>
    %590 = vector.shape_cast %587 : vector<8x128xf32> to vector<1x8x128xf32>
    tpu.vector_store %arg18[%c5_239, %c0_240, %c0_241], %590 {strides = array<i32>} : memref<6x8x128xf32, #tpu.memory_space<vmem>>, vector<1x8x128xf32>,
    return
  }
}

</mosaic_0001>

<bundles_post_ra>
// kernel: rnn_seq2seq_forward.1
= control target key start
LH: loop header
LB: loop body
LE: loop exit
PB: predicated region body
PF: predicated region fallthrough
CT: control target
= control target key end

     0   :  { %s8210_s0 = inlined_call_operand.vmem [shape: s32[6], index: 0, kind: input, shape index: {}]   ;;  %s8211_s1 = inlined_call_operand.vmem [shape: f32[8,8,32], index: 1, kind: input, shape index: {}]   ;;  %s8212_s2 = inlined_call_operand.vmem [shape: f32[6,8,32], index: 2, kind: input, shape index: {}]   ;;  %s8213_s3 = inlined_call_operand.vmem [shape: f32[32,96], index: 3, kind: input, shape index: {}]   ;;  %s8214_s4 = inlined_call_operand.vmem [shape: f32[32,96], index: 4, kind: input, shape index: {}]   ;;  %s8215_s5 = inlined_call_operand.vmem [shape: f32[1,96], index: 5, kind: input, shape index: {}]   ;;  %s8216_s6 = inlined_call_operand.vmem [shape: f32[1,96], index: 6, kind: input, shape index: {}]   ;;  %s8217_s7 = inlined_call_operand.vmem [shape: f32[32,32], index: 7, kind: input, shape index: {}]   ;;  %s8218_s8 = inlined_call_operand.vmem [shape: f32[32,32], index: 8, kind: input, shape index: {}]   ;;  %s8219_s9 = inlined_call_operand.vmem [shape: f32[1,32], index: 9, kind: input, shape index: {}]   ;;  %s8220_s10 = inlined_call_operand.vmem [shape: f32[32,32], index: 10, kind: input, shape index: {}]   ;;  %s8221_s11 = inlined_call_operand.vmem [shape: f32[64,96], index: 11, kind: input, shape index: {}]   ;;  %s8222_s12 = inlined_call_operand.vmem [shape: f32[32,96], index: 12, kind: input, shape index: {}]   ;;  %s8223_s13 = inlined_call_operand.vmem [shape: f32[1,96], index: 13, kind: input, shape index: {}]   ;;  %s8224_s14 = inlined_call_operand.vmem [shape: f32[1,96], index: 14, kind: input, shape index: {}]   ;;  %s8225_s15 = inlined_call_operand.vmem [shape: f32[96,128], index: 15, kind: input, shape index: {}]   ;;  %s8226_s16 = inlined_call_operand.vmem [shape: f32[1,128], index: 16, kind: input, shape index: {}]   ;;  %s8227_s17 = inlined_call_operand.vmem [shape: f32[128,32], index: 17, kind: input, shape index: {}]   ;;  %s8228_s18 = inlined_call_operand.hbm [shape: f32[6,8,128], index: 18, kind: output, shape index: {}]  }
   0x1   :  { %8230 = sst [smem:[#allocation10_spill]] %s8210_s0 }
   0x2   :  { %8231 = sst [smem:[#allocation11_spill]] %s8211_s1 }
   0x3   :  { %8232 = sst [smem:[#allocation12_spill]] %s8212_s2 }
   0x4   :  { %23 = vsyncpa [#allocation6], 0 }
   0x5   :  { %24 = vsyncpa [#allocation5], 0  ;;  %s8233_s29 = sld [smem:[#allocation10_spill]] }
   0xb   :  { %s31_s30 = sshll.u32 %s8233_s29, 4  ;;  %s32_s30 = int_to_ptr.vmem [resolvable:$true] %s31_s30 }
   0xc   :  { %s6624_s0 = scalar_lea.vmem %s32_s30, 16  ;;  %p6629_p1 = scmp.lt.s32.totalorder %s32_s30, %s32_s30 }
   0xd   :  { %p6625_p0 = scmp.ne.s32.totalorder %s32_s30, %s6624_s0  ;;  %p6630_p2 = scmp.lt.s32.totalorder %s6624_s0, %s6624_s0 }
   0xf   :  { %p6631_p3 = por %p6630_p2, %p6629_p1 }
  0x11   :  { %p6632_p4 = pnand %p6631_p3, %p6625_p0 }
  0x13   :  { %6635 = shalt.err (!%p6632_p4)
}
  0x14   :  { %s6662_s19 = smov [#allocation4]  }
  0x15   :  { %34 = dma.vmem_to_smem %s32_s30, 16, %s6662_s19, [#allocation6]  }
  0x16   :  { %6658 = dma.done.wait [#allocation6], 16  }
  0x17   :  { %6659 = vsyncadd [#allocation6], 4294967280 }
  0x18   :  { %72 = sfence }
  0x19   :  { %v81_v0 = vld [vmem:[%s8213_s3] sm:$0xff]  ;;  %v82_v1 = vld [vmem:[%s8213_s3 + $0x8] sm:$0xff]  ;;  %v6663_v3 = vmov 0.0|0.0   ;;  %v83_v6 = vld [vmem:[%s8213_s3 + $0x10] sm:$0xff]  ;;  %vm6664_vm0 = vmmov 0   ;;  %v6665_v8 = vmov 0.0  }
  0x1a   :  { %v222_v2 = vld [vmem:[%s8214_s4] sm:$0xff]  ;;  %5947 = vmatprep.subr.bf16.mxu1 %v6663_v3  ;;  %v5939_v4 = vpack.c.bf16 %v82_v1, %v81_v0  ;;  %v223_v5 = vld [vmem:[%s8214_s4 + $0x8] sm:$0xff]  ;;  %v84_v7 = vld [vmem:[%s8213_s3 + $0x18] sm:$0xff]  ;;  %5259 = vmatprep.mubr.msk.f32.mxu1 %vm6664_vm0, %v6665_v8  ;;  %1223 = vst [vmem:[#allocation7] sm:$0xff] %v6665_v8  ;;  %vm92_vm1 = vcmask 261120   ;;  %s8234_s21 = sld [smem:[#allocation11_spill]] }
  0x1b   :  { %v6808_v9 = vpack.c.bf16 %v223_v5, %v222_v2  ;;  %v5943_v10 = vpack.c.bf16 %v84_v7, %v83_v6  ;;  %v224_v11 = vld [vmem:[%s8214_s4 + $0x10] sm:$0xff]  ;;  %v225_v12 = vld [vmem:[%s8214_s4 + $0x18] sm:$0xff]  ;;  %v6845_v16 = vld [vmem:[%s8216_s6] ss:$0 sm:$0xff]  ;;  %s6666_s24 = smov 64   ;;  %s6667_s6 = smov 96  }
  0x1c   :  { %5940 = vmatprep.subr.bf16.mxu0 %v5939_v4  ;;  %v6821_v14 = vpack.c.bf16 %v225_v12, %v224_v11  ;;  %v6852_v22 = vld [vmem:[%s8215_s5] ss:$0 sm:$0xff]  ;;  %s8235_s20 = sld [smem:[#allocation12_spill]]  ;;  %s6668_s5 = smov 32   ;;  %vm1558_vm2 = vcmask 523264   ;;  %vm1768_vm3 = vcmask 785408  }
  0x1d   :  { %5949 = vmatpush3.bf16.msra.mxu1 %v6808_v9  ;;  %5942 = vmatpush3.bf16.msra.mxu0 %v5939_v4  ;;  %s4791_s2 = sld [smem:[#allocation4 + $0x1]] }
  0x1e   :  { %5950 = vmatprep.subr.bf16.mxu1 %v6663_v3  ;;  %5944 = vmatprep.subr.bf16.mxu0 %v5943_v10 }
  0x20   :  { %v73_v13 = vld [vmem:[%s8234_s21] sm:$0xff]  ;;  %v74_v15 = vld [vmem:[%s8234_s21 + $0x8] sm:$0xff]  ;;  %v75_v53 = vld [vmem:[%s8234_s21 + $0x10] sm:$0xff] }
  0x21   :  { %5239 = vmatprep.mubr.msk.f32.mxu0 %vm92_vm1, %v73_v13  ;;  %5952 = vmatpush3.bf16.msra.mxu1 %v6821_v14  ;;  %v76_v54 = vld [vmem:[%s8234_s21 + $0x18] sm:$0xff]  ;;  %v77_v55 = vld [vmem:[%s8234_s21 + $0x20] sm:$0xff]  ;;  %v78_v56 = vld [vmem:[%s8234_s21 + $0x28] sm:$0xff] }
  0x22   :  { %5946 = vmatpush3.bf16.msra.mxu0 %v5943_v10  ;;  %5953 = vmatprep.subr.bf16.mxu1 %v6663_v3  ;;  %v79_v57 = vld [vmem:[%s8234_s21 + $0x30] sm:$0xff]  ;;  %v80_v58 = vld [vmem:[%s8234_s21 + $0x38] sm:$0xff] }
  0x23   :  { %5959 = vmatprep.subr.bf16.mxu0 %v6663_v3  ;;  %p4792_p5 = scmp.le.s32.totalorder %s4791_s2, 0 }
  0x24   :  { %5260 = vmatmul.mubr.f32.vlgmr.msra.gmra.mrb[0].mxu1 %v6665_v8 }
  0x25   :  { %5240 = vmatmul.mubr.msk.f32.vlgmr.msra.gmra.mrb[0].mxu0 %vm92_vm1, %v74_v15  ;;  %5955 = vmatpush3.bf16.msra.mxu1 %v6808_v9 }
  0x26   :  { %5270 = vmatprep.mubr.msk.f32.mxu1 %vm6664_vm0, %v6665_v8  ;;  %5956 = vmatprep.subr.bf16.mxu1 %v6663_v3 }
  0x27   :  { %5961 = vmatpush3.bf16.msra.mxu0 %v6808_v9  ;;  %5242 = vmatprep.mubr.msk.f32.mxu0 %vm92_vm1, %v75_v53 }
  0x28   :  { %5962 = vmatprep.subr.bf16.mxu0 %v6663_v3 }
  0x29   :  { %5958 = vmatpush3.bf16.msra.mxu1 %v6821_v14  ;;  %5243 = vmatmul.mubr.msk.f32.gmra.mrb[2].mxu0 %vm92_vm1, %v76_v54 }
  0x2a   :  { %5965 = vmatprep.subr.bf16.mxu1 %v6663_v3  ;;  %5245 = vmatprep.mubr.msk.f32.mxu0 %vm92_vm1, %v77_v55 }
  0x2b   :  { %5964 = vmatpush3.bf16.msra.mxu0 %v6821_v14 }
  0x2c   :  { %5971 = vmatprep.subr.bf16.mxu0 %v6663_v3 }
  0x2d   :  { %5246 = vmatmul.mubr.msk.f32.gmra.mrb[4].mxu0 %vm92_vm1, %v78_v56 }
  0x2e   :  { %5248 = vmatprep.mubr.msk.f32.mxu0 %vm92_vm1, %v79_v57 }
  0x31   :  { %5249 = vmatmul.mubr.msk.f32.gmra.mrb[6].mxu0 %vm92_vm1, %v80_v58 }
  0x32   :  { %5281 = vmatprep.mubr.msk.f32.mxu0 %vm6664_vm0, %v6665_v8 }
  0xf7   :  { %v302_v17 = vpop.f32.mrb[0].mxu1 }
  0xf8   :  { %v5241_v18 = vpop.f32.mrb[0].mxu0  ;;  %v303_v19 = vadd.f32 %v6845_v16, %v302_v17  ;;  %v5261_v20 = vpop.f32.mrb[1].mxu1 }
  0xf9   :  { %v183_v21 = vpop.f32.mrb[1].mxu0  ;;  %v189_v43 = vadd.f32 %v5241_v18, %v6852_v22 }
  0xfa   :  { %314 = vrot.lane.b32.xlu0 %v303_v19, %s6666_s24  ;;  %v184_v23 = vadd.f32 %v6852_v22, %v183_v21 }
  0xfc   :  { %v306_v24 = vadd.f32 %v303_v19, %v184_v23  ;;  %v5244_v1 = vpop.f32.mrb[2].mxu0 }
  0xfd   :  { %v193_v2 = vpop.f32.mrb[3].mxu0 }
  0xfe   :  { %v4751_v25 = vmul.f32 -1.442695, %v306_v24  ;;  %v194_v15 = vadd.f32 %v6852_v22, %v193_v2 }
 0x100   :  { %6375 = vpow2.f32 %v4751_v25  ;;  %v6898_v4 = vpop.f32.mrb[4].mxu0 }
 0x101   :  { %v6900_v5 = vpop.f32.mrb[5].mxu0 }
 0x102   :  { %v204_v57 = vadd.f32 %v6852_v22, %v6900_v5 }
 0x104   :  { %v6902_v6 = vpop.f32.mrb[6].mxu0 }
 0x105   :  { %v6904_v7 = vpop.f32.mrb[7].mxu0 }
 0x10a   :  { %v6376_v26 = vpop.eup %6375 }
 0x10b   :  { %v310_v27 = vadd.f32 1.0, %v6376_v26 }
 0x10d   :  { %6377 = vrcp.f32 %v310_v27 }
 0x117   :  { %v6378_v28 = vpop.eup %6377 }
 0x118   :  { %v324_v34 = vsub.f32 1.0, %v6378_v28  ;;  %v330_v36 = vmul.f32 0.0, %v6378_v28 }
 0x16c   :  { %v315_v29 = vpop.permute.xlu0 %314 }
 0x16d   :  { %v317_v30 = vmul.f32 %v6378_v28, %v315_v29 }
 0x16f   :  { %319 = vrot.lane.b32.xlu0 %v317_v30, %s6666_s24 }
 0x1e1   :  { %v320_v31 = vpop.permute.xlu0 %319 }
 0x1e2   :  { %v322_v32 = vadd.f32 %v320_v31, %v184_v23 }
 0x1e4   :  { %6379 = vtanh.f32 %v322_v32 }
 0x1ee   :  { %v6380_v33 = vpop.eup %6379 }
 0x1ef   :  { %326 = vrot.lane.b32.xlu1 %v6380_v33, %s6667_s6 }
 0x261   :  { %v327_v35 = vpop.permute.xlu1 %326 }
 0x262   :  { %v329_v37 = vmul.f32 %v327_v35, %v324_v34 }
 0x264   :  { %v331_v38 = vadd.f32 %v330_v36, %v329_v37  ;;  %v199_v37 = vadd.f32 %v5244_v1, %v6852_v22 }
 0x266   :  { %333 = vrot.lane.b32.xlu1 %v331_v38, %s6667_s6 }
 0x2d8   :  { %v334_v39 = vpop.permute.xlu1 %333 }
 0x2d9   :  { %336 = vst.msk [vmem:[#allocation2] sm:$0xff] %vm92_vm1, %v334_v39  ;;  %5271 = vmatmul.mubr.msk.f32.vlgmr.msra.gmra.mrb[2].mxu1 %vm92_vm1, %v334_v39 }
 0x2da   :  { %5967 = vmatpush3.bf16.msra.mxu1 %v6808_v9  ;;  %5292 = vmatprep.mubr.msk.f32.mxu1 %vm6664_vm0, %v6665_v8 }
 0x2db   :  { %5968 = vmatprep.subr.bf16.mxu1 %v6663_v3 }
 0x2de   :  { %5970 = vmatpush3.bf16.msra.mxu1 %v6821_v14 }
 0x2df   :  { %5977 = vmatprep.subr.bf16.mxu1 %v6663_v3 }
 0x3ac   :  { %v405_v40 = vpop.f32.mrb[2].mxu1 }
 0x3ad   :  { %v406_v41 = vadd.f32 %v6845_v16, %v405_v40  ;;  %v5272_v42 = vpop.f32.mrb[3].mxu1 }
 0x3af   :  { %417 = vrot.lane.b32.xlu0 %v406_v41, %s6666_s24  ;;  %v409_v44 = vadd.f32 %v406_v41, %v189_v43 }
 0x3b1   :  { %v4753_v45 = vmul.f32 -1.442695, %v409_v44 }
 0x3b3   :  { %6381 = vpow2.f32 %v4753_v45 }
 0x3bd   :  { %v6382_v46 = vpop.eup %6381 }
 0x3be   :  { %v413_v47 = vadd.f32 1.0, %v6382_v46 }
 0x3c0   :  { %6383 = vrcp.f32 %v413_v47 }
 0x3ca   :  { %v6384_v48 = vpop.eup %6383 }
 0x3cb   :  { %v427_v60 = vsub.f32 1.0, %v6384_v48  ;;  %v433_v62 = vmul.f32 %v6384_v48, %v331_v38 }
 0x421   :  { %v418_v49 = vpop.permute.xlu0 %417 }
 0x422   :  { %v420_v50 = vmul.f32 %v6384_v48, %v418_v49 }
 0x424   :  { %422 = vrot.lane.b32.xlu1 %v420_v50, %s6666_s24 }
 0x496   :  { %v423_v51 = vpop.permute.xlu1 %422 }
 0x497   :  { %v425_v52 = vadd.f32 %v423_v51, %v189_v43 }
 0x499   :  { %6385 = vtanh.f32 %v425_v52 }
 0x4a3   :  { %v6386_v59 = vpop.eup %6385 }
 0x4a4   :  { %429 = vrot.lane.b32.xlu0 %v6386_v59, %s6667_s6 }
 0x516   :  { %v430_v61 = vpop.permute.xlu0 %429 }
 0x517   :  { %v432_v63 = vmul.f32 %v430_v61, %v427_v60 }
 0x519   :  { %v434_v0 = vadd.f32 %v433_v62, %v432_v63 }
 0x51b   :  { %436 = vrot.lane.b32.xlu1 %v434_v0, %s6667_s6 }
 0x58d   :  { %v437_v10 = vpop.permute.xlu1 %436 }
 0x58e   :  { %440 = vst.msk [vmem:[#allocation2 + $0x8] sm:$0xff] %vm92_vm1, %v437_v10  ;;  %5282 = vmatmul.mubr.msk.f32.vlgmr.msra.gmra.mrb[8].mxu0 %vm92_vm1, %v437_v10 }
 0x58f   :  { %5973 = vmatpush3.bf16.msra.mxu0 %v6808_v9  ;;  %5303 = vmatprep.mubr.msk.f32.mxu0 %vm6664_vm0, %v6665_v8 }
 0x590   :  { %5974 = vmatprep.subr.bf16.mxu0 %v6663_v3 }
 0x593   :  { %5976 = vmatpush3.bf16.msra.mxu0 %v6821_v14 }
 0x594   :  { %5983 = vmatprep.subr.bf16.mxu0 %v6663_v3 }
 0x661   :  { %v509_v11 = vpop.f32.mrb[8].mxu0 }
 0x662   :  { %v510_v12 = vadd.f32 %v6845_v16, %v509_v11  ;;  %v5283_v13 = vpop.f32.mrb[9].mxu0 }
 0x664   :  { %521 = vrot.lane.b32.xlu0 %v510_v12, %s6666_s24  ;;  %v513_v17 = vadd.f32 %v510_v12, %v194_v15 }
 0x666   :  { %v4755_v18 = vmul.f32 -1.442695, %v513_v17 }
 0x668   :  { %6387 = vpow2.f32 %v4755_v18 }
 0x672   :  { %v6388_v19 = vpop.eup %6387 }
 0x673   :  { %v517_v20 = vadd.f32 1.0, %v6388_v19 }
 0x675   :  { %6389 = vrcp.f32 %v517_v20 }
 0x67f   :  { %v6390_v21 = vpop.eup %6389 }
 0x680   :  { %v531_v28 = vsub.f32 1.0, %v6390_v21  ;;  %v537_v30 = vmul.f32 %v6390_v21, %v434_v0 }
 0x6d6   :  { %v522_v23 = vpop.permute.xlu0 %521 }
 0x6d7   :  { %v524_v24 = vmul.f32 %v6390_v21, %v522_v23  ;;  %v209_v21 = vadd.f32 %v6898_v4, %v6852_v22  ;;  %v1082_v4 = vld [vmem:[%s8218_s8 + $0x8] sm:$0xff] }
 0x6d9   :  { %526 = vrot.lane.b32.xlu1 %v524_v24, %s6666_s24 }
 0x74b   :  { %v527_v25 = vpop.permute.xlu1 %526 }
 0x74c   :  { %v529_v26 = vadd.f32 %v527_v25, %v194_v15 }
 0x74e   :  { %6391 = vtanh.f32 %v529_v26 }
 0x758   :  { %v6392_v27 = vpop.eup %6391 }
 0x759   :  { %533 = vrot.lane.b32.xlu0 %v6392_v27, %s6667_s6 }
 0x7cb   :  { %v534_v29 = vpop.permute.xlu0 %533 }
 0x7cc   :  { %v536_v31 = vmul.f32 %v534_v29, %v531_v28 }
 0x7ce   :  { %v538_v32 = vadd.f32 %v537_v30, %v536_v31  ;;  %v1081_v30 = vld [vmem:[%s8218_s8] sm:$0xff] }
 0x7cf   :  { %v5995_v31 = vpack.c.bf16 %v1082_v4, %v1081_v30  ;;  %v1065_v30 = vld [vmem:[%s8217_s7] sm:$0xff] }
 0x7d0   :  { %540 = vrot.lane.b32.xlu1 %v538_v32, %s6667_s6 }
 0x842   :  { %v541_v33 = vpop.permute.xlu1 %540 }
 0x843   :  { %544 = vst.msk [vmem:[#allocation2 + $0x10] sm:$0xff] %vm92_vm1, %v541_v33  ;;  %5293 = vmatmul.mubr.msk.f32.vlgmr.msra.gmra.mrb[4].mxu1 %vm92_vm1, %v541_v33 }
 0x844   :  { %5979 = vmatpush3.bf16.msra.mxu1 %v6808_v9  ;;  %5314 = vmatprep.mubr.msk.f32.mxu1 %vm6664_vm0, %v6665_v8 }
 0x845   :  { %5980 = vmatprep.subr.bf16.mxu1 %v6663_v3 }
 0x848   :  { %5982 = vmatpush3.bf16.msra.mxu1 %v6821_v14 }
 0x849   :  { %5989 = vmatprep.subr.bf16.mxu1 %v6663_v3 }
 0x916   :  { %v613_v34 = vpop.f32.mrb[4].mxu1 }
 0x917   :  { %v614_v35 = vadd.f32 %v6845_v16, %v613_v34  ;;  %v5294_v36 = vpop.f32.mrb[5].mxu1 }
 0x919   :  { %625 = vrot.lane.b32.xlu0 %v614_v35, %s6666_s24  ;;  %v617_v38 = vadd.f32 %v614_v35, %v199_v37 }
 0x91b   :  { %v4757_v39 = vmul.f32 -1.442695, %v617_v38  ;;  %v1083_v38 = vld [vmem:[%s8218_s8 + $0x10] sm:$0xff] }
 0x91d   :  { %6393 = vpow2.f32 %v4757_v39  ;;  %v1084_v39 = vld [vmem:[%s8218_s8 + $0x18] sm:$0xff] }
 0x927   :  { %v6394_v40 = vpop.eup %6393 }
 0x928   :  { %v621_v41 = vadd.f32 1.0, %v6394_v40  ;;  %v5999_v40 = vpack.c.bf16 %v1084_v39, %v1083_v38 }
 0x92a   :  { %6395 = vrcp.f32 %v621_v41 }
 0x934   :  { %v6396_v42 = vpop.eup %6395 }
 0x935   :  { %v635_v48 = vsub.f32 1.0, %v6396_v42  ;;  %v641_v50 = vmul.f32 %v6396_v42, %v538_v32 }
 0x98b   :  { %v626_v43 = vpop.permute.xlu0 %625 }
 0x98c   :  { %v628_v44 = vmul.f32 %v6396_v42, %v626_v43  ;;  %v6977_v42 = vld [vmem:[#allocation2] sm:$0xff]  ;;  %v6982_v43 = vld [vmem:[#allocation2 + $0x8] sm:$0xff] }
 0x98e   :  { %630 = vrot.lane.b32.xlu1 %v628_v44, %s6666_s24  ;;  %v6986_v44 = vld [vmem:[#allocation2 + $0x10] sm:$0xff] }
 0xa00   :  { %v631_v45 = vpop.permute.xlu1 %630 }
 0xa01   :  { %v633_v46 = vadd.f32 %v631_v45, %v199_v37 }
 0xa03   :  { %6397 = vtanh.f32 %v633_v46 }
 0xa0d   :  { %v6398_v47 = vpop.eup %6397 }
 0xa0e   :  { %637 = vrot.lane.b32.xlu0 %v6398_v47, %s6667_s6 }
 0xa80   :  { %v638_v49 = vpop.permute.xlu0 %637 }
 0xa81   :  { %v640_v51 = vmul.f32 %v638_v49, %v635_v48 }
 0xa83   :  { %v642_v52 = vadd.f32 %v641_v50, %v640_v51 }
 0xa85   :  { %644 = vrot.lane.b32.xlu1 %v642_v52, %s6667_s6 }
 0xaf7   :  { %v645_v53 = vpop.permute.xlu1 %644 }
 0xaf8   :  { %648 = vst.msk [vmem:[#allocation2 + $0x18] sm:$0xff] %vm92_vm1, %v645_v53  ;;  %5304 = vmatmul.mubr.msk.f32.vlgmr.msra.gmra.mrb[10].mxu0 %vm92_vm1, %v645_v53 }
 0xaf9   :  { %5985 = vmatpush3.bf16.msra.mxu0 %v6808_v9  ;;  %5325 = vmatprep.mubr.msk.f32.mxu0 %vm6664_vm0, %v6665_v8 }
 0xafa   :  { %5986 = vmatprep.subr.bf16.mxu0 %v6663_v3 }
 0xafd   :  { %5988 = vmatpush3.bf16.msra.mxu0 %v6821_v14 }
 0xafe   :  { %5996 = vmatprep.subr.bf16.mxu0 %v5995_v31 }
 0xaff   :  { %v6990_v45 = vld [vmem:[#allocation2 + $0x18] sm:$0xff] }
 0xbcb   :  { %v717_v54 = vpop.f32.mrb[10].mxu0 }
 0xbcc   :  { %v718_v55 = vadd.f32 %v6845_v16, %v717_v54  ;;  %v5305_v56 = vpop.f32.mrb[11].mxu0 }
 0xbce   :  { %729 = vrot.lane.b32.xlu0 %v718_v55, %s6666_s24  ;;  %v721_v58 = vadd.f32 %v718_v55, %v204_v57 }
 0xbd0   :  { %v4759_v59 = vmul.f32 -1.442695, %v721_v58 }
 0xbd2   :  { %6399 = vpow2.f32 %v4759_v59 }
 0xbdc   :  { %v6400_v60 = vpop.eup %6399 }
 0xbdd   :  { %v725_v61 = vadd.f32 1.0, %v6400_v60 }
 0xbdf   :  { %6401 = vrcp.f32 %v725_v61 }
 0xbe9   :  { %v6402_v62 = vpop.eup %6401 }
 0xbea   :  { %v739_v11 = vsub.f32 1.0, %v6402_v62  ;;  %v745_v5 = vmul.f32 %v6402_v62, %v642_v52 }
 0xc40   :  { %v730_v63 = vpop.permute.xlu0 %729 }
 0xc41   :  { %v732_v0 = vmul.f32 %v6402_v62, %v730_v63 }
 0xc43   :  { %734 = vrot.lane.b32.xlu1 %v732_v0, %s6666_s24 }
 0xcb5   :  { %v735_v1 = vpop.permute.xlu1 %734 }
 0xcb6   :  { %v737_v2 = vadd.f32 %v735_v1, %v204_v57  ;;  %v214_v57 = vadd.f32 %v6852_v22, %v6904_v7 }
 0xcb8   :  { %6403 = vtanh.f32 %v737_v2 }
 0xcc2   :  { %v6404_v10 = vpop.eup %6403 }
 0xcc3   :  { %741 = vrot.lane.b32.xlu0 %v6404_v10, %s6667_s6 }
 0xd35   :  { %v742_v12 = vpop.permute.xlu0 %741 }
 0xd36   :  { %v744_v13 = vmul.f32 %v742_v12, %v739_v11 }
 0xd38   :  { %v746_v15 = vadd.f32 %v745_v5, %v744_v13 }
 0xd3a   :  { %748 = vrot.lane.b32.xlu1 %v746_v15, %s6667_s6 }
 0xdac   :  { %v749_v17 = vpop.permute.xlu1 %748 }
 0xdad   :  { %752 = vst.msk [vmem:[#allocation2 + $0x20] sm:$0xff] %vm92_vm1, %v749_v17  ;;  %5315 = vmatmul.mubr.msk.f32.vlgmr.msra.gmra.mrb[6].mxu1 %vm92_vm1, %v749_v17 }
 0xdae   :  { %5991 = vmatpush3.bf16.msra.mxu1 %v6808_v9  ;;  %5336 = vmatprep.mubr.msk.f32.mxu1 %vm6664_vm0, %v6665_v8 }
 0xdaf   :  { %5992 = vmatprep.subr.bf16.mxu1 %v6663_v3 }
 0xdb2   :  { %5994 = vmatpush3.bf16.msra.mxu1 %v6821_v14 }
 0xdb3   :  { %6003 = vmatprep.subr.bf16.mxu1 %v6663_v3 }
 0xdb4   :  { %v6994_v46 = vld [vmem:[#allocation2 + $0x20] sm:$0xff] }
 0xe80   :  { %v821_v18 = vpop.f32.mrb[6].mxu1 }
 0xe81   :  { %v822_v19 = vadd.f32 %v6845_v16, %v821_v18  ;;  %v5316_v20 = vpop.f32.mrb[7].mxu1 }
 0xe83   :  { %833 = vrot.lane.b32.xlu0 %v822_v19, %s6666_s24  ;;  %v825_v23 = vadd.f32 %v822_v19, %v209_v21 }
 0xe85   :  { %v4761_v9 = vmul.f32 -1.442695, %v825_v23 }
 0xe87   :  { %6405 = vpow2.f32 %v4761_v9 }
 0xe91   :  { %v6406_v24 = vpop.eup %6405 }
 0xe92   :  { %v829_v25 = vadd.f32 1.0, %v6406_v24 }
 0xe94   :  { %6407 = vrcp.f32 %v829_v25 }
 0xe9e   :  { %v6408_v26 = vpop.eup %6407 }
 0xe9f   :  { %v843_v33 = vsub.f32 1.0, %v6408_v26  ;;  %v849_v35 = vmul.f32 %v6408_v26, %v746_v15 }
 0xef5   :  { %v834_v27 = vpop.permute.xlu0 %833 }
 0xef6   :  { %v836_v14 = vmul.f32 %v6408_v26, %v834_v27 }
 0xef8   :  { %838 = vrot.lane.b32.xlu1 %v836_v14, %s6666_s24 }
 0xf6a   :  { %v839_v28 = vpop.permute.xlu1 %838 }
 0xf6b   :  { %v841_v29 = vadd.f32 %v839_v28, %v209_v21  ;;  %v219_v21 = vadd.f32 %v6902_v6, %v6852_v22  ;;  %v1066_v22 = vld [vmem:[%s8217_s7 + $0x8] sm:$0xff]  ;;  %v1067_v6 = vld [vmem:[%s8217_s7 + $0x10] sm:$0xff] }
 0xf6c   :  { %v7043_v4 = vpack.c.bf16 %v1066_v22, %v1065_v30  ;;  %v1224_v30 = vld [vmem:[%s8235_s20] sm:$0xff] }
 0xf6d   :  { %6409 = vtanh.f32 %v841_v29  ;;  %1225 = vst.msk [vmem:[#allocation3] sm:$0xff] %vm92_vm1, %v1224_v30 }
 0xf77   :  { %v6410_v32 = vpop.eup %6409 }
 0xf78   :  { %845 = vrot.lane.b32.xlu0 %v6410_v32, %s6667_s6 }
 0xfea   :  { %v846_v34 = vpop.permute.xlu0 %845 }
 0xfeb   :  { %v848_v36 = vmul.f32 %v846_v34, %v843_v33 }
 0xfed   :  { %v850_v37 = vadd.f32 %v849_v35, %v848_v36 }
 0xfef   :  { %852 = vrot.lane.b32.xlu1 %v850_v37, %s6667_s6 }
0x1061   :  { %v853_v41 = vpop.permute.xlu1 %852 }
0x1062   :  { %856 = vst.msk [vmem:[#allocation2 + $0x28] sm:$0xff] %vm92_vm1, %v853_v41  ;;  %5326 = vmatmul.mubr.msk.f32.vlgmr.msra.gmra.mrb[12].mxu0 %vm92_vm1, %v853_v41 }
0x1063   :  { %5998 = vmatpush3.bf16.msra.mxu0 %v5995_v31  ;;  %5347 = vmatprep.mubr.msk.f32.mxu0 %vm92_vm1, %v6977_v42  ;;  %v1068_v31 = vld [vmem:[%s8217_s7 + $0x18] sm:$0xff] }
0x1064   :  { %6000 = vmatprep.subr.bf16.mxu0 %v5999_v40  ;;  %v7051_v33 = vpack.c.bf16 %v1068_v31, %v1067_v6  ;;  %v1547_v6 = vld [vmem:[%s8221_s11 + $0x20] sm:$0xff]  ;;  %v1548_v31 = vld [vmem:[%s8221_s11 + $0x28] sm:$0xff] }
0x1067   :  { %6002 = vmatpush3.bf16.msra.mxu0 %v5999_v40 }
0x1068   :  { %6017 = vmatprep.subr.bf16.mxu0 %v6663_v3 }
0x1069   :  { %v6998_v47 = vld [vmem:[#allocation2 + $0x28] sm:$0xff] }
0x106a   :  { %5348 = vmatmul.mubr.msk.f32.vlgmr.msra.gmra.mrb[14].mxu0 %vm92_vm1, %v6982_v43 }
0x106b   :  { %5350 = vmatprep.mubr.msk.f32.mxu0 %vm92_vm1, %v6986_v44 }
0x106e   :  { %5351 = vmatmul.mubr.msk.f32.gmra.mrb[16].mxu0 %vm92_vm1, %v6990_v45 }
0x106f   :  { %5353 = vmatprep.mubr.msk.f32.mxu0 %vm92_vm1, %v6994_v46 }
0x1072   :  { %5354 = vmatmul.mubr.msk.f32.gmra.mrb[18].mxu0 %vm92_vm1, %v6998_v47 }
0x1135   :  { %v925_v48 = vpop.f32.mrb[12].mxu0 }
0x1136   :  { %v926_v49 = vadd.f32 %v6845_v16, %v925_v48  ;;  %v5327_v50 = vpop.f32.mrb[13].mxu0  ;;  %v1069_v48 = vld [vmem:[%s8220_s10] sm:$0xff] }
0x1138   :  { %937 = vrot.lane.b32.xlu0 %v926_v49, %s6666_s24  ;;  %v929_v58 = vadd.f32 %v926_v49, %v214_v57  ;;  %v1070_v49 = vld [vmem:[%s8220_s10 + $0x8] sm:$0xff] }
0x1139   :  { %v7078_v50 = vpack.c.bf16 %v1070_v49, %v1069_v48 }
0x113a   :  { %v4763_v59 = vmul.f32 -1.442695, %v929_v58  ;;  %v1072_v58 = vld [vmem:[%s8220_s10 + $0x18] sm:$0xff] }
0x113c   :  { %6411 = vpow2.f32 %v4763_v59 }
0x113d   :  { %v7004_v51 = vpop.f32.mrb[14].mxu0 }
0x113e   :  { %v7006_v52 = vpop.f32.mrb[15].mxu0 }
0x1141   :  { %v7008_v53 = vpop.f32.mrb[16].mxu0 }
0x1142   :  { %v7010_v54 = vpop.f32.mrb[17].mxu0 }
0x1145   :  { %v7012_v55 = vpop.f32.mrb[18].mxu0 }
0x1146   :  { %v7014_v56 = vpop.f32.mrb[19].mxu0  ;;  %v6412_v60 = vpop.eup %6411 }
0x1147   :  { %v933_v61 = vadd.f32 1.0, %v6412_v60  ;;  %v4766_v60 = vld [vmem:[%s8219_s9] ss:$0 sm:$0xff]  ;;  %s8236_s9 = sld [smem:[#allocation12_spill]] (!%p4792_p5) }
0x1149   :  { %6413 = vrcp.f32 %v933_v61  ;;  %v7097_v61 = vadd.f32 %v7004_v51, %v4766_v60 }
0x1153   :  { %v6414_v62 = vpop.eup %6413 }
0x1154   :  { %v947_v11 = vsub.f32 1.0, %v6414_v62  ;;  %v953_v7 = vmul.f32 %v6414_v62, %v850_v37 }
0x11aa   :  { %v938_v63 = vpop.permute.xlu0 %937 }
0x11ab   :  { %v940_v0 = vmul.f32 %v6414_v62, %v938_v63  ;;  %v7100_v62 = vadd.f32 %v4766_v60, %v7006_v52  ;;  %v7103_v63 = vadd.f32 %v7008_v53, %v4766_v60 }
0x11ad   :  { %942 = vrot.lane.b32.xlu1 %v940_v0, %s6666_s24  ;;  %v7106_v0 = vadd.f32 %v4766_v60, %v7010_v54 }
0x121f   :  { %v943_v1 = vpop.permute.xlu1 %942 }
0x1220   :  { %v945_v2 = vadd.f32 %v943_v1, %v214_v57  ;;  %v1071_v57 = vld [vmem:[%s8220_s10 + $0x10] sm:$0xff]  ;;  %v7109_v1 = vadd.f32 %v7012_v55, %v4766_v60 }
0x1221   :  { %v7088_v59 = vpack.c.bf16 %v1072_v58, %v1071_v57 }
0x1222   :  { %6415 = vtanh.f32 %v945_v2  ;;  %v7112_v2 = vadd.f32 %v4766_v60, %v7014_v56 }
0x122c   :  { %v6416_v10 = vpop.eup %6415 }
0x122d   :  { %949 = vrot.lane.b32.xlu0 %v6416_v10, %s6667_s6 }
0x129f   :  { %v950_v12 = vpop.permute.xlu0 %949 }
0x12a0   :  { %v952_v5 = vmul.f32 %v950_v12, %v947_v11 }
0x12a2   :  { %v954_v13 = vadd.f32 %v953_v7, %v952_v5 }
0x12a4   :  { %956 = vrot.lane.b32.xlu1 %v954_v13, %s6667_s6 }
0x1316   :  { %v957_v15 = vpop.permute.xlu1 %956 }
0x1317   :  { %960 = vst.msk [vmem:[#allocation2 + $0x30] sm:$0xff] %vm92_vm1, %v957_v15  ;;  %5337 = vmatmul.mubr.msk.f32.vlgmr.msra.gmra.mrb[8].mxu1 %vm92_vm1, %v957_v15 }
0x1318   :  { %5367 = vmatprep.mubr.msk.f32.mxu1 %vm6664_vm0, %v6665_v8  ;;  %6005 = vmatpush3.bf16.msra.mxu1 %v7043_v4 }
0x1319   :  { %6006 = vmatprep.subr.bf16.mxu1 %v6663_v3 }
0x131c   :  { %6008 = vmatpush3.bf16.msra.mxu1 %v7051_v33 }
0x131d   :  { %6010 = vmatprep.subr.bf16.mxu1 %v7078_v50 }
0x131e   :  { %v7025_v17 = vld [vmem:[#allocation2 + $0x30] sm:$0xff] }
0x131f   :  { %5356 = vmatprep.mubr.msk.f32.mxu0 %vm92_vm1, %v7025_v17 }
0x13ea   :  { %v1029_v18 = vpop.f32.mrb[8].mxu1 }
0x13eb   :  { %v1030_v19 = vadd.f32 %v6845_v16, %v1029_v18  ;;  %v5338_v20 = vpop.f32.mrb[9].mxu1  ;;  %v1221_v16 = vlaneseq }
0x13ed   :  { %1041 = vrot.lane.b32.xlu0 %v1030_v19, %s6666_s24  ;;  %v1033_v23 = vadd.f32 %v1030_v19, %v219_v21  ;;  %v7048_v32 = vand.u32 127, %v1221_v16  ;;  %v1546_v16 = vld [vmem:[%s8221_s11 + $0x18] sm:$0xff] }
0x13ef   :  { %v4765_v9 = vmul.f32 -1.442695, %v1033_v23 }
0x13f1   :  { %6417 = vpow2.f32 %v4765_v9 }
0x13fb   :  { %v6418_v24 = vpop.eup %6417 }
0x13fc   :  { %v1037_v25 = vadd.f32 1.0, %v6418_v24 }
0x13fe   :  { %6419 = vrcp.f32 %v1037_v25 }
0x1408   :  { %v6420_v26 = vpop.eup %6419 }
0x1409   :  { %v1051_v35 = vsub.f32 1.0, %v6420_v26  ;;  %v1057_v37 = vmul.f32 %v6420_v26, %v954_v13 }
0x145f   :  { %v1042_v27 = vpop.permute.xlu0 %1041 }
0x1460   :  { %v1044_v14 = vmul.f32 %v6420_v26, %v1042_v27  ;;  %v1543_v27 = vld [vmem:[%s8221_s11] sm:$0xff] }
0x1462   :  { %1046 = vrot.lane.b32.xlu1 %v1044_v14, %s6666_s24  ;;  %v1544_v14 = vld [vmem:[%s8221_s11 + $0x8] sm:$0xff] }
0x14d4   :  { %v1047_v28 = vpop.permute.xlu1 %1046 }
0x14d5   :  { %v1049_v29 = vadd.f32 %v1047_v28, %v219_v21  ;;  %v1545_v28 = vld [vmem:[%s8221_s11 + $0x10] sm:$0xff] }
0x14d6   :  { %v6021_v22 = vpack.c.bf16 %v1546_v16, %v1545_v28 }
0x14d7   :  { %6421 = vtanh.f32 %v1049_v29  ;;  %v6018_v29 = vpack.c.bf16 %v1544_v14, %v1543_v27 }
0x14d9   :  { %6019 = vmatpush3.bf16.msra.mxu0 %v6018_v29 }
0x14da   :  { %6020 = vmatprep.subr.bf16.mxu0 %v6663_v3 }
0x14dd   :  { %6022 = vmatpush3.bf16.msra.mxu0 %v6021_v22 }
0x14de   :  { %6023 = vmatprep.subr.bf16.mxu0 %v6663_v3 }
0x14e1   :  { %v6422_v34 = vpop.eup %6421 }
0x14e2   :  { %1053 = vrot.lane.b32.xlu0 %v6422_v34, %s6667_s6  ;;  %v6024_v34 = vpack.c.bf16 %v1548_v31, %v1547_v6 }
0x14e4   :  { %6025 = vmatpush3.bf16.msra.mxu0 %v6024_v34 }
0x14e5   :  { %6026 = vmatprep.subr.bf16.mxu0 %v6663_v3 }
0x1554   :  { %v1054_v36 = vpop.permute.xlu0 %1053 }
0x1555   :  { %v1056_v38 = vmul.f32 %v1054_v36, %v1051_v35  ;;  %v1549_v35 = vld [vmem:[%s8221_s11 + $0x30] sm:$0xff]  ;;  %v1550_v36 = vld [vmem:[%s8221_s11 + $0x38] sm:$0xff] }
0x1557   :  { %v7056_v39 = vadd.f32 %v1057_v37, %v1056_v38  ;;  %v6027_v37 = vpack.c.bf16 %v1550_v36, %v1549_v35 }
0x1559   :  { %1060 = vrot.lane.b32.xlu1 %v7056_v39, %s6667_s6  ;;  %6028 = vmatpush3.bf16.msra.mxu0 %v6027_v37 }
0x155a   :  { %6029 = vmatprep.subr.bf16.mxu0 %v6663_v3 }
0x15cb   :  { %v7060_v40 = vpop.permute.xlu1 %1060 }
0x15cc   :  { %1064 = vst.msk [vmem:[#allocation2 + $0x38] sm:$0xff] %vm92_vm1, %v7060_v40  ;;  %5368 = vmatmul.mubr.msk.f32.vlgmr.msra.gmra.mrb[10].mxu1 %vm92_vm1, %v7060_v40 }
0x15cd   :  { %6012 = vmatpush3.bf16.msra.mxu1 %v7078_v50 }
0x15ce   :  { %6014 = vmatprep.subr.bf16.mxu1 %v7088_v59 }
0x15d1   :  { %6016 = vmatpush3.bf16.msra.mxu1 %v7088_v59 }
0x15d2   :  { %6035 = vmatprep.subr.bf16.mxu1 %v6663_v3 }
0x15d3   :  { %v7066_v41 = vld [vmem:[#allocation2 + $0x38] sm:$0xff] }
0x15d4   :  { %5357 = vmatmul.mubr.msk.f32.gmra.mrb[20].mxu0 %vm92_vm1, %v7066_v41 }
0x15d5   :  { %5406 = vmatprep.mubr.msk.f32.mxu0 %vm6664_vm0, %v6665_v8 }
0x169f   :  { %v1295_v10 = vpop.f32.mrb[10].mxu1 }
0x16a0   :  { %v1299_v11 = vadd.f32 %v1295_v10, %v7100_v62  ;;  %v1300_v51 = vadd.f32 %v1295_v10, %v7097_v61  ;;  %v1301_v52 = vadd.f32 %v1295_v10, %v7106_v0  ;;  %v1302_v12 = vadd.f32 %v1295_v10, %v7103_v63  ;;  %v5369_v53 = vpop.f32.mrb[11].mxu1 }
0x16a1   :  { %v1303_v7 = vadd.f32 %v1295_v10, %v7112_v2  ;;  %v1304_v54 = vadd.f32 %v1295_v10, %v7109_v1 }
0x16a2   :  { %6423 = vtanh.f32 %v1299_v11 }
0x16a3   :  { %6425 = vtanh.f32 %v1300_v51 }
0x16a4   :  { %6427 = vtanh.f32 %v1301_v52 }
0x16a5   :  { %6429 = vtanh.f32 %v1302_v12 }
0x16a6   :  { %6431 = vtanh.f32 %v1303_v7 }
0x16a7   :  { %v5358_v55 = vpop.f32.mrb[20].mxu0  ;;  %6433 = vtanh.f32 %v1304_v54 }
0x16a8   :  { %v7120_v56 = vadd.f32 %v5358_v55, %v4766_v60  ;;  %v1212_v5 = vpop.f32.mrb[21].mxu0 }
0x16a9   :  { %v7122_v13 = vadd.f32 %v4766_v60, %v1212_v5 }
0x16aa   :  { %v1306_v15 = vadd.f32 %v1295_v10, %v7120_v56 }
0x16ab   :  { %v1305_v18 = vadd.f32 %v1295_v10, %v7122_v13 }
0x16ac   :  { %v6424_v19 = vpop.eup %6423 }
0x16ad   :  { %v6426_v20 = vpop.eup %6425  ;;  %6435 = vtanh.f32 %v1305_v18  ;;  %5378 = vmatprep.mubr.msk.f32.mxu1 %vm92_vm1, %v6424_v19 }
0x16ae   :  { %v6428_v21 = vpop.eup %6427  ;;  %5379 = vmatmul.mubr.msk.f32.vlgmr.msra.gmra.mrb[12].mxu1 %vm92_vm1, %v6426_v20  ;;  %6437 = vtanh.f32 %v1306_v15 }
0x16af   :  { %5381 = vmatprep.mubr.msk.f32.mxu1 %vm92_vm1, %v6428_v21  ;;  %v6430_v23 = vpop.eup %6429 }
0x16b0   :  { %v6432_v9 = vpop.eup %6431 }
0x16b1   :  { %v6434_v24 = vpop.eup %6433 }
0x16b2   :  { %5382 = vmatmul.mubr.msk.f32.gmra.mrb[14].mxu1 %vm92_vm1, %v6430_v23 }
0x16b3   :  { %5384 = vmatprep.mubr.msk.f32.mxu1 %vm92_vm1, %v6432_v9 }
0x16b6   :  { %5385 = vmatmul.mubr.msk.f32.gmra.mrb[16].mxu1 %vm92_vm1, %v6434_v24 }
0x16b7   :  { %v6436_v25 = vpop.eup %6435 }
0x16b8   :  { %5387 = vmatprep.mubr.msk.f32.mxu1 %vm92_vm1, %v6436_v25  ;;  %v6438_v26 = vpop.eup %6437 }
0x16ba   :  { %5388 = vmatmul.mubr.msk.f32.gmra.mrb[18].mxu1 %vm92_vm1, %v6438_v26 }
0x16bb   :  { %5444 = vmatprep.mubr.msk.f32.mxu1 %vm6664_vm0, %v6665_v8 }
0x1781   :  { %v5380_v38 = vpop.f32.mrb[12].mxu1 }
0x1782   :  { %v1405_v48 = vpop.f32.mrb[13].mxu1  ;;  %v1445_v60 = vsel %vm92_vm1, %v5380_v38, -inf }
0x1783   :  { %v1444_v51 = vsel %vm92_vm1, %v1405_v48, -inf }
0x1785   :  { %v5383_v49 = vpop.f32.mrb[14].mxu1 }
0x1786   :  { %v1415_v57 = vpop.f32.mrb[15].mxu1  ;;  %v1447_v54 = vsel %vm92_vm1, %v5383_v49, -inf }
0x1787   :  { %v1446_v18 = vsel %vm92_vm1, %v1415_v57, -inf }
0x1789   :  { %v5386_v58 = vpop.f32.mrb[16].mxu1 }
0x178a   :  { %v1450_v10 = vsel %vm92_vm1, %v5386_v58, -inf  ;;  %v1425_v11 = vpop.f32.mrb[17].mxu1 }
0x178b   :  { %v1451_v52 = vmax.f32 %v1445_v60, %v1450_v10  ;;  %v1448_v12 = vsel %vm92_vm1, %v1425_v11, -inf }
0x178c   :  { %v1449_v53 = vmax.f32 %v1444_v51, %v1448_v12 }
0x178d   :  { %v5389_v7 = vpop.f32.mrb[18].mxu1 }
0x178e   :  { %v1456_v55 = vmax.f32 %v1449_v53, %v1451_v52  ;;  %v1454_v5 = vsel %vm92_vm1, %v5389_v7, -inf  ;;  %v1435_v15 = vpop.f32.mrb[19].mxu1 }
0x178f   :  { %v1455_v19 = vmax.f32 %v1447_v54, %v1454_v5  ;;  %v1452_v20 = vsel %vm92_vm1, %v1435_v15, -inf }
0x1790   :  { %v1453_v21 = vmax.f32 %v1446_v18, %v1452_v20 }
0x1792   :  { %v1457_v23 = vmax.f32 %v1453_v21, %v1455_v19 }
0x1794   :  { %v1458_v9 = vmax.f32 %v1456_v55, %v1457_v23 }
0x1796   :  { %v1459_v24 = vsub.f32 %v1405_v48, %v1458_v9  ;;  %v1460_v25 = vsub.f32 %v5380_v38, %v1458_v9  ;;  %v1461_v26 = vsub.f32 %v1415_v57, %v1458_v9  ;;  %v1462_v27 = vsub.f32 %v5383_v49, %v1458_v9 }
0x1797   :  { %v1463_v14 = vsub.f32 %v1425_v11, %v1458_v9  ;;  %v1464_v28 = vsub.f32 %v5386_v58, %v1458_v9  ;;  %v1465_v29 = vsub.f32 %v1435_v15, %v1458_v9  ;;  %v1466_v16 = vsub.f32 %v5389_v7, %v1458_v9 }
0x1798   :  { %v1467_v30 = vmul.f32 1.442695, %v1459_v24  ;;  %v1469_v22 = vmul.f32 1.442695, %v1460_v25  ;;  %v1471_v6 = vmul.f32 1.442695, %v1461_v26 }
0x1799   :  { %v1473_v31 = vmul.f32 1.442695, %v1462_v27  ;;  %v1475_v34 = vmul.f32 1.442695, %v1463_v14  ;;  %v1477_v35 = vmul.f32 1.442695, %v1464_v28 }
0x179a   :  { %6439 = vpow2.f32 %v1467_v30  ;;  %v1479_v36 = vmul.f32 1.442695, %v1465_v29  ;;  %v1481_v37 = vmul.f32 1.442695, %v1466_v16 }
0x179b   :  { %6441 = vpow2.f32 %v1469_v22 }
0x179c   :  { %6443 = vpow2.f32 %v1471_v6 }
0x179d   :  { %6445 = vpow2.f32 %v1473_v31 }
0x179e   :  { %6447 = vpow2.f32 %v1475_v34 }
0x179f   :  { %6449 = vpow2.f32 %v1477_v35 }
0x17a0   :  { %6451 = vpow2.f32 %v1479_v36 }
0x17a1   :  { %6453 = vpow2.f32 %v1481_v37 }
0x17a4   :  { %v6440_v38 = vpop.eup %6439 }
0x17a5   :  { %v6442_v48 = vpop.eup %6441  ;;  %v1483_v49 = vsel %vm92_vm1, %v6440_v38, 0.0 }
0x17a6   :  { %v6444_v57 = vpop.eup %6443  ;;  %v1484_v58 = vsel %vm92_vm1, %v6442_v48, 0.0 }
0x17a7   :  { %v6446_v60 = vpop.eup %6445  ;;  %v1485_v10 = vadd.f32 %v1484_v58, %v1483_v49  ;;  %v1486_v11 = vsel %vm92_vm1, %v6444_v57, 0.0 }
0x17a8   :  { %v6448_v51 = vpop.eup %6447  ;;  %v1488_v12 = vsel %vm92_vm1, %v6446_v60, 0.0 }
0x17a9   :  { %v1487_v52 = vadd.f32 %v1486_v11, %v1485_v10  ;;  %v6450_v53 = vpop.eup %6449  ;;  %v1490_v54 = vsel %vm92_vm1, %v6448_v51, 0.0 }
0x17aa   :  { %v6452_v55 = vpop.eup %6451  ;;  %v1492_v15 = vsel %vm92_vm1, %v6450_v53, 0.0 }
0x17ab   :  { %v1489_v7 = vadd.f32 %v1488_v12, %v1487_v52  ;;  %v6454_v18 = vpop.eup %6453  ;;  %v1494_v20 = vsel %vm92_vm1, %v6452_v55, 0.0 }
0x17ac   :  { %v1496_v23 = vsel %vm92_vm1, %v6454_v18, 0.0 }
0x17ad   :  { %v1491_v5 = vadd.f32 %v1490_v54, %v1489_v7  ;;  %v1634_v54 = vld [vmem:[%s8222_s12 + $0x10] sm:$0xff] }
0x17af   :  { %v1493_v19 = vadd.f32 %v1492_v15, %v1491_v5 }
0x17b1   :  { %v1495_v21 = vadd.f32 %v1494_v20, %v1493_v19 }
0x17b3   :  { %v1497_v9 = vadd.f32 %v1496_v23, %v1495_v21  ;;  %v4786_v21 = vld [vmem:[%s8224_s14] ss:$0 sm:$0xff] }
0x17b5   :  { %6455 = vrcp.f32 %v1497_v9 }
0x17bf   :  { %v6456_v24 = vpop.eup %6455 }
0x17c0   :  { %v1499_v25 = vmul.f32 %v6456_v24, %v6440_v38  ;;  %v1500_v26 = vmul.f32 %v6456_v24, %v6442_v48  ;;  %v1501_v27 = vmul.f32 %v6456_v24, %v6444_v57  ;;  %v1502_v14 = vmul.f32 %v6456_v24, %v6446_v60 }
0x17c1   :  { %v1503_v28 = vmul.f32 %v6456_v24, %v6448_v51  ;;  %v1504_v29 = vmul.f32 %v6456_v24, %v6450_v53  ;;  %v1505_v16 = vmul.f32 %v6456_v24, %v6452_v55  ;;  %v1506_v30 = vmul.f32 %v6456_v24, %v6454_v18  ;;  %v1635_v55 = vld [vmem:[%s8222_s12 + $0x18] sm:$0xff]  ;;  %v6463_v18 = vld [vmem:[#allocation7] sm:$0xff] }
0x17c2   :  { %v1515_v22 = vmul.f32 %v1499_v25, %v6977_v42  ;;  %v1516_v6 = vmul.f32 %v1500_v26, %v6982_v43  ;;  %v1517_v31 = vmul.f32 %v1501_v27, %v6986_v44  ;;  %v1518_v34 = vmul.f32 %v1502_v14, %v6990_v45  ;;  %v4784_v25 = vld [vmem:[%s8223_s13] ss:$0 sm:$0xff] }
0x17c3   :  { %v1519_v38 = vmul.f32 %v1503_v28, %v6994_v46  ;;  %v1520_v57 = vmul.f32 %v1504_v29, %v6998_v47  ;;  %v1521_v43 = vmul.f32 %v1505_v16, %v7025_v17  ;;  %v1522_v60 = vmul.f32 %v1506_v30, %v7066_v41  ;;  %v1632_v47 = vld [vmem:[%s8222_s12] sm:$0xff]  ;;  %v1633_v17 = vld [vmem:[%s8222_s12 + $0x8] sm:$0xff] }
0x17c4   :  { %v1523_v35 = vsel %vm92_vm1, %v1515_v22, 0.0  ;;  %v1524_v36 = vsel %vm92_vm1, %v1516_v6, 0.0  ;;  %v1526_v48 = vsel %vm92_vm1, %v1517_v31, 0.0  ;;  %v1528_v42 = vsel %vm92_vm1, %v1518_v34, 0.0  ;;  %v1226_v41 = vld [vmem:[#allocation3] sm:$0xff]  ;;  %v1750_v34 = vld [vmem:[%s8225_s15 + $0x8] sm:$0xff] }
0x17c5   :  { %v1525_v37 = vadd.f32 %v1524_v36, %v1523_v35  ;;  %v1530_v44 = vsel %vm92_vm1, %v1519_v38, 0.0  ;;  %v1532_v10 = vsel %vm92_vm1, %v1520_v57, 0.0  ;;  %v1534_v46 = vsel %vm92_vm1, %v1521_v43, 0.0  ;;  %v1749_v31 = vld [vmem:[%s8225_s15] sm:$0xff]  ;;  %v1751_v35 = vld [vmem:[%s8225_s15 + $0x10] sm:$0xff]  ;;  %v1756_v43 = vld [vmem:[%s8225_s15 + $0x38] sm:$0xff] }
0x17c6   :  { %v1536_v52 = vsel %vm92_vm1, %v1522_v60, 0.0  ;;  %v6030_v53 = vpack.c.bf16 %v1633_v17, %v1632_v47  ;;  %v6033_v15 = vpack.c.bf16 %v1635_v55, %v1634_v54  ;;  %v6036_v36 = vpack.c.bf16 %v1750_v34, %v1749_v31  ;;  %v1758_v60 = vld [vmem:[%s8225_s15 + $0x48] sm:$0xff] }
0x17c7   :  { %v1527_v49 = vadd.f32 %v1526_v48, %v1525_v37  ;;  %v1752_v37 = vld [vmem:[%s8225_s15 + $0x18] sm:$0xff]  ;;  %v1753_v48 = vld [vmem:[%s8225_s15 + $0x20] sm:$0xff] }
0x17c8   :  { %6037 = vmatpush3.bf16.msra.mxu1 %v6036_v36  ;;  %v6039_v38 = vpack.c.bf16 %v1752_v37, %v1751_v35 }
0x17c9   :  { %v1529_v58 = vadd.f32 %v1528_v42, %v1527_v49  ;;  %6038 = vmatprep.subr.bf16.mxu1 %v6663_v3  ;;  %v1754_v49 = vld [vmem:[%s8225_s15 + $0x28] sm:$0xff] }
0x17ca   :  { %v6042_v57 = vpack.c.bf16 %v1754_v49, %v1753_v48 }
0x17cb   :  { %v1531_v45 = vadd.f32 %v1530_v44, %v1529_v58  ;;  %v1755_v58 = vld [vmem:[%s8225_s15 + $0x30] sm:$0xff] }
0x17cc   :  { %6040 = vmatpush3.bf16.msra.mxu1 %v6039_v38  ;;  %v6045_v44 = vpack.c.bf16 %v1756_v43, %v1755_v58 }
0x17cd   :  { %v1533_v11 = vadd.f32 %v1532_v10, %v1531_v45  ;;  %6041 = vmatprep.subr.bf16.mxu1 %v6663_v3  ;;  %v1757_v45 = vld [vmem:[%s8225_s15 + $0x40] sm:$0xff] }
0x17ce   :  { %v6048_v10 = vpack.c.bf16 %v1758_v60, %v1757_v45 }
0x17cf   :  { %v1535_v51 = vadd.f32 %v1534_v46, %v1533_v11  ;;  %v1759_v11 = vld [vmem:[%s8225_s15 + $0x50] sm:$0xff]  ;;  %v1760_v46 = vld [vmem:[%s8225_s15 + $0x58] sm:$0xff] }
0x17d0   :  { %6043 = vmatpush3.bf16.msra.mxu1 %v6042_v57 }
0x17d1   :  { %v1537_v12 = vadd.f32 %v1536_v52, %v1535_v51  ;;  %6044 = vmatprep.subr.bf16.mxu1 %v6663_v3  ;;  %v6051_v51 = vpack.c.bf16 %v1760_v46, %v1759_v11 }
0x17d3   :  { %1539 = vrot.lane.b32.xlu0 %v1537_v12, %s6668_s5 }
0x17d4   :  { %6046 = vmatpush3.bf16.msra.mxu1 %v6045_v44 }
0x17d5   :  { %6047 = vmatprep.subr.bf16.mxu1 %v6663_v3 }
0x17d8   :  { %6049 = vmatpush3.bf16.msra.mxu1 %v6048_v10 }
0x17d9   :  { %6050 = vmatprep.subr.bf16.mxu1 %v6663_v3 }
0x17dc   :  { %6052 = vmatpush3.bf16.msra.mxu1 %v6051_v51 }
0x1845   :  { %v7207_v7 = vpop.permute.xlu0 %1539 }
0x1846   :  { %v1542_v5 = vsel %vm92_vm1, %v1226_v41, %v7207_v7 }
0x1847   :  { %5407 = vmatmul.mubr.msk.f32.vlgmr.msra.gmra.mrb[22].mxu0 %vm1558_vm2, %v1542_v5 }
0x1848   :  { %6031 = vmatpush3.bf16.msra.mxu0 %v6030_v53  ;;  %5417 = vmatprep.mubr.msk.f32.mxu0 %vm6664_vm0, %v6463_v18 }
0x1849   :  { %6032 = vmatprep.subr.bf16.mxu0 %v6663_v3 }
0x184c   :  { %6034 = vmatpush3.bf16.msra.mxu0 %v6033_v15 }
0x184f   :  { %5418 = vmatmul.mubr.msk.f32.vlgmr.msra.gmra.mrb[24].mxu0 %vm92_vm1, %v7060_v40 }
0x191a   :  { %v1628_v19 = vpop.f32.mrb[22].mxu0 }
0x191b   :  { %v5408_v20 = vpop.f32.mrb[23].mxu0  ;;  %v1629_v26 = vadd.f32 %v4784_v25, %v1628_v19 }
0x191c   :  { %v4793_v20 = vld [vmem:[%s8236_s9 + $0x8] sm:$0xff] (!%p4792_p5) }
0x191d   :  { %1851 = vst.msk [vmem:[#allocation3] sm:$0xff] (!%p4792_p5), %vm92_vm1, %v4793_v20 }
0x1922   :  { %v1709_v23 = vpop.f32.mrb[24].mxu0 }
0x1923   :  { %v1710_v9 = vadd.f32 %v4786_v21, %v1709_v23  ;;  %v5419_v24 = vpop.f32.mrb[25].mxu0 }
0x1925   :  { %1721 = vrot.lane.b32.xlu1 %v1710_v9, %s6666_s24  ;;  %v1713_v27 = vadd.f32 %v1710_v9, %v1629_v26 }
0x1927   :  { %v4788_v14 = vmul.f32 -1.442695, %v1713_v27 }
0x1929   :  { %6457 = vpow2.f32 %v4788_v14 }
0x1933   :  { %v6458_v40 = vpop.eup %6457 }
0x1934   :  { %v1717_v28 = vadd.f32 1.0, %v6458_v40 }
0x1936   :  { %6459 = vrcp.f32 %v1717_v28 }
0x1940   :  { %v6460_v29 = vpop.eup %6459 }
0x1941   :  { %v1731_v52 = vsub.f32 1.0, %v6460_v29  ;;  %v1737_v47 = vmul.f32 %v6460_v29, %v7056_v39  ;;  %v4789_v39 = vld [vmem:[%s8226_s16] ss:$0 sm:$0xff] }
0x1997   :  { %v1722_v16 = vpop.permute.xlu1 %1721 }
0x1998   :  { %v1724_v30 = vmul.f32 %v6460_v29, %v1722_v16 }
0x199a   :  { %1726 = vrot.lane.b32.xlu0 %v1724_v30, %s6666_s24 }
0x1a0c   :  { %v1727_v22 = vpop.permute.xlu0 %1726 }
0x1a0d   :  { %v1729_v6 = vadd.f32 %v1727_v22, %v1629_v26 }
0x1a0f   :  { %6461 = vtanh.f32 %v1729_v6 }
0x1a19   :  { %v6462_v42 = vpop.eup %6461 }
0x1a1a   :  { %1733 = vrot.lane.b32.xlu1 %v6462_v42, %s6667_s6 }
0x1a1e   :  { %1744 = vrot.lane.b32.xlu1 %v1226_v41, %s6666_s24 }
0x1a8c   :  { %v1734_v12 = vpop.permute.xlu1 %1733 }
0x1a8d   :  { %v1736_v17 = vmul.f32 %v1734_v12, %v1731_v52 }
0x1a8f   :  { %v7274_v41 = vadd.f32 %v1737_v47, %v1736_v17 }
0x1a90   :  { %v1745_v53 = vpop.permute.xlu1 %1744 }
0x1a91   :  { %1740 = vrot.lane.b32.xlu0 %v7274_v41, %s6667_s6 }
0x1b03   :  { %v7278_v54 = vpop.permute.xlu0 %1740 }
0x1b04   :  { %v1747_v55 = vsel %vm92_vm1, %v7278_v54, %v7207_v7 }
0x1b05   :  { %v1748_v5 = vsel %vm1558_vm2, %v1747_v55, %v1745_v53 }
0x1b06   :  { %5445 = vmatmul.mubr.msk.f32.vlgmr.msra.gmra.mrb[20].mxu1 %vm1768_vm3, %v1748_v5 }
0x1bd6   :  { %1848 = sbr.rel (%p4792_p5) target bundleno = 7133 (0x1bdd), region = 81 }
0x1bd9   :  { %v1838_v15 = vpop.f32.mrb[20].mxu1 }
0x1bda   :  { %v1839_v18 = vadd.f32 %v4789_v39, %v1838_v15  ;;  %v5446_v19 = vpop.f32.mrb[21].mxu1 }
0x1bdc   :  { %1843 = vst [vmem:[#allocation7 + $0x8] sm:$0xff] %v1839_v18 }
0x1bdd PF:  { %p4794_p6 = scmp.ne.s32.totalorder %s4791_s2, 0 }
0x1bde   :  { %1856 = vmax.index.xlane.f32.xlu0 (!%p4794_p6), %v1839_v18  ;;  %v1861_v7 = vld [vmem:[%s8227_s17] sm:$0xff] (!%p4794_p6)  ;;  %v1862_v21 = vld [vmem:[%s8227_s17 + $0x8] sm:$0xff] (!%p4794_p6)  ;;  %v1863_v23 = vld [vmem:[%s8227_s17 + $0x10] sm:$0xff] (!%p4794_p6)  ;;  %v6669_v9 = vmov (!%p4794_p6), 0.0|0.0   ;;  %vm6670_vm4 = vmmov (!%p4794_p6), 0   ;;  %v6671_v6 = vmov (!%p4794_p6), 0.0  }
0x1bdf   :  { %1855 = sbr.rel (%p4794_p6) target bundleno = 7490 (0x1d42), region = 85  ;;  %6053 = vmatprep.subr.bf16.mxu0 (!%p4794_p6), %v6669_v9  ;;  %v6054_v24 = vpack.c.bf16 (!%p4794_p6), %v1862_v21, %v1861_v7  ;;  %v1864_v25 = vld [vmem:[%s8227_s17 + $0x18] sm:$0xff] (!%p4794_p6)  ;;  %v1865_v27 = vld [vmem:[%s8227_s17 + $0x20] sm:$0xff] (!%p4794_p6)  ;;  %v1866_v14 = vld [vmem:[%s8227_s17 + $0x28] sm:$0xff] (!%p4794_p6)  ;;  %5479 = vmatprep.mubr.msk.f32.mxu0 (!%p4794_p6), %vm6670_vm4, %v6671_v6  ;;  %v6672_v43 = vmov (!%p4794_p6), 1.0  }
0x1be0   :  { %v6057_v26 = vpack.c.bf16 (!%p4794_p6), %v1864_v25, %v1863_v23  ;;  %v6060_v40 = vpack.c.bf16 (!%p4794_p6), %v1866_v14, %v1865_v27  ;;  %v1867_v28 = vld [vmem:[%s8227_s17 + $0x30] sm:$0xff] (!%p4794_p6)  ;;  %v1868_v29 = vld [vmem:[%s8227_s17 + $0x38] sm:$0xff] (!%p4794_p6)  ;;  %v1869_v30 = vld [vmem:[%s8227_s17 + $0x40] sm:$0xff] (!%p4794_p6) }
0x1be1   :  { %6055 = vmatpush3.bf16.msra.mxu0 (!%p4794_p6), %v6054_v24  ;;  %v6063_v16 = vpack.c.bf16 (!%p4794_p6), %v1868_v29, %v1867_v28  ;;  %v1870_v22 = vld [vmem:[%s8227_s17 + $0x48] sm:$0xff] (!%p4794_p6)  ;;  %v1871_v34 = vld [vmem:[%s8227_s17 + $0x50] sm:$0xff] (!%p4794_p6)  ;;  %v1872_v35 = vld [vmem:[%s8227_s17 + $0x58] sm:$0xff] (!%p4794_p6) }
0x1be2   :  { %6056 = vmatprep.subr.bf16.mxu0 (!%p4794_p6), %v6669_v9  ;;  %v6066_v31 = vpack.c.bf16 (!%p4794_p6), %v1870_v22, %v1869_v30  ;;  %v6069_v36 = vpack.c.bf16 (!%p4794_p6), %v1872_v35, %v1871_v34  ;;  %v1873_v37 = vld [vmem:[%s8227_s17 + $0x60] sm:$0xff] (!%p4794_p6)  ;;  %v1874_v38 = vld [vmem:[%s8227_s17 + $0x68] sm:$0xff] (!%p4794_p6)  ;;  %v1875_v49 = vld [vmem:[%s8227_s17 + $0x70] sm:$0xff] (!%p4794_p6) }
0x1be3   :  { %v6072_v48 = vpack.c.bf16 (!%p4794_p6), %v1874_v38, %v1873_v37  ;;  %v1876_v57 = vld [vmem:[%s8227_s17 + $0x78] sm:$0xff] (!%p4794_p6) }
0x1be4   :  { %v6075_v42 = vpack.c.bf16 (!%p4794_p6), %v1876_v57, %v1875_v49 }
0x1be5   :  { %6058 = vmatpush3.bf16.msra.mxu0 (!%p4794_p6), %v6057_v26 }
0x1be6   :  { %6059 = vmatprep.subr.bf16.mxu0 %v6669_v9 }
0x1be9   :  { %6061 = vmatpush3.bf16.msra.mxu0 %v6060_v40 }
0x1bea   :  { %6062 = vmatprep.subr.bf16.mxu0 %v6669_v9 }
0x1bed   :  { %6064 = vmatpush3.bf16.msra.mxu0 %v6063_v16 }
0x1bee   :  { %6065 = vmatprep.subr.bf16.mxu0 %v6669_v9 }
0x1bf1   :  { %6067 = vmatpush3.bf16.msra.mxu0 %v6066_v31 }
0x1bf2   :  { %6068 = vmatprep.subr.bf16.mxu0 %v6669_v9 }
0x1bf5   :  { %6070 = vmatpush3.bf16.msra.mxu0 %v6069_v36 }
0x1bf6   :  { %6071 = vmatprep.subr.bf16.mxu0 %v6669_v9 }
0x1bf9   :  { %6073 = vmatpush3.bf16.msra.mxu0 %v6072_v48 }
0x1bfa   :  { %6074 = vmatprep.subr.bf16.mxu0 %v6669_v9 }
0x1bfd   :  { %6076 = vmatpush3.bf16.msra.mxu0 %v6075_v42 }
0x1c6b   :  { %v1857_v58 = vpop.xlane.xlu0 %1856 }
0x1c6c   :  { %vm1858_vm5 = vcmp.eq.s32.totalorder %v7048_v32, %v1857_v58 }
0x1c6d   :  { %5480 = vmatmul.mubr.msk.f32.vlgmr.msra.gmra.mrb[0].mxu0 %vm1858_vm5, %v6672_v43 }
0x1d40   :  { %v1943_v44 = vpop.f32.mrb[0].mxu0 }
0x1d41   :  { %1947 = vst.msk [vmem:[#allocation3] sm:$0xff] %vm92_vm1, %v1943_v44  ;;  %v5481_v45 = vpop.f32.mrb[1].mxu0 }
0x1d42 PF:  { %6077 = vmatprep.subr.bf16.mxu0 %v6663_v3  ;;  %5490 = vmatprep.mubr.msk.f32.mxu0 %vm6664_vm0, %v6665_v8  ;;  %v2265_v21 = vld [vmem:[%s8221_s11] sm:$0xff]  ;;  %v2266_v23 = vld [vmem:[%s8221_s11 + $0x8] sm:$0xff]  ;;  %v2267_v9 = vld [vmem:[%s8221_s11 + $0x10] sm:$0xff]  ;;  %s4813_s30 = sld [smem:[#allocation4 + $0x2]] }
0x1d43   :  { %6079 = vmatpush3.bf16.msra.mxu0 %v7043_v4  ;;  %6084 = vmatprep.subr.bf16.mxu1 %v7078_v50  ;;  %v6092_v24 = vpack.c.bf16 %v2266_v23, %v2265_v21  ;;  %v2268_v25 = vld [vmem:[%s8221_s11 + $0x18] sm:$0xff]  ;;  %v2269_v27 = vld [vmem:[%s8221_s11 + $0x20] sm:$0xff]  ;;  %v2270_v14 = vld [vmem:[%s8221_s11 + $0x28] sm:$0xff] }
0x1d44   :  { %6080 = vmatprep.subr.bf16.mxu0 %v6663_v3  ;;  %6086 = vmatpush3.bf16.msra.mxu1 %v7078_v50  ;;  %v6095_v26 = vpack.c.bf16 %v2268_v25, %v2267_v9  ;;  %v6098_v40 = vpack.c.bf16 %v2270_v14, %v2269_v27  ;;  %v2271_v28 = vld [vmem:[%s8221_s11 + $0x30] sm:$0xff]  ;;  %v2272_v29 = vld [vmem:[%s8221_s11 + $0x38] sm:$0xff] }
0x1d45   :  { %6088 = vmatprep.subr.bf16.mxu1 %v7088_v59  ;;  %v6101_v16 = vpack.c.bf16 %v2272_v29, %v2271_v28 }
0x1d47   :  { %6082 = vmatpush3.bf16.msra.mxu0 %v7051_v33 }
0x1d48   :  { %6090 = vmatpush3.bf16.msra.mxu1 %v7088_v59  ;;  %6109 = vmatprep.subr.bf16.mxu0 %v6663_v3  ;;  %p4814_p7 = scmp.le.s32.totalorder %s4813_s30, 0 }
0x1d49   :  { %6091 = vmatprep.subr.bf16.mxu1 %v6663_v3  ;;  %s8237_s20 = sld [smem:[#allocation12_spill]] (!%p4814_p7) }
0x1d4a   :  { %5491 = vmatmul.mubr.msk.f32.vlgmr.msra.gmra.mrb[0].mxu0 %vm92_vm1, %v7278_v54 }
0x1d4b   :  { %5567 = vmatprep.mubr.msk.f32.mxu0 %vm6664_vm0, %v6665_v8 }
0x1e1d   :  { %v2017_v60 = vpop.f32.mrb[0].mxu0 }
0x1e1e   :  { %v5492_v10 = vpop.f32.mrb[1].mxu0  ;;  %v2022_v11 = vadd.f32 %v2017_v60, %v7097_v61  ;;  %v2021_v46 = vadd.f32 %v2017_v60, %v7100_v62  ;;  %v2023_v51 = vadd.f32 %v2017_v60, %v7106_v0  ;;  %v2024_v52 = vadd.f32 %v2017_v60, %v7103_v63 }
0x1e1f   :  { %v2025_v12 = vadd.f32 %v2017_v60, %v7112_v2  ;;  %v2026_v47 = vadd.f32 %v2017_v60, %v7109_v1  ;;  %v2027_v17 = vadd.f32 %v2017_v60, %v7122_v13  ;;  %v2028_v55 = vadd.f32 %v2017_v60, %v7120_v56 }
0x1e20   :  { %6464 = vtanh.f32 %v2022_v11 }
0x1e21   :  { %6466 = vtanh.f32 %v2021_v46 }
0x1e22   :  { %6468 = vtanh.f32 %v2023_v51 }
0x1e23   :  { %6470 = vtanh.f32 %v2024_v52 }
0x1e24   :  { %6472 = vtanh.f32 %v2025_v12 }
0x1e25   :  { %6474 = vtanh.f32 %v2026_v47 }
0x1e26   :  { %6476 = vtanh.f32 %v2027_v17 }
0x1e27   :  { %6478 = vtanh.f32 %v2028_v55 }
0x1e2a   :  { %v6465_v53 = vpop.eup %6464 }
0x1e2b   :  { %v6467_v5 = vpop.eup %6466 }
0x1e2c   :  { %5501 = vmatprep.mubr.msk.f32.mxu1 %vm92_vm1, %v6467_v5  ;;  %v6469_v39 = vpop.eup %6468 }
0x1e2d   :  { %5502 = vmatmul.mubr.msk.f32.vlgmr.msra.gmra.mrb[0].mxu1 %vm92_vm1, %v6465_v53  ;;  %v6471_v15 = vpop.eup %6470 }
0x1e2e   :  { %5504 = vmatprep.mubr.msk.f32.mxu1 %vm92_vm1, %v6469_v39  ;;  %v6473_v18 = vpop.eup %6472  ;;  %6093 = vmatpush3.bf16.msra.mxu1 %v6092_v24 }
0x1e2f   :  { %v6475_v19 = vpop.eup %6474  ;;  %6094 = vmatprep.subr.bf16.mxu1 %v6663_v3 }
0x1e30   :  { %v6477_v20 = vpop.eup %6476 }
0x1e31   :  { %5505 = vmatmul.mubr.msk.f32.gmra.mrb[2].mxu1 %vm92_vm1, %v6471_v15  ;;  %v6479_v7 = vpop.eup %6478 }
0x1e32   :  { %5507 = vmatprep.mubr.msk.f32.mxu1 %vm92_vm1, %v6473_v18  ;;  %6096 = vmatpush3.bf16.msra.mxu1 %v6095_v26 }
0x1e33   :  { %6097 = vmatprep.subr.bf16.mxu1 %v6663_v3 }
0x1e35   :  { %5508 = vmatmul.mubr.msk.f32.gmra.mrb[4].mxu1 %vm92_vm1, %v6475_v19 }
0x1e36   :  { %5510 = vmatprep.mubr.msk.f32.mxu1 %vm92_vm1, %v6477_v20  ;;  %6099 = vmatpush3.bf16.msra.mxu1 %v6098_v40 }
0x1e37   :  { %6100 = vmatprep.subr.bf16.mxu1 %v6663_v3 }
0x1e39   :  { %5511 = vmatmul.mubr.msk.f32.gmra.mrb[6].mxu1 %vm92_vm1, %v6479_v7 }
0x1e3a   :  { %5529 = vmatprep.mubr.msk.f32.mxu1 %vm6664_vm0, %v6665_v8  ;;  %6102 = vmatpush3.bf16.msra.mxu1 %v6101_v16 }
0x1e3b   :  { %6103 = vmatprep.subr.bf16.mxu1 %v6663_v3 }
0x1f00   :  { %v5503_v30 = vpop.f32.mrb[0].mxu1 }
0x1f01   :  { %v2127_v22 = vpop.f32.mrb[1].mxu1  ;;  %v2167_v35 = vsel %vm92_vm1, %v5503_v30, -inf }
0x1f02   :  { %v2166_v38 = vsel %vm92_vm1, %v2127_v22, -inf }
0x1f04   :  { %v5506_v6 = vpop.f32.mrb[2].mxu1 }
0x1f05   :  { %v2137_v31 = vpop.f32.mrb[3].mxu1  ;;  %v2169_v58 = vsel %vm92_vm1, %v5506_v6, -inf }
0x1f06   :  { %v2168_v60 = vsel %vm92_vm1, %v2137_v31, -inf }
0x1f08   :  { %v5509_v34 = vpop.f32.mrb[4].mxu1 }
0x1f09   :  { %v2172_v36 = vsel %vm92_vm1, %v5509_v34, -inf  ;;  %v2147_v37 = vpop.f32.mrb[5].mxu1 }
0x1f0a   :  { %v2173_v48 = vmax.f32 %v2167_v35, %v2172_v36  ;;  %v2170_v49 = vsel %vm92_vm1, %v2147_v37, -inf }
0x1f0b   :  { %v2171_v57 = vmax.f32 %v2166_v38, %v2170_v49 }
0x1f0c   :  { %v5512_v42 = vpop.f32.mrb[6].mxu1 }
0x1f0d   :  { %v2178_v43 = vmax.f32 %v2171_v57, %v2173_v48  ;;  %v2176_v44 = vsel %vm92_vm1, %v5512_v42, -inf  ;;  %v2157_v45 = vpop.f32.mrb[7].mxu1 }
0x1f0e   :  { %v2177_v10 = vmax.f32 %v2169_v58, %v2176_v44  ;;  %v2174_v11 = vsel %vm92_vm1, %v2157_v45, -inf }
0x1f0f   :  { %v2175_v46 = vmax.f32 %v2168_v60, %v2174_v11  ;;  %v2230_v60 = vld [vmem:[#allocation2 + $0x8] sm:$0xff] }
0x1f11   :  { %v2179_v51 = vmax.f32 %v2175_v46, %v2177_v10  ;;  %v2231_v10 = vld [vmem:[#allocation2 + $0x10] sm:$0xff] }
0x1f13   :  { %v2180_v52 = vmax.f32 %v2178_v43, %v2179_v51 }
0x1f15   :  { %v2181_v12 = vsub.f32 %v2127_v22, %v2180_v52  ;;  %v2182_v47 = vsub.f32 %v5503_v30, %v2180_v52  ;;  %v2183_v17 = vsub.f32 %v2137_v31, %v2180_v52  ;;  %v2184_v53 = vsub.f32 %v5506_v6, %v2180_v52 }
0x1f16   :  { %v2185_v55 = vsub.f32 %v2147_v37, %v2180_v52  ;;  %v2186_v5 = vsub.f32 %v5509_v34, %v2180_v52  ;;  %v2187_v39 = vsub.f32 %v2157_v45, %v2180_v52  ;;  %v2188_v15 = vsub.f32 %v5512_v42, %v2180_v52  ;;  %v2229_v45 = vld [vmem:[#allocation2] sm:$0xff] }
0x1f17   :  { %v2189_v18 = vmul.f32 1.442695, %v2181_v12  ;;  %v2191_v19 = vmul.f32 1.442695, %v2182_v47  ;;  %v2193_v20 = vmul.f32 1.442695, %v2183_v17 }
0x1f18   :  { %v2195_v7 = vmul.f32 1.442695, %v2184_v53  ;;  %v2197_v21 = vmul.f32 1.442695, %v2185_v55  ;;  %v2199_v23 = vmul.f32 1.442695, %v2186_v5 }
0x1f19   :  { %6480 = vpow2.f32 %v2189_v18  ;;  %v2201_v9 = vmul.f32 1.442695, %v2187_v39  ;;  %v2203_v24 = vmul.f32 1.442695, %v2188_v15  ;;  %v2232_v55 = vld [vmem:[#allocation2 + $0x18] sm:$0xff]  ;;  %v2233_v18 = vld [vmem:[#allocation2 + $0x20] sm:$0xff] }
0x1f1a   :  { %6482 = vpow2.f32 %v2191_v19 }
0x1f1b   :  { %6484 = vpow2.f32 %v2193_v20 }
0x1f1c   :  { %6486 = vpow2.f32 %v2195_v7 }
0x1f1d   :  { %6488 = vpow2.f32 %v2197_v21  ;;  %v2234_v21 = vld [vmem:[#allocation2 + $0x28] sm:$0xff] }
0x1f1e   :  { %6490 = vpow2.f32 %v2199_v23 }
0x1f1f   :  { %6492 = vpow2.f32 %v2201_v9 }
0x1f20   :  { %6494 = vpow2.f32 %v2203_v24 }
0x1f23   :  { %v6481_v25 = vpop.eup %6480 }
0x1f24   :  { %v6483_v26 = vpop.eup %6482  ;;  %v2205_v27 = vsel %vm92_vm1, %v6481_v25, 0.0 }
0x1f25   :  { %v6485_v14 = vpop.eup %6484  ;;  %v2206_v40 = vsel %vm92_vm1, %v6483_v26, 0.0 }
0x1f26   :  { %v6487_v28 = vpop.eup %6486  ;;  %v2207_v29 = vadd.f32 %v2206_v40, %v2205_v27  ;;  %v2208_v16 = vsel %vm92_vm1, %v6485_v14, 0.0  ;;  %v2236_v40 = vld [vmem:[#allocation2 + $0x38] sm:$0xff] }
0x1f27   :  { %v6489_v30 = vpop.eup %6488  ;;  %v2210_v6 = vsel %vm92_vm1, %v6487_v28, 0.0 }
0x1f28   :  { %v2209_v22 = vadd.f32 %v2208_v16, %v2207_v29  ;;  %v6491_v31 = vpop.eup %6490  ;;  %v2212_v35 = vsel %vm92_vm1, %v6489_v30, 0.0 }
0x1f29   :  { %v6493_v36 = vpop.eup %6492  ;;  %v2214_v38 = vsel %vm92_vm1, %v6491_v31, 0.0 }
0x1f2a   :  { %v2211_v34 = vadd.f32 %v2210_v6, %v2209_v22  ;;  %v6495_v48 = vpop.eup %6494  ;;  %v2216_v57 = vsel %vm92_vm1, %v6493_v36, 0.0 }
0x1f2b   :  { %v2218_v58 = vsel %vm92_vm1, %v6495_v48, 0.0 }
0x1f2c   :  { %v2213_v37 = vadd.f32 %v2212_v35, %v2211_v34 }
0x1f2e   :  { %v2215_v49 = vadd.f32 %v2214_v38, %v2213_v37  ;;  %v2353_v38 = vld [vmem:[%s8222_s12] sm:$0xff] }
0x1f30   :  { %v2217_v42 = vadd.f32 %v2216_v57, %v2215_v49  ;;  %v1948_v49 = vld [vmem:[#allocation3] sm:$0xff] }
0x1f32   :  { %v2219_v43 = vadd.f32 %v2218_v58, %v2217_v42  ;;  %v2355_v58 = vld [vmem:[%s8222_s12 + $0x10] sm:$0xff] }
0x1f34   :  { %6496 = vrcp.f32 %v2219_v43  ;;  %v2356_v43 = vld [vmem:[%s8222_s12 + $0x18] sm:$0xff] }
0x1f3e   :  { %v6497_v44 = vpop.eup %6496 }
0x1f3f   :  { %v2221_v11 = vmul.f32 %v6497_v44, %v6481_v25  ;;  %v2222_v46 = vmul.f32 %v6497_v44, %v6483_v26  ;;  %v2223_v51 = vmul.f32 %v6497_v44, %v6485_v14  ;;  %v2224_v52 = vmul.f32 %v6497_v44, %v6487_v28  ;;  %v2235_v25 = vld [vmem:[#allocation2 + $0x30] sm:$0xff] }
0x1f40   :  { %v2225_v12 = vmul.f32 %v6497_v44, %v6489_v30  ;;  %v2226_v47 = vmul.f32 %v6497_v44, %v6491_v31  ;;  %v2227_v17 = vmul.f32 %v6497_v44, %v6493_v36  ;;  %v2228_v53 = vmul.f32 %v6497_v44, %v6495_v48  ;;  %v2354_v48 = vld [vmem:[%s8222_s12 + $0x8] sm:$0xff] }
0x1f41   :  { %v2237_v5 = vmul.f32 %v2229_v45, %v2221_v11  ;;  %v2238_v39 = vmul.f32 %v2230_v60, %v2222_v46  ;;  %v2239_v15 = vmul.f32 %v2231_v10, %v2223_v51  ;;  %v2240_v19 = vmul.f32 %v2232_v55, %v2224_v52  ;;  %v4808_v11 = vld [vmem:[%s8224_s14] ss:$0 sm:$0xff] }
0x1f42   :  { %v2241_v9 = vmul.f32 %v2233_v18, %v2225_v12  ;;  %v2242_v27 = vmul.f32 %v2234_v21, %v2226_v47  ;;  %v2243_v29 = vmul.f32 %v2235_v25, %v2227_v17  ;;  %v2244_v22 = vmul.f32 %v2236_v40, %v2228_v53  ;;  %v4806_v12 = vld [vmem:[%s8223_s13] ss:$0 sm:$0xff]  ;;  %v2472_v21 = vld [vmem:[%s8225_s15 + $0x10] sm:$0xff] }
0x1f43   :  { %v2245_v20 = vsel %vm92_vm1, %v2237_v5, 0.0  ;;  %v2246_v7 = vsel %vm92_vm1, %v2238_v39, 0.0  ;;  %v2248_v24 = vsel %vm92_vm1, %v2239_v15, 0.0  ;;  %v2250_v14 = vsel %vm92_vm1, %v2240_v19, 0.0  ;;  %v2474_v25 = vld [vmem:[%s8225_s15 + $0x20] sm:$0xff]  ;;  %v2476_v40 = vld [vmem:[%s8225_s15 + $0x30] sm:$0xff] }
0x1f44   :  { %v2247_v23 = vadd.f32 %v2246_v7, %v2245_v20  ;;  %v2252_v16 = vsel %vm92_vm1, %v2241_v9, 0.0  ;;  %v2254_v6 = vsel %vm92_vm1, %v2242_v27, 0.0  ;;  %v2256_v34 = vsel %vm92_vm1, %v2243_v29, 0.0  ;;  %v2470_v20 = vld [vmem:[%s8225_s15] sm:$0xff]  ;;  %v2471_v7 = vld [vmem:[%s8225_s15 + $0x8] sm:$0xff]  ;;  %v2473_v9 = vld [vmem:[%s8225_s15 + $0x18] sm:$0xff] }
0x1f45   :  { %v2258_v36 = vsel %vm92_vm1, %v2244_v22, 0.0  ;;  %v6104_v57 = vpack.c.bf16 %v2354_v48, %v2353_v38  ;;  %v6107_v45 = vpack.c.bf16 %v2356_v43, %v2355_v58 }
0x1f46   :  { %v2249_v26 = vadd.f32 %v2248_v24, %v2247_v23  ;;  %v6110_v23 = vpack.c.bf16 %v2471_v7, %v2470_v20  ;;  %v6113_v24 = vpack.c.bf16 %v2473_v9, %v2472_v21 }
0x1f48   :  { %v2251_v28 = vadd.f32 %v2250_v14, %v2249_v26  ;;  %6111 = vmatpush3.bf16.msra.mxu0 %v6110_v23  ;;  %v2475_v26 = vld [vmem:[%s8225_s15 + $0x28] sm:$0xff] }
0x1f49   :  { %6112 = vmatprep.subr.bf16.mxu0 %v6663_v3  ;;  %v6116_v27 = vpack.c.bf16 %v2475_v26, %v2474_v25 }
0x1f4a   :  { %v2253_v30 = vadd.f32 %v2252_v16, %v2251_v28  ;;  %v2477_v28 = vld [vmem:[%s8225_s15 + $0x38] sm:$0xff]  ;;  %v2478_v16 = vld [vmem:[%s8225_s15 + $0x40] sm:$0xff] }
0x1f4b   :  { %v6119_v29 = vpack.c.bf16 %v2477_v28, %v2476_v40 }
0x1f4c   :  { %v2255_v31 = vadd.f32 %v2254_v6, %v2253_v30  ;;  %6114 = vmatpush3.bf16.msra.mxu0 %v6113_v24  ;;  %v2479_v30 = vld [vmem:[%s8225_s15 + $0x48] sm:$0xff]  ;;  %v2480_v6 = vld [vmem:[%s8225_s15 + $0x50] sm:$0xff] }
0x1f4d   :  { %6115 = vmatprep.subr.bf16.mxu0 %v6663_v3  ;;  %v6122_v22 = vpack.c.bf16 %v2479_v30, %v2478_v16 }
0x1f4e   :  { %v2257_v35 = vadd.f32 %v2256_v34, %v2255_v31  ;;  %v2481_v31 = vld [vmem:[%s8225_s15 + $0x58] sm:$0xff] }
0x1f4f   :  { %v6125_v34 = vpack.c.bf16 %v2481_v31, %v2480_v6 }
0x1f50   :  { %v2259_v37 = vadd.f32 %v2258_v36, %v2257_v35  ;;  %6117 = vmatpush3.bf16.msra.mxu0 %v6116_v27 }
0x1f51   :  { %6118 = vmatprep.subr.bf16.mxu0 %v6663_v3 }
0x1f52   :  { %2261 = vrot.lane.b32.xlu0 %v2259_v37, %s6668_s5 }
0x1f54   :  { %6120 = vmatpush3.bf16.msra.mxu0 %v6119_v29 }
0x1f55   :  { %6121 = vmatprep.subr.bf16.mxu0 %v6663_v3 }
0x1f58   :  { %6123 = vmatpush3.bf16.msra.mxu0 %v6122_v22 }
0x1f59   :  { %6124 = vmatprep.subr.bf16.mxu0 %v6663_v3 }
0x1f5c   :  { %6126 = vmatpush3.bf16.msra.mxu0 %v6125_v34 }
0x1fc4   :  { %v7435_v42 = vpop.permute.xlu0 %2261 }
0x1fc5   :  { %v2264_v44 = vsel %vm92_vm1, %v1948_v49, %v7435_v42 }
0x1fc6   :  { %5530 = vmatmul.mubr.msk.f32.vlgmr.msra.gmra.mrb[8].mxu1 %vm1558_vm2, %v2264_v44 }
0x1fc7   :  { %6105 = vmatpush3.bf16.msra.mxu1 %v6104_v57  ;;  %5540 = vmatprep.mubr.msk.f32.mxu1 %vm6664_vm0, %v6665_v8 }
0x1fc8   :  { %6106 = vmatprep.subr.bf16.mxu1 %v6663_v3 }
0x1fcb   :  { %6108 = vmatpush3.bf16.msra.mxu1 %v6107_v45 }
0x1fce   :  { %5541 = vmatmul.mubr.msk.f32.vlgmr.msra.gmra.mrb[10].mxu1 %vm92_vm1, %v7278_v54 }
0x2099   :  { %v2349_v60 = vpop.f32.mrb[8].mxu1 }
0x209a   :  { %v5531_v10 = vpop.f32.mrb[9].mxu1  ;;  %v2350_v47 = vadd.f32 %v4806_v12, %v2349_v60 }
0x209b   :  { %v4815_v10 = vld [vmem:[%s8237_s20 + $0x10] sm:$0xff] (!%p4814_p7) }
0x209c   :  { %2571 = vst.msk [vmem:[#allocation3] sm:$0xff] (!%p4814_p7), %vm92_vm1, %v4815_v10 }
0x20a1   :  { %v2430_v46 = vpop.f32.mrb[10].mxu1 }
0x20a2   :  { %v2431_v51 = vadd.f32 %v4808_v11, %v2430_v46  ;;  %v5542_v52 = vpop.f32.mrb[11].mxu1 }
0x20a4   :  { %2442 = vrot.lane.b32.xlu0 %v2431_v51, %s6666_s24  ;;  %v2434_v17 = vadd.f32 %v2431_v51, %v2350_v47 }
0x20a6   :  { %v4810_v53 = vmul.f32 -1.442695, %v2434_v17 }
0x20a8   :  { %6498 = vpow2.f32 %v4810_v53 }
0x20b2   :  { %v6499_v54 = vpop.eup %6498 }
0x20b3   :  { %v2438_v55 = vadd.f32 1.0, %v6499_v54 }
0x20b5   :  { %6500 = vrcp.f32 %v2438_v55 }
0x20bf   :  { %v6501_v5 = vpop.eup %6500 }
0x20c0   :  { %v2452_v35 = vsub.f32 1.0, %v6501_v5  ;;  %v2458_v38 = vmul.f32 %v6501_v5, %v7274_v41  ;;  %v4811_v41 = vld [vmem:[%s8226_s16] ss:$0 sm:$0xff] }
0x2116   :  { %v2443_v39 = vpop.permute.xlu0 %2442 }
0x2117   :  { %v2445_v15 = vmul.f32 %v6501_v5, %v2443_v39 }
0x2119   :  { %2447 = vrot.lane.b32.xlu1 %v2445_v15, %s6666_s24 }
0x218b   :  { %v2448_v18 = vpop.permute.xlu1 %2447 }
0x218c   :  { %v2450_v19 = vadd.f32 %v2448_v18, %v2350_v47 }
0x218e   :  { %6502 = vtanh.f32 %v2450_v19 }
0x2198   :  { %v6503_v14 = vpop.eup %6502 }
0x2199   :  { %2454 = vrot.lane.b32.xlu1 %v6503_v14, %s6667_s6 }
0x219d   :  { %2465 = vrot.lane.b32.xlu1 %v1948_v49, %s6666_s24 }
0x220b   :  { %v2455_v36 = vpop.permute.xlu1 %2454 }
0x220c   :  { %v2457_v37 = vmul.f32 %v2455_v36, %v2452_v35 }
0x220e   :  { %v7503_v48 = vadd.f32 %v2458_v38, %v2457_v37 }
0x220f   :  { %v2466_v49 = vpop.permute.xlu1 %2465 }
0x2210   :  { %2461 = vrot.lane.b32.xlu0 %v7503_v48, %s6667_s6 }
0x2282   :  { %v7507_v57 = vpop.permute.xlu0 %2461 }
0x2283   :  { %v2468_v58 = vsel %vm92_vm1, %v7507_v57, %v7435_v42 }
0x2284   :  { %v2469_v43 = vsel %vm1558_vm2, %v2468_v58, %v2466_v49 }
0x2285   :  { %5568 = vmatmul.mubr.msk.f32.vlgmr.msra.gmra.mrb[2].mxu0 %vm1768_vm3, %v2469_v43 }
0x2355   :  { %2568 = sbr.rel (%p4814_p7) target bundleno = 9052 (0x235c), region = 89 }
0x2358   :  { %v2558_v44 = vpop.f32.mrb[2].mxu0 }
0x2359   :  { %v2559_v45 = vadd.f32 %v4811_v41, %v2558_v44  ;;  %v5569_v60 = vpop.f32.mrb[3].mxu0 }
0x235b   :  { %2563 = vst [vmem:[#allocation7 + $0x10] sm:$0xff] %v2559_v45 }
0x235c PF:  { %p4816_p8 = scmp.ne.s32.totalorder %s4813_s30, 0 }
0x235d   :  { %2576 = vmax.index.xlane.f32.xlu0 (!%p4816_p8), %v2559_v45  ;;  %v2581_v42 = vld [vmem:[%s8227_s17] sm:$0xff] (!%p4816_p8)  ;;  %v2582_v11 = vld [vmem:[%s8227_s17 + $0x8] sm:$0xff] (!%p4816_p8)  ;;  %v2583_v46 = vld [vmem:[%s8227_s17 + $0x10] sm:$0xff] (!%p4816_p8)  ;;  %v6673_v51 = vmov (!%p4816_p8), 0.0|0.0   ;;  %vm6674_vm6 = vmmov (!%p4816_p8), 0   ;;  %v6675_v19 = vmov (!%p4816_p8), 0.0  }
0x235e   :  { %2575 = sbr.rel (%p4816_p8) target bundleno = 9409 (0x24c1), region = 93  ;;  %6127 = vmatprep.subr.bf16.mxu0 (!%p4816_p8), %v6673_v51  ;;  %v6128_v52 = vpack.c.bf16 (!%p4816_p8), %v2582_v11, %v2581_v42  ;;  %v2584_v12 = vld [vmem:[%s8227_s17 + $0x18] sm:$0xff] (!%p4816_p8)  ;;  %v2585_v17 = vld [vmem:[%s8227_s17 + $0x20] sm:$0xff] (!%p4816_p8)  ;;  %v2586_v53 = vld [vmem:[%s8227_s17 + $0x28] sm:$0xff] (!%p4816_p8)  ;;  %5602 = vmatprep.mubr.msk.f32.mxu0 (!%p4816_p8), %vm6674_vm6, %v6675_v19  ;;  %v6676_v28 = vmov (!%p4816_p8), 1.0  }
0x235f   :  { %v6131_v47 = vpack.c.bf16 (!%p4816_p8), %v2584_v12, %v2583_v46  ;;  %v6134_v54 = vpack.c.bf16 (!%p4816_p8), %v2586_v53, %v2585_v17  ;;  %v2587_v55 = vld [vmem:[%s8227_s17 + $0x30] sm:$0xff] (!%p4816_p8)  ;;  %v2588_v5 = vld [vmem:[%s8227_s17 + $0x38] sm:$0xff] (!%p4816_p8)  ;;  %v2589_v15 = vld [vmem:[%s8227_s17 + $0x40] sm:$0xff] (!%p4816_p8) }
0x2360   :  { %6129 = vmatpush3.bf16.msra.mxu0 (!%p4816_p8), %v6128_v52  ;;  %v6137_v39 = vpack.c.bf16 (!%p4816_p8), %v2588_v5, %v2587_v55  ;;  %v2590_v18 = vld [vmem:[%s8227_s17 + $0x48] sm:$0xff] (!%p4816_p8)  ;;  %v2591_v7 = vld [vmem:[%s8227_s17 + $0x50] sm:$0xff] (!%p4816_p8)  ;;  %v2592_v21 = vld [vmem:[%s8227_s17 + $0x58] sm:$0xff] (!%p4816_p8) }
0x2361   :  { %6130 = vmatprep.subr.bf16.mxu0 (!%p4816_p8), %v6673_v51  ;;  %v6140_v20 = vpack.c.bf16 (!%p4816_p8), %v2590_v18, %v2589_v15  ;;  %v6143_v23 = vpack.c.bf16 (!%p4816_p8), %v2592_v21, %v2591_v7  ;;  %v2593_v9 = vld [vmem:[%s8227_s17 + $0x60] sm:$0xff] (!%p4816_p8)  ;;  %v2594_v24 = vld [vmem:[%s8227_s17 + $0x68] sm:$0xff] (!%p4816_p8)  ;;  %v2595_v26 = vld [vmem:[%s8227_s17 + $0x70] sm:$0xff] (!%p4816_p8) }
0x2362   :  { %v6146_v25 = vpack.c.bf16 (!%p4816_p8), %v2594_v24, %v2593_v9  ;;  %v2596_v27 = vld [vmem:[%s8227_s17 + $0x78] sm:$0xff] (!%p4816_p8) }
0x2363   :  { %v6149_v14 = vpack.c.bf16 (!%p4816_p8), %v2596_v27, %v2595_v26 }
0x2364   :  { %6132 = vmatpush3.bf16.msra.mxu0 (!%p4816_p8), %v6131_v47 }
0x2365   :  { %6133 = vmatprep.subr.bf16.mxu0 %v6673_v51 }
0x2368   :  { %6135 = vmatpush3.bf16.msra.mxu0 %v6134_v54 }
0x2369   :  { %6136 = vmatprep.subr.bf16.mxu0 %v6673_v51 }
0x236c   :  { %6138 = vmatpush3.bf16.msra.mxu0 %v6137_v39 }
0x236d   :  { %6139 = vmatprep.subr.bf16.mxu0 %v6673_v51 }
0x2370   :  { %6141 = vmatpush3.bf16.msra.mxu0 %v6140_v20 }
0x2371   :  { %6142 = vmatprep.subr.bf16.mxu0 %v6673_v51 }
0x2374   :  { %6144 = vmatpush3.bf16.msra.mxu0 %v6143_v23 }
0x2375   :  { %6145 = vmatprep.subr.bf16.mxu0 %v6673_v51 }
0x2378   :  { %6147 = vmatpush3.bf16.msra.mxu0 %v6146_v25 }
0x2379   :  { %6148 = vmatprep.subr.bf16.mxu0 %v6673_v51 }
0x237c   :  { %6150 = vmatpush3.bf16.msra.mxu0 %v6149_v14 }
0x23ea   :  { %v2577_v40 = vpop.xlane.xlu0 %2576 }
0x23eb   :  { %vm2578_vm7 = vcmp.eq.s32.totalorder %v7048_v32, %v2577_v40 }
0x23ec   :  { %5603 = vmatmul.mubr.msk.f32.vlgmr.msra.gmra.mrb[0].mxu0 %vm2578_vm7, %v6676_v28 }
0x24bf   :  { %v2663_v29 = vpop.f32.mrb[0].mxu0 }
0x24c0   :  { %2667 = vst.msk [vmem:[#allocation3] sm:$0xff] %vm92_vm1, %v2663_v29  ;;  %v5604_v16 = vpop.f32.mrb[1].mxu0 }
0x24c1 PF:  { %6151 = vmatprep.subr.bf16.mxu0 %v6663_v3  ;;  %5613 = vmatprep.mubr.msk.f32.mxu0 %vm6664_vm0, %v6665_v8  ;;  %v2985_v11 = vld [vmem:[%s8221_s11] sm:$0xff]  ;;  %v2986_v46 = vld [vmem:[%s8221_s11 + $0x8] sm:$0xff]  ;;  %v2987_v51 = vld [vmem:[%s8221_s11 + $0x10] sm:$0xff]  ;;  %s4835_s2 = sld [smem:[#allocation4 + $0x3]] }
0x24c2   :  { %6153 = vmatpush3.bf16.msra.mxu0 %v7043_v4  ;;  %6158 = vmatprep.subr.bf16.mxu1 %v7078_v50  ;;  %v6166_v52 = vpack.c.bf16 %v2986_v46, %v2985_v11  ;;  %v2988_v12 = vld [vmem:[%s8221_s11 + $0x18] sm:$0xff]  ;;  %v2989_v17 = vld [vmem:[%s8221_s11 + $0x20] sm:$0xff]  ;;  %v2990_v53 = vld [vmem:[%s8221_s11 + $0x28] sm:$0xff] }
0x24c3   :  { %6154 = vmatprep.subr.bf16.mxu0 %v6663_v3  ;;  %6160 = vmatpush3.bf16.msra.mxu1 %v7078_v50  ;;  %v6169_v47 = vpack.c.bf16 %v2988_v12, %v2987_v51  ;;  %v6172_v54 = vpack.c.bf16 %v2990_v53, %v2989_v17  ;;  %v2991_v55 = vld [vmem:[%s8221_s11 + $0x30] sm:$0xff]  ;;  %v2992_v5 = vld [vmem:[%s8221_s11 + $0x38] sm:$0xff] }
0x24c4   :  { %6162 = vmatprep.subr.bf16.mxu1 %v7088_v59  ;;  %v6175_v39 = vpack.c.bf16 %v2992_v5, %v2991_v55 }
0x24c6   :  { %6156 = vmatpush3.bf16.msra.mxu0 %v7051_v33 }
0x24c7   :  { %6164 = vmatpush3.bf16.msra.mxu1 %v7088_v59  ;;  %6183 = vmatprep.subr.bf16.mxu0 %v6663_v3  ;;  %p4836_p9 = scmp.le.s32.totalorder %s4835_s2, 0 }
0x24c8   :  { %6165 = vmatprep.subr.bf16.mxu1 %v6663_v3  ;;  %s8238_s9 = sld [smem:[#allocation12_spill]] (!%p4836_p9) }
0x24c9   :  { %5614 = vmatmul.mubr.msk.f32.vlgmr.msra.gmra.mrb[0].mxu0 %vm92_vm1, %v7507_v57 }
0x24ca   :  { %5690 = vmatprep.mubr.msk.f32.mxu0 %vm6664_vm0, %v6665_v8 }
0x259c   :  { %v2737_v30 = vpop.f32.mrb[0].mxu0 }
0x259d   :  { %v5615_v22 = vpop.f32.mrb[1].mxu0  ;;  %v2742_v6 = vadd.f32 %v2737_v30, %v7097_v61  ;;  %v2741_v31 = vadd.f32 %v2737_v30, %v7100_v62  ;;  %v2743_v34 = vadd.f32 %v2737_v30, %v7106_v0  ;;  %v2744_v35 = vadd.f32 %v2737_v30, %v7103_v63 }
0x259e   :  { %v2745_v36 = vadd.f32 %v2737_v30, %v7112_v2  ;;  %v2746_v37 = vadd.f32 %v2737_v30, %v7109_v1  ;;  %v2747_v38 = vadd.f32 %v2737_v30, %v7122_v13  ;;  %v2748_v58 = vadd.f32 %v2737_v30, %v7120_v56 }
0x259f   :  { %6504 = vtanh.f32 %v2742_v6 }
0x25a0   :  { %6506 = vtanh.f32 %v2741_v31 }
0x25a1   :  { %6508 = vtanh.f32 %v2743_v34 }
0x25a2   :  { %6510 = vtanh.f32 %v2744_v35 }
0x25a3   :  { %6512 = vtanh.f32 %v2745_v36 }
0x25a4   :  { %6514 = vtanh.f32 %v2746_v37 }
0x25a5   :  { %6516 = vtanh.f32 %v2747_v38 }
0x25a6   :  { %6518 = vtanh.f32 %v2748_v58 }
0x25a9   :  { %v6505_v49 = vpop.eup %6504 }
0x25aa   :  { %v6507_v43 = vpop.eup %6506 }
0x25ab   :  { %5624 = vmatprep.mubr.msk.f32.mxu1 %vm92_vm1, %v6507_v43  ;;  %v6509_v41 = vpop.eup %6508 }
0x25ac   :  { %5625 = vmatmul.mubr.msk.f32.vlgmr.msra.gmra.mrb[0].mxu1 %vm92_vm1, %v6505_v49  ;;  %v6511_v44 = vpop.eup %6510 }
0x25ad   :  { %5627 = vmatprep.mubr.msk.f32.mxu1 %vm92_vm1, %v6509_v41  ;;  %v6513_v45 = vpop.eup %6512  ;;  %6167 = vmatpush3.bf16.msra.mxu1 %v6166_v52 }
0x25ae   :  { %v6515_v60 = vpop.eup %6514  ;;  %6168 = vmatprep.subr.bf16.mxu1 %v6663_v3 }
0x25af   :  { %v6517_v10 = vpop.eup %6516 }
0x25b0   :  { %5628 = vmatmul.mubr.msk.f32.gmra.mrb[2].mxu1 %vm92_vm1, %v6511_v44  ;;  %v6519_v42 = vpop.eup %6518 }
0x25b1   :  { %5630 = vmatprep.mubr.msk.f32.mxu1 %vm92_vm1, %v6513_v45  ;;  %6170 = vmatpush3.bf16.msra.mxu1 %v6169_v47 }
0x25b2   :  { %6171 = vmatprep.subr.bf16.mxu1 %v6663_v3 }
0x25b4   :  { %5631 = vmatmul.mubr.msk.f32.gmra.mrb[4].mxu1 %vm92_vm1, %v6515_v60 }
0x25b5   :  { %5633 = vmatprep.mubr.msk.f32.mxu1 %vm92_vm1, %v6517_v10  ;;  %6173 = vmatpush3.bf16.msra.mxu1 %v6172_v54 }
0x25b6   :  { %6174 = vmatprep.subr.bf16.mxu1 %v6663_v3 }
0x25b8   :  { %5634 = vmatmul.mubr.msk.f32.gmra.mrb[6].mxu1 %vm92_vm1, %v6519_v42 }
0x25b9   :  { %5652 = vmatprep.mubr.msk.f32.mxu1 %vm6664_vm0, %v6665_v8  ;;  %6176 = vmatpush3.bf16.msra.mxu1 %v6175_v39 }
0x25ba   :  { %6177 = vmatprep.subr.bf16.mxu1 %v6663_v3 }
0x267f   :  { %v5626_v15 = vpop.f32.mrb[0].mxu1 }
0x2680   :  { %v2847_v18 = vpop.f32.mrb[1].mxu1  ;;  %v2887_v21 = vsel %vm92_vm1, %v5626_v15, -inf }
0x2681   :  { %v2886_v24 = vsel %vm92_vm1, %v2847_v18, -inf }
0x2683   :  { %v5629_v19 = vpop.f32.mrb[2].mxu1 }
0x2684   :  { %v2857_v20 = vpop.f32.mrb[3].mxu1  ;;  %v2889_v40 = vsel %vm92_vm1, %v5629_v19, -inf }
0x2685   :  { %v2888_v30 = vsel %vm92_vm1, %v2857_v20, -inf }
0x2687   :  { %v5632_v7 = vpop.f32.mrb[4].mxu1 }
0x2688   :  { %v2892_v23 = vsel %vm92_vm1, %v5632_v7, -inf  ;;  %v2867_v9 = vpop.f32.mrb[5].mxu1 }
0x2689   :  { %v2893_v25 = vmax.f32 %v2887_v21, %v2892_v23  ;;  %v2890_v26 = vsel %vm92_vm1, %v2867_v9, -inf }
0x268a   :  { %v2891_v27 = vmax.f32 %v2886_v24, %v2890_v26 }
0x268b   :  { %v5635_v14 = vpop.f32.mrb[6].mxu1 }
0x268c   :  { %v2898_v28 = vmax.f32 %v2891_v27, %v2893_v25  ;;  %v2896_v29 = vsel %vm92_vm1, %v5635_v14, -inf  ;;  %v2877_v16 = vpop.f32.mrb[7].mxu1 }
0x268d   :  { %v2897_v22 = vmax.f32 %v2889_v40, %v2896_v29  ;;  %v2894_v6 = vsel %vm92_vm1, %v2877_v16, -inf }
0x268e   :  { %v2895_v31 = vmax.f32 %v2888_v30, %v2894_v6  ;;  %v2950_v30 = vld [vmem:[#allocation2 + $0x8] sm:$0xff] }
0x2690   :  { %v2899_v34 = vmax.f32 %v2895_v31, %v2897_v22  ;;  %v2951_v22 = vld [vmem:[#allocation2 + $0x10] sm:$0xff] }
0x2692   :  { %v2900_v35 = vmax.f32 %v2898_v28, %v2899_v34 }
0x2694   :  { %v2901_v36 = vsub.f32 %v2847_v18, %v2900_v35  ;;  %v2902_v37 = vsub.f32 %v5626_v15, %v2900_v35  ;;  %v2903_v38 = vsub.f32 %v2857_v20, %v2900_v35  ;;  %v2904_v49 = vsub.f32 %v5629_v19, %v2900_v35 }
0x2695   :  { %v2905_v58 = vsub.f32 %v2867_v9, %v2900_v35  ;;  %v2906_v43 = vsub.f32 %v5632_v7, %v2900_v35  ;;  %v2907_v41 = vsub.f32 %v2877_v16, %v2900_v35  ;;  %v2908_v44 = vsub.f32 %v5635_v14, %v2900_v35  ;;  %v2949_v16 = vld [vmem:[#allocation2] sm:$0xff] }
0x2696   :  { %v2909_v45 = vmul.f32 1.442695, %v2901_v36  ;;  %v2911_v60 = vmul.f32 1.442695, %v2902_v37  ;;  %v2913_v10 = vmul.f32 1.442695, %v2903_v38 }
0x2697   :  { %v2915_v42 = vmul.f32 1.442695, %v2904_v49  ;;  %v2917_v11 = vmul.f32 1.442695, %v2905_v58  ;;  %v2919_v46 = vmul.f32 1.442695, %v2906_v43 }
0x2698   :  { %6520 = vpow2.f32 %v2909_v45  ;;  %v2921_v51 = vmul.f32 1.442695, %v2907_v41  ;;  %v2923_v52 = vmul.f32 1.442695, %v2908_v44  ;;  %v2952_v58 = vld [vmem:[#allocation2 + $0x18] sm:$0xff]  ;;  %v2953_v45 = vld [vmem:[#allocation2 + $0x20] sm:$0xff] }
0x2699   :  { %6522 = vpow2.f32 %v2911_v60 }
0x269a   :  { %6524 = vpow2.f32 %v2913_v10 }
0x269b   :  { %6526 = vpow2.f32 %v2915_v42 }
0x269c   :  { %6528 = vpow2.f32 %v2917_v11  ;;  %v2954_v11 = vld [vmem:[#allocation2 + $0x28] sm:$0xff] }
0x269d   :  { %6530 = vpow2.f32 %v2919_v46 }
0x269e   :  { %6532 = vpow2.f32 %v2921_v51 }
0x269f   :  { %6534 = vpow2.f32 %v2923_v52 }
0x26a2   :  { %v6521_v12 = vpop.eup %6520 }
0x26a3   :  { %v6523_v47 = vpop.eup %6522  ;;  %v2925_v17 = vsel %vm92_vm1, %v6521_v12, 0.0 }
0x26a4   :  { %v6525_v53 = vpop.eup %6524  ;;  %v2926_v54 = vsel %vm92_vm1, %v6523_v47, 0.0 }
0x26a5   :  { %v6527_v55 = vpop.eup %6526  ;;  %v2927_v5 = vadd.f32 %v2926_v54, %v2925_v17  ;;  %v2928_v39 = vsel %vm92_vm1, %v6525_v53, 0.0  ;;  %v2956_v54 = vld [vmem:[#allocation2 + $0x38] sm:$0xff] }
0x26a6   :  { %v6529_v15 = vpop.eup %6528  ;;  %v2930_v19 = vsel %vm92_vm1, %v6527_v55, 0.0 }
0x26a7   :  { %v2929_v18 = vadd.f32 %v2928_v39, %v2927_v5  ;;  %v6531_v20 = vpop.eup %6530  ;;  %v2932_v21 = vsel %vm92_vm1, %v6529_v15, 0.0 }
0x26a8   :  { %v6533_v23 = vpop.eup %6532  ;;  %v2934_v24 = vsel %vm92_vm1, %v6531_v20, 0.0 }
0x26a9   :  { %v2931_v7 = vadd.f32 %v2930_v19, %v2929_v18  ;;  %v6535_v25 = vpop.eup %6534  ;;  %v2936_v27 = vsel %vm92_vm1, %v6533_v23, 0.0 }
0x26aa   :  { %v2938_v40 = vsel %vm92_vm1, %v6535_v25, 0.0 }
0x26ab   :  { %v2933_v9 = vadd.f32 %v2932_v21, %v2931_v7 }
0x26ad   :  { %v2935_v26 = vadd.f32 %v2934_v24, %v2933_v9  ;;  %v3073_v24 = vld [vmem:[%s8222_s12] sm:$0xff] }
0x26af   :  { %v2937_v14 = vadd.f32 %v2936_v27, %v2935_v26  ;;  %v2668_v26 = vld [vmem:[#allocation3] sm:$0xff] }
0x26b1   :  { %v2939_v28 = vadd.f32 %v2938_v40, %v2937_v14  ;;  %v3075_v40 = vld [vmem:[%s8222_s12 + $0x10] sm:$0xff] }
0x26b3   :  { %6536 = vrcp.f32 %v2939_v28  ;;  %v3076_v28 = vld [vmem:[%s8222_s12 + $0x18] sm:$0xff] }
0x26bd   :  { %v6537_v29 = vpop.eup %6536 }
0x26be   :  { %v2941_v6 = vmul.f32 %v6537_v29, %v6521_v12  ;;  %v2942_v31 = vmul.f32 %v6537_v29, %v6523_v47  ;;  %v2943_v34 = vmul.f32 %v6537_v29, %v6525_v53  ;;  %v2944_v35 = vmul.f32 %v6537_v29, %v6527_v55  ;;  %v2955_v12 = vld [vmem:[#allocation2 + $0x30] sm:$0xff] }
0x26bf   :  { %v2945_v36 = vmul.f32 %v6537_v29, %v6529_v15  ;;  %v2946_v37 = vmul.f32 %v6537_v29, %v6531_v20  ;;  %v2947_v38 = vmul.f32 %v6537_v29, %v6533_v23  ;;  %v2948_v49 = vmul.f32 %v6537_v29, %v6535_v25  ;;  %v3074_v25 = vld [vmem:[%s8222_s12 + $0x8] sm:$0xff] }
0x26c0   :  { %v2957_v43 = vmul.f32 %v2949_v16, %v2941_v6  ;;  %v2958_v41 = vmul.f32 %v2950_v30, %v2942_v31  ;;  %v2959_v44 = vmul.f32 %v2951_v22, %v2943_v34  ;;  %v2960_v60 = vmul.f32 %v2952_v58, %v2944_v35  ;;  %v4830_v6 = vld [vmem:[%s8224_s14] ss:$0 sm:$0xff] }
0x26c1   :  { %v2961_v51 = vmul.f32 %v2953_v45, %v2945_v36  ;;  %v2962_v17 = vmul.f32 %v2954_v11, %v2946_v37  ;;  %v2963_v5 = vmul.f32 %v2955_v12, %v2947_v38  ;;  %v2964_v18 = vmul.f32 %v2956_v54, %v2948_v49  ;;  %v4828_v36 = vld [vmem:[%s8223_s13] ss:$0 sm:$0xff]  ;;  %v3192_v11 = vld [vmem:[%s8225_s15 + $0x10] sm:$0xff] }
0x26c2   :  { %v2965_v10 = vsel %vm92_vm1, %v2957_v43, 0.0  ;;  %v2966_v42 = vsel %vm92_vm1, %v2958_v41, 0.0  ;;  %v2968_v52 = vsel %vm92_vm1, %v2959_v44, 0.0  ;;  %v2970_v53 = vsel %vm92_vm1, %v2960_v60, 0.0  ;;  %v3194_v12 = vld [vmem:[%s8225_s15 + $0x20] sm:$0xff]  ;;  %v3196_v54 = vld [vmem:[%s8225_s15 + $0x30] sm:$0xff] }
0x26c3   :  { %v2967_v46 = vadd.f32 %v2966_v42, %v2965_v10  ;;  %v2972_v39 = vsel %vm92_vm1, %v2961_v51, 0.0  ;;  %v2974_v19 = vsel %vm92_vm1, %v2962_v17, 0.0  ;;  %v2976_v7 = vsel %vm92_vm1, %v2963_v5, 0.0  ;;  %v3190_v10 = vld [vmem:[%s8225_s15] sm:$0xff]  ;;  %v3191_v42 = vld [vmem:[%s8225_s15 + $0x8] sm:$0xff]  ;;  %v3193_v51 = vld [vmem:[%s8225_s15 + $0x18] sm:$0xff] }
0x26c4   :  { %v2978_v23 = vsel %vm92_vm1, %v2964_v18, 0.0  ;;  %v6178_v27 = vpack.c.bf16 %v3074_v25, %v3073_v24  ;;  %v6181_v16 = vpack.c.bf16 %v3076_v28, %v3075_v40 }
0x26c5   :  { %v2969_v47 = vadd.f32 %v2968_v52, %v2967_v46  ;;  %v6184_v46 = vpack.c.bf16 %v3191_v42, %v3190_v10  ;;  %v6187_v52 = vpack.c.bf16 %v3193_v51, %v3192_v11 }
0x26c7   :  { %v2971_v55 = vadd.f32 %v2970_v53, %v2969_v47  ;;  %6185 = vmatpush3.bf16.msra.mxu0 %v6184_v46  ;;  %v3195_v47 = vld [vmem:[%s8225_s15 + $0x28] sm:$0xff] }
0x26c8   :  { %6186 = vmatprep.subr.bf16.mxu0 %v6663_v3  ;;  %v6190_v17 = vpack.c.bf16 %v3195_v47, %v3194_v12 }
0x26c9   :  { %v2973_v15 = vadd.f32 %v2972_v39, %v2971_v55  ;;  %v3197_v55 = vld [vmem:[%s8225_s15 + $0x38] sm:$0xff]  ;;  %v3198_v39 = vld [vmem:[%s8225_s15 + $0x40] sm:$0xff] }
0x26ca   :  { %v6193_v5 = vpack.c.bf16 %v3197_v55, %v3196_v54 }
0x26cb   :  { %v2975_v20 = vadd.f32 %v2974_v19, %v2973_v15  ;;  %6188 = vmatpush3.bf16.msra.mxu0 %v6187_v52  ;;  %v3199_v15 = vld [vmem:[%s8225_s15 + $0x48] sm:$0xff]  ;;  %v3200_v19 = vld [vmem:[%s8225_s15 + $0x50] sm:$0xff] }
0x26cc   :  { %6189 = vmatprep.subr.bf16.mxu0 %v6663_v3  ;;  %v6196_v18 = vpack.c.bf16 %v3199_v15, %v3198_v39 }
0x26cd   :  { %v2977_v21 = vadd.f32 %v2976_v7, %v2975_v20  ;;  %v3201_v20 = vld [vmem:[%s8225_s15 + $0x58] sm:$0xff] }
0x26ce   :  { %v6199_v7 = vpack.c.bf16 %v3201_v20, %v3200_v19 }
0x26cf   :  { %v2979_v9 = vadd.f32 %v2978_v23, %v2977_v21  ;;  %6191 = vmatpush3.bf16.msra.mxu0 %v6190_v17 }
0x26d0   :  { %6192 = vmatprep.subr.bf16.mxu0 %v6663_v3 }
0x26d1   :  { %2981 = vrot.lane.b32.xlu0 %v2979_v9, %s6668_s5 }
0x26d3   :  { %6194 = vmatpush3.bf16.msra.mxu0 %v6193_v5 }
0x26d4   :  { %6195 = vmatprep.subr.bf16.mxu0 %v6663_v3 }
0x26d7   :  { %6197 = vmatpush3.bf16.msra.mxu0 %v6196_v18 }
0x26d8   :  { %6198 = vmatprep.subr.bf16.mxu0 %v6663_v3 }
0x26db   :  { %6200 = vmatpush3.bf16.msra.mxu0 %v6199_v7 }
0x2743   :  { %v7664_v14 = vpop.permute.xlu0 %2981 }
0x2744   :  { %v2984_v29 = vsel %vm92_vm1, %v2668_v26, %v7664_v14 }
0x2745   :  { %5653 = vmatmul.mubr.msk.f32.vlgmr.msra.gmra.mrb[8].mxu1 %vm1558_vm2, %v2984_v29 }
0x2746   :  { %6179 = vmatpush3.bf16.msra.mxu1 %v6178_v27  ;;  %5663 = vmatprep.mubr.msk.f32.mxu1 %vm6664_vm0, %v6665_v8 }
0x2747   :  { %6180 = vmatprep.subr.bf16.mxu1 %v6663_v3 }
0x274a   :  { %6182 = vmatpush3.bf16.msra.mxu1 %v6181_v16 }
0x274d   :  { %5664 = vmatmul.mubr.msk.f32.vlgmr.msra.gmra.mrb[10].mxu1 %vm92_vm1, %v7507_v57 }
0x2818   :  { %v3069_v30 = vpop.f32.mrb[8].mxu1 }
0x2819   :  { %v5654_v22 = vpop.f32.mrb[9].mxu1  ;;  %v3070_v37 = vadd.f32 %v4828_v36, %v3069_v30 }
0x281a   :  { %v4837_v22 = vld [vmem:[%s8238_s9 + $0x18] sm:$0xff] (!%p4836_p9) }
0x281b   :  { %3291 = vst.msk [vmem:[#allocation3] sm:$0xff] (!%p4836_p9), %vm92_vm1, %v4837_v22 }
0x2820   :  { %v3150_v31 = vpop.f32.mrb[10].mxu1 }
0x2821   :  { %v3151_v34 = vadd.f32 %v4830_v6, %v3150_v31  ;;  %v5665_v35 = vpop.f32.mrb[11].mxu1 }
0x2823   :  { %3162 = vrot.lane.b32.xlu0 %v3151_v34, %s6666_s24  ;;  %v3154_v38 = vadd.f32 %v3151_v34, %v3070_v37 }
0x2825   :  { %v4832_v49 = vmul.f32 -1.442695, %v3154_v38 }
0x2827   :  { %6538 = vpow2.f32 %v4832_v49 }
0x2831   :  { %v6539_v57 = vpop.eup %6538 }
0x2832   :  { %v3158_v58 = vadd.f32 1.0, %v6539_v57 }
0x2834   :  { %6540 = vrcp.f32 %v3158_v58 }
0x283e   :  { %v6541_v43 = vpop.eup %6540 }
0x283f   :  { %v3172_v21 = vsub.f32 1.0, %v6541_v43  ;;  %v3178_v24 = vmul.f32 %v6541_v43, %v7503_v48  ;;  %v4833_v48 = vld [vmem:[%s8226_s16] ss:$0 sm:$0xff] }
0x2895   :  { %v3163_v41 = vpop.permute.xlu0 %3162 }
0x2896   :  { %v3165_v44 = vmul.f32 %v6541_v43, %v3163_v41 }
0x2898   :  { %3167 = vrot.lane.b32.xlu1 %v3165_v44, %s6666_s24 }
0x290a   :  { %v3168_v45 = vpop.permute.xlu1 %3167 }
0x290b   :  { %v3170_v60 = vadd.f32 %v3168_v45, %v3070_v37 }
0x290d   :  { %6542 = vtanh.f32 %v3170_v60 }
0x2917   :  { %v6543_v53 = vpop.eup %6542 }
0x2918   :  { %3174 = vrot.lane.b32.xlu1 %v6543_v53, %s6667_s6 }
0x291c   :  { %3185 = vrot.lane.b32.xlu1 %v2668_v26, %s6666_s24 }
0x298a   :  { %v3175_v23 = vpop.permute.xlu1 %3174 }
0x298b   :  { %v3177_v9 = vmul.f32 %v3175_v23, %v3172_v21 }
0x298d   :  { %v7732_v25 = vadd.f32 %v3178_v24, %v3177_v9 }
0x298e   :  { %v3186_v26 = vpop.permute.xlu1 %3185 }
0x298f   :  { %3181 = vrot.lane.b32.xlu0 %v7732_v25, %s6667_s6 }
0x2a01   :  { %v7736_v27 = vpop.permute.xlu0 %3181 }
0x2a02   :  { %v3188_v40 = vsel %vm92_vm1, %v7736_v27, %v7664_v14 }
0x2a03   :  { %v3189_v28 = vsel %vm1558_vm2, %v3188_v40, %v3186_v26 }
0x2a04   :  { %5691 = vmatmul.mubr.msk.f32.vlgmr.msra.gmra.mrb[2].mxu0 %vm1768_vm3, %v3189_v28 }
0x2ad4   :  { %3288 = sbr.rel (%p4836_p9) target bundleno = 10971 (0x2adb), region = 97 }
0x2ad7   :  { %v3278_v29 = vpop.f32.mrb[2].mxu0 }
0x2ad8   :  { %v3279_v16 = vadd.f32 %v4833_v48, %v3278_v29  ;;  %v5692_v30 = vpop.f32.mrb[3].mxu0 }
0x2ada   :  { %3283 = vst [vmem:[#allocation7 + $0x18] sm:$0xff] %v3279_v16 }
0x2adb PF:  { %p4838_p10 = scmp.ne.s32.totalorder %s4835_s2, 0 }
0x2adc   :  { %3296 = vmax.index.xlane.f32.xlu0 (!%p4838_p10), %v3279_v16  ;;  %v3301_v14 = vld [vmem:[%s8227_s17] sm:$0xff] (!%p4838_p10)  ;;  %v3302_v6 = vld [vmem:[%s8227_s17 + $0x8] sm:$0xff] (!%p4838_p10)  ;;  %v3303_v31 = vld [vmem:[%s8227_s17 + $0x10] sm:$0xff] (!%p4838_p10)  ;;  %v6677_v34 = vmov (!%p4838_p10), 0.0|0.0   ;;  %vm6678_vm8 = vmmov (!%p4838_p10), 0   ;;  %v6679_v60 = vmov (!%p4838_p10), 0.0  }
0x2add   :  { %3295 = sbr.rel (%p4838_p10) target bundleno = 11328 (0x2c40), region = 101  ;;  %6201 = vmatprep.subr.bf16.mxu0 (!%p4838_p10), %v6677_v34  ;;  %v6202_v35 = vpack.c.bf16 (!%p4838_p10), %v3302_v6, %v3301_v14  ;;  %v3304_v36 = vld [vmem:[%s8227_s17 + $0x18] sm:$0xff] (!%p4838_p10)  ;;  %v3305_v38 = vld [vmem:[%s8227_s17 + $0x20] sm:$0xff] (!%p4838_p10)  ;;  %v3306_v49 = vld [vmem:[%s8227_s17 + $0x28] sm:$0xff] (!%p4838_p10)  ;;  %5725 = vmatprep.mubr.msk.f32.mxu0 (!%p4838_p10), %vm6678_vm8, %v6679_v60  ;;  %v6680_v55 = vmov (!%p4838_p10), 1.0  }
0x2ade   :  { %v6205_v37 = vpack.c.bf16 (!%p4838_p10), %v3304_v36, %v3303_v31  ;;  %v6208_v57 = vpack.c.bf16 (!%p4838_p10), %v3306_v49, %v3305_v38  ;;  %v3307_v58 = vld [vmem:[%s8227_s17 + $0x30] sm:$0xff] (!%p4838_p10)  ;;  %v3308_v43 = vld [vmem:[%s8227_s17 + $0x38] sm:$0xff] (!%p4838_p10)  ;;  %v3309_v44 = vld [vmem:[%s8227_s17 + $0x40] sm:$0xff] (!%p4838_p10) }
0x2adf   :  { %6203 = vmatpush3.bf16.msra.mxu0 (!%p4838_p10), %v6202_v35  ;;  %v6211_v41 = vpack.c.bf16 (!%p4838_p10), %v3308_v43, %v3307_v58  ;;  %v3310_v45 = vld [vmem:[%s8227_s17 + $0x48] sm:$0xff] (!%p4838_p10)  ;;  %v3311_v42 = vld [vmem:[%s8227_s17 + $0x50] sm:$0xff] (!%p4838_p10)  ;;  %v3312_v11 = vld [vmem:[%s8227_s17 + $0x58] sm:$0xff] (!%p4838_p10) }
0x2ae0   :  { %6204 = vmatprep.subr.bf16.mxu0 (!%p4838_p10), %v6677_v34  ;;  %v6214_v10 = vpack.c.bf16 (!%p4838_p10), %v3310_v45, %v3309_v44  ;;  %v6217_v46 = vpack.c.bf16 (!%p4838_p10), %v3312_v11, %v3311_v42  ;;  %v3313_v51 = vld [vmem:[%s8227_s17 + $0x60] sm:$0xff] (!%p4838_p10)  ;;  %v3314_v52 = vld [vmem:[%s8227_s17 + $0x68] sm:$0xff] (!%p4838_p10)  ;;  %v3315_v47 = vld [vmem:[%s8227_s17 + $0x70] sm:$0xff] (!%p4838_p10) }
0x2ae1   :  { %v6220_v12 = vpack.c.bf16 (!%p4838_p10), %v3314_v52, %v3313_v51  ;;  %v3316_v17 = vld [vmem:[%s8227_s17 + $0x78] sm:$0xff] (!%p4838_p10) }
0x2ae2   :  { %v6223_v53 = vpack.c.bf16 (!%p4838_p10), %v3316_v17, %v3315_v47 }
0x2ae3   :  { %6206 = vmatpush3.bf16.msra.mxu0 (!%p4838_p10), %v6205_v37 }
0x2ae4   :  { %6207 = vmatprep.subr.bf16.mxu0 %v6677_v34 }
0x2ae7   :  { %6209 = vmatpush3.bf16.msra.mxu0 %v6208_v57 }
0x2ae8   :  { %6210 = vmatprep.subr.bf16.mxu0 %v6677_v34 }
0x2aeb   :  { %6212 = vmatpush3.bf16.msra.mxu0 %v6211_v41 }
0x2aec   :  { %6213 = vmatprep.subr.bf16.mxu0 %v6677_v34 }
0x2aef   :  { %6215 = vmatpush3.bf16.msra.mxu0 %v6214_v10 }
0x2af0   :  { %6216 = vmatprep.subr.bf16.mxu0 %v6677_v34 }
0x2af3   :  { %6218 = vmatpush3.bf16.msra.mxu0 %v6217_v46 }
0x2af4   :  { %6219 = vmatprep.subr.bf16.mxu0 %v6677_v34 }
0x2af7   :  { %6221 = vmatpush3.bf16.msra.mxu0 %v6220_v12 }
0x2af8   :  { %6222 = vmatprep.subr.bf16.mxu0 %v6677_v34 }
0x2afb   :  { %6224 = vmatpush3.bf16.msra.mxu0 %v6223_v53 }
0x2b69   :  { %v3297_v54 = vpop.xlane.xlu0 %3296 }
0x2b6a   :  { %vm3298_vm9 = vcmp.eq.s32.totalorder %v7048_v32, %v3297_v54 }
0x2b6b   :  { %5726 = vmatmul.mubr.msk.f32.vlgmr.msra.gmra.mrb[0].mxu0 %vm3298_vm9, %v6680_v55 }
0x2c3e   :  { %v3383_v5 = vpop.f32.mrb[0].mxu0 }
0x2c3f   :  { %3387 = vst.msk [vmem:[#allocation3] sm:$0xff] %vm92_vm1, %v3383_v5  ;;  %v5727_v39 = vpop.f32.mrb[1].mxu0 }
0x2c40 PF:  { %6225 = vmatprep.subr.bf16.mxu0 %v6663_v3  ;;  %5736 = vmatprep.mubr.msk.f32.mxu0 %vm6664_vm0, %v6665_v8  ;;  %v3705_v6 = vld [vmem:[%s8221_s11] sm:$0xff]  ;;  %v3706_v31 = vld [vmem:[%s8221_s11 + $0x8] sm:$0xff]  ;;  %v3707_v34 = vld [vmem:[%s8221_s11 + $0x10] sm:$0xff]  ;;  %s4857_s30 = sld [smem:[#allocation4 + $0x4]] }
0x2c41   :  { %6227 = vmatpush3.bf16.msra.mxu0 %v7043_v4  ;;  %6232 = vmatprep.subr.bf16.mxu1 %v7078_v50  ;;  %v6240_v35 = vpack.c.bf16 %v3706_v31, %v3705_v6  ;;  %v3708_v36 = vld [vmem:[%s8221_s11 + $0x18] sm:$0xff]  ;;  %v3709_v38 = vld [vmem:[%s8221_s11 + $0x20] sm:$0xff]  ;;  %v3710_v49 = vld [vmem:[%s8221_s11 + $0x28] sm:$0xff] }
0x2c42   :  { %6228 = vmatprep.subr.bf16.mxu0 %v6663_v3  ;;  %6234 = vmatpush3.bf16.msra.mxu1 %v7078_v50  ;;  %v6243_v37 = vpack.c.bf16 %v3708_v36, %v3707_v34  ;;  %v6246_v57 = vpack.c.bf16 %v3710_v49, %v3709_v38  ;;  %v3711_v58 = vld [vmem:[%s8221_s11 + $0x30] sm:$0xff]  ;;  %v3712_v43 = vld [vmem:[%s8221_s11 + $0x38] sm:$0xff] }
0x2c43   :  { %6236 = vmatprep.subr.bf16.mxu1 %v7088_v59  ;;  %v6249_v41 = vpack.c.bf16 %v3712_v43, %v3711_v58 }
0x2c45   :  { %6230 = vmatpush3.bf16.msra.mxu0 %v7051_v33 }
0x2c46   :  { %6238 = vmatpush3.bf16.msra.mxu1 %v7088_v59  ;;  %6257 = vmatprep.subr.bf16.mxu0 %v6663_v3  ;;  %p4858_p11 = scmp.le.s32.totalorder %s4857_s30, 0 }
0x2c47   :  { %6239 = vmatprep.subr.bf16.mxu1 %v6663_v3  ;;  %s8239_s20 = sld [smem:[#allocation12_spill]] (!%p4858_p11) }
0x2c48   :  { %5737 = vmatmul.mubr.msk.f32.vlgmr.msra.gmra.mrb[0].mxu0 %vm92_vm1, %v7736_v27 }
0x2c49   :  { %5813 = vmatprep.mubr.msk.f32.mxu0 %vm6664_vm0, %v6665_v8 }
0x2d1b   :  { %v3457_v15 = vpop.f32.mrb[0].mxu0 }
0x2d1c   :  { %v5738_v18 = vpop.f32.mrb[1].mxu0  ;;  %v3462_v19 = vadd.f32 %v3457_v15, %v7097_v61  ;;  %v3461_v20 = vadd.f32 %v3457_v15, %v7100_v62  ;;  %v3463_v7 = vadd.f32 %v3457_v15, %v7106_v0  ;;  %v3464_v21 = vadd.f32 %v3457_v15, %v7103_v63 }
0x2d1d   :  { %v3465_v23 = vadd.f32 %v3457_v15, %v7112_v2  ;;  %v3466_v9 = vadd.f32 %v3457_v15, %v7109_v1  ;;  %v3467_v24 = vadd.f32 %v3457_v15, %v7122_v13  ;;  %v3468_v40 = vadd.f32 %v3457_v15, %v7120_v56 }
0x2d1e   :  { %6544 = vtanh.f32 %v3462_v19 }
0x2d1f   :  { %6546 = vtanh.f32 %v3461_v20 }
0x2d20   :  { %6548 = vtanh.f32 %v3463_v7 }
0x2d21   :  { %6550 = vtanh.f32 %v3464_v21 }
0x2d22   :  { %6552 = vtanh.f32 %v3465_v23 }
0x2d23   :  { %6554 = vtanh.f32 %v3466_v9 }
0x2d24   :  { %6556 = vtanh.f32 %v3467_v24 }
0x2d25   :  { %6558 = vtanh.f32 %v3468_v40 }
0x2d28   :  { %v6545_v26 = vpop.eup %6544 }
0x2d29   :  { %v6547_v28 = vpop.eup %6546 }
0x2d2a   :  { %5747 = vmatprep.mubr.msk.f32.mxu1 %vm92_vm1, %v6547_v28  ;;  %v6549_v48 = vpop.eup %6548 }
0x2d2b   :  { %5748 = vmatmul.mubr.msk.f32.vlgmr.msra.gmra.mrb[0].mxu1 %vm92_vm1, %v6545_v26  ;;  %v6551_v29 = vpop.eup %6550 }
0x2d2c   :  { %5750 = vmatprep.mubr.msk.f32.mxu1 %vm92_vm1, %v6549_v48  ;;  %v6553_v16 = vpop.eup %6552  ;;  %6241 = vmatpush3.bf16.msra.mxu1 %v6240_v35 }
0x2d2d   :  { %v6555_v30 = vpop.eup %6554  ;;  %6242 = vmatprep.subr.bf16.mxu1 %v6663_v3 }
0x2d2e   :  { %v6557_v22 = vpop.eup %6556 }
0x2d2f   :  { %5751 = vmatmul.mubr.msk.f32.gmra.mrb[2].mxu1 %vm92_vm1, %v6551_v29  ;;  %v6559_v14 = vpop.eup %6558 }
0x2d30   :  { %5753 = vmatprep.mubr.msk.f32.mxu1 %vm92_vm1, %v6553_v16  ;;  %6244 = vmatpush3.bf16.msra.mxu1 %v6243_v37 }
0x2d31   :  { %6245 = vmatprep.subr.bf16.mxu1 %v6663_v3 }
0x2d33   :  { %5754 = vmatmul.mubr.msk.f32.gmra.mrb[4].mxu1 %vm92_vm1, %v6555_v30 }
0x2d34   :  { %5756 = vmatprep.mubr.msk.f32.mxu1 %vm92_vm1, %v6557_v22  ;;  %6247 = vmatpush3.bf16.msra.mxu1 %v6246_v57 }
0x2d35   :  { %6248 = vmatprep.subr.bf16.mxu1 %v6663_v3 }
0x2d37   :  { %5757 = vmatmul.mubr.msk.f32.gmra.mrb[6].mxu1 %vm92_vm1, %v6559_v14 }
0x2d38   :  { %5775 = vmatprep.mubr.msk.f32.mxu1 %vm6664_vm0, %v6665_v8  ;;  %6250 = vmatpush3.bf16.msra.mxu1 %v6249_v41 }
0x2d39   :  { %6251 = vmatprep.subr.bf16.mxu1 %v6663_v3 }
0x2dfe   :  { %v5749_v44 = vpop.f32.mrb[0].mxu1 }
0x2dff   :  { %v3567_v45 = vpop.f32.mrb[1].mxu1  ;;  %v3607_v11 = vsel %vm92_vm1, %v5749_v44, -inf }
0x2e00   :  { %v3606_v52 = vsel %vm92_vm1, %v3567_v45, -inf }
0x2e02   :  { %v5752_v60 = vpop.f32.mrb[2].mxu1 }
0x2e03   :  { %v3577_v10 = vpop.f32.mrb[3].mxu1  ;;  %v3609_v54 = vsel %vm92_vm1, %v5752_v60, -inf }
0x2e04   :  { %v3608_v15 = vsel %vm92_vm1, %v3577_v10, -inf }
0x2e06   :  { %v5755_v42 = vpop.f32.mrb[4].mxu1 }
0x2e07   :  { %v3612_v46 = vsel %vm92_vm1, %v5755_v42, -inf  ;;  %v3587_v51 = vpop.f32.mrb[5].mxu1 }
0x2e08   :  { %v3613_v12 = vmax.f32 %v3607_v11, %v3612_v46  ;;  %v3610_v47 = vsel %vm92_vm1, %v3587_v51, -inf }
0x2e09   :  { %v3611_v17 = vmax.f32 %v3606_v52, %v3610_v47 }
0x2e0a   :  { %v5758_v53 = vpop.f32.mrb[6].mxu1 }
0x2e0b   :  { %v3618_v55 = vmax.f32 %v3611_v17, %v3613_v12  ;;  %v3616_v5 = vsel %vm92_vm1, %v5758_v53, -inf  ;;  %v3597_v39 = vpop.f32.mrb[7].mxu1 }
0x2e0c   :  { %v3617_v18 = vmax.f32 %v3609_v54, %v3616_v5  ;;  %v3614_v19 = vsel %vm92_vm1, %v3597_v39, -inf }
0x2e0d   :  { %v3615_v20 = vmax.f32 %v3608_v15, %v3614_v19  ;;  %v3670_v15 = vld [vmem:[#allocation2 + $0x8] sm:$0xff] }
0x2e0f   :  { %v3619_v7 = vmax.f32 %v3615_v20, %v3617_v18  ;;  %v3671_v18 = vld [vmem:[#allocation2 + $0x10] sm:$0xff] }
0x2e11   :  { %v3620_v21 = vmax.f32 %v3618_v55, %v3619_v7 }
0x2e13   :  { %v3621_v23 = vsub.f32 %v3567_v45, %v3620_v21  ;;  %v3622_v9 = vsub.f32 %v5749_v44, %v3620_v21  ;;  %v3623_v24 = vsub.f32 %v3577_v10, %v3620_v21  ;;  %v3624_v26 = vsub.f32 %v5752_v60, %v3620_v21 }
0x2e14   :  { %v3625_v40 = vsub.f32 %v3587_v51, %v3620_v21  ;;  %v3626_v28 = vsub.f32 %v5755_v42, %v3620_v21  ;;  %v3627_v48 = vsub.f32 %v3597_v39, %v3620_v21  ;;  %v3628_v29 = vsub.f32 %v5758_v53, %v3620_v21  ;;  %v3669_v39 = vld [vmem:[#allocation2] sm:$0xff] }
0x2e15   :  { %v3629_v16 = vmul.f32 1.442695, %v3621_v23  ;;  %v3631_v30 = vmul.f32 1.442695, %v3622_v9  ;;  %v3633_v22 = vmul.f32 1.442695, %v3623_v24 }
0x2e16   :  { %v3635_v14 = vmul.f32 1.442695, %v3624_v26  ;;  %v3637_v6 = vmul.f32 1.442695, %v3625_v40  ;;  %v3639_v31 = vmul.f32 1.442695, %v3626_v28 }
0x2e17   :  { %6560 = vpow2.f32 %v3629_v16  ;;  %v3641_v34 = vmul.f32 1.442695, %v3627_v48  ;;  %v3643_v35 = vmul.f32 1.442695, %v3628_v29  ;;  %v3672_v40 = vld [vmem:[#allocation2 + $0x18] sm:$0xff]  ;;  %v3673_v16 = vld [vmem:[#allocation2 + $0x20] sm:$0xff] }
0x2e18   :  { %6562 = vpow2.f32 %v3631_v30 }
0x2e19   :  { %6564 = vpow2.f32 %v3633_v22 }
0x2e1a   :  { %6566 = vpow2.f32 %v3635_v14 }
0x2e1b   :  { %6568 = vpow2.f32 %v3637_v6  ;;  %v3674_v6 = vld [vmem:[#allocation2 + $0x28] sm:$0xff] }
0x2e1c   :  { %6570 = vpow2.f32 %v3639_v31 }
0x2e1d   :  { %6572 = vpow2.f32 %v3641_v34 }
0x2e1e   :  { %6574 = vpow2.f32 %v3643_v35 }
0x2e21   :  { %v6561_v36 = vpop.eup %6560 }
0x2e22   :  { %v6563_v37 = vpop.eup %6562  ;;  %v3645_v38 = vsel %vm92_vm1, %v6561_v36, 0.0 }
0x2e23   :  { %v6565_v49 = vpop.eup %6564  ;;  %v3646_v57 = vsel %vm92_vm1, %v6563_v37, 0.0 }
0x2e24   :  { %v6567_v58 = vpop.eup %6566  ;;  %v3647_v43 = vadd.f32 %v3646_v57, %v3645_v38  ;;  %v3648_v41 = vsel %vm92_vm1, %v6565_v49, 0.0  ;;  %v3676_v57 = vld [vmem:[#allocation2 + $0x38] sm:$0xff] }
0x2e25   :  { %v6569_v44 = vpop.eup %6568  ;;  %v3650_v60 = vsel %vm92_vm1, %v6567_v58, 0.0 }
0x2e26   :  { %v3649_v45 = vadd.f32 %v3648_v41, %v3647_v43  ;;  %v6571_v10 = vpop.eup %6570  ;;  %v3652_v11 = vsel %vm92_vm1, %v6569_v44, 0.0 }
0x2e27   :  { %v6573_v46 = vpop.eup %6572  ;;  %v3654_v52 = vsel %vm92_vm1, %v6571_v10, 0.0 }
0x2e28   :  { %v3651_v42 = vadd.f32 %v3650_v60, %v3649_v45  ;;  %v6575_v12 = vpop.eup %6574  ;;  %v3656_v17 = vsel %vm92_vm1, %v6573_v46, 0.0 }
0x2e29   :  { %v3658_v54 = vsel %vm92_vm1, %v6575_v12, 0.0 }
0x2e2a   :  { %v3653_v51 = vadd.f32 %v3652_v11, %v3651_v42 }
0x2e2c   :  { %v3655_v47 = vadd.f32 %v3654_v52, %v3653_v51  ;;  %v3793_v52 = vld [vmem:[%s8222_s12] sm:$0xff] }
0x2e2e   :  { %v3657_v53 = vadd.f32 %v3656_v17, %v3655_v47  ;;  %v3388_v47 = vld [vmem:[#allocation3] sm:$0xff] }
0x2e30   :  { %v3659_v55 = vadd.f32 %v3658_v54, %v3657_v53  ;;  %v3795_v54 = vld [vmem:[%s8222_s12 + $0x10] sm:$0xff] }
0x2e32   :  { %6576 = vrcp.f32 %v3659_v55  ;;  %v3796_v55 = vld [vmem:[%s8222_s12 + $0x18] sm:$0xff] }
0x2e3c   :  { %v6577_v5 = vpop.eup %6576 }
0x2e3d   :  { %v3661_v19 = vmul.f32 %v6577_v5, %v6561_v36  ;;  %v3662_v20 = vmul.f32 %v6577_v5, %v6563_v37  ;;  %v3663_v7 = vmul.f32 %v6577_v5, %v6565_v49  ;;  %v3664_v21 = vmul.f32 %v6577_v5, %v6567_v58  ;;  %v3675_v36 = vld [vmem:[#allocation2 + $0x30] sm:$0xff] }
0x2e3e   :  { %v3665_v23 = vmul.f32 %v6577_v5, %v6569_v44  ;;  %v3666_v9 = vmul.f32 %v6577_v5, %v6571_v10  ;;  %v3667_v24 = vmul.f32 %v6577_v5, %v6573_v46  ;;  %v3668_v26 = vmul.f32 %v6577_v5, %v6575_v12  ;;  %v3794_v12 = vld [vmem:[%s8222_s12 + $0x8] sm:$0xff] }
0x2e3f   :  { %v3677_v28 = vmul.f32 %v3669_v39, %v3661_v19  ;;  %v3678_v48 = vmul.f32 %v3670_v15, %v3662_v20  ;;  %v3679_v29 = vmul.f32 %v3671_v18, %v3663_v7  ;;  %v3680_v30 = vmul.f32 %v3672_v40, %v3664_v21  ;;  %v4852_v19 = vld [vmem:[%s8224_s14] ss:$0 sm:$0xff] }
0x2e40   :  { %v3681_v34 = vmul.f32 %v3673_v16, %v3665_v23  ;;  %v3682_v38 = vmul.f32 %v3674_v6, %v3666_v9  ;;  %v3683_v43 = vmul.f32 %v3675_v36, %v3667_v24  ;;  %v3684_v45 = vmul.f32 %v3676_v57, %v3668_v26  ;;  %v4850_v23 = vld [vmem:[%s8223_s13] ss:$0 sm:$0xff]  ;;  %v3912_v6 = vld [vmem:[%s8225_s15 + $0x10] sm:$0xff] }
0x2e41   :  { %v3685_v22 = vsel %vm92_vm1, %v3677_v28, 0.0  ;;  %v3686_v14 = vsel %vm92_vm1, %v3678_v48, 0.0  ;;  %v3688_v35 = vsel %vm92_vm1, %v3679_v29, 0.0  ;;  %v3690_v49 = vsel %vm92_vm1, %v3680_v30, 0.0  ;;  %v3914_v36 = vld [vmem:[%s8225_s15 + $0x20] sm:$0xff]  ;;  %v3916_v57 = vld [vmem:[%s8225_s15 + $0x30] sm:$0xff] }
0x2e42   :  { %v3687_v31 = vadd.f32 %v3686_v14, %v3685_v22  ;;  %v3692_v41 = vsel %vm92_vm1, %v3681_v34, 0.0  ;;  %v3694_v60 = vsel %vm92_vm1, %v3682_v38, 0.0  ;;  %v3696_v42 = vsel %vm92_vm1, %v3683_v43, 0.0  ;;  %v3910_v22 = vld [vmem:[%s8225_s15] sm:$0xff]  ;;  %v3911_v14 = vld [vmem:[%s8225_s15 + $0x8] sm:$0xff]  ;;  %v3913_v34 = vld [vmem:[%s8225_s15 + $0x18] sm:$0xff] }
0x2e43   :  { %v3698_v46 = vsel %vm92_vm1, %v3684_v45, 0.0  ;;  %v6252_v17 = vpack.c.bf16 %v3794_v12, %v3793_v52  ;;  %v6255_v39 = vpack.c.bf16 %v3796_v55, %v3795_v54 }
0x2e44   :  { %v3689_v37 = vadd.f32 %v3688_v35, %v3687_v31  ;;  %v6258_v31 = vpack.c.bf16 %v3911_v14, %v3910_v22  ;;  %v6261_v35 = vpack.c.bf16 %v3913_v34, %v3912_v6 }
0x2e46   :  { %v3691_v58 = vadd.f32 %v3690_v49, %v3689_v37  ;;  %6259 = vmatpush3.bf16.msra.mxu0 %v6258_v31  ;;  %v3915_v37 = vld [vmem:[%s8225_s15 + $0x28] sm:$0xff] }
0x2e47   :  { %6260 = vmatprep.subr.bf16.mxu0 %v6663_v3  ;;  %v6264_v38 = vpack.c.bf16 %v3915_v37, %v3914_v36 }
0x2e48   :  { %v3693_v44 = vadd.f32 %v3692_v41, %v3691_v58  ;;  %v3917_v58 = vld [vmem:[%s8225_s15 + $0x38] sm:$0xff]  ;;  %v3918_v41 = vld [vmem:[%s8225_s15 + $0x40] sm:$0xff] }
0x2e49   :  { %v6267_v43 = vpack.c.bf16 %v3917_v58, %v3916_v57 }
0x2e4a   :  { %v3695_v10 = vadd.f32 %v3694_v60, %v3693_v44  ;;  %6262 = vmatpush3.bf16.msra.mxu0 %v6261_v35  ;;  %v3919_v44 = vld [vmem:[%s8225_s15 + $0x48] sm:$0xff]  ;;  %v3920_v60 = vld [vmem:[%s8225_s15 + $0x50] sm:$0xff] }
0x2e4b   :  { %6263 = vmatprep.subr.bf16.mxu0 %v6663_v3  ;;  %v6270_v45 = vpack.c.bf16 %v3919_v44, %v3918_v41 }
0x2e4c   :  { %v3697_v11 = vadd.f32 %v3696_v42, %v3695_v10  ;;  %v3921_v10 = vld [vmem:[%s8225_s15 + $0x58] sm:$0xff] }
0x2e4d   :  { %v6273_v42 = vpack.c.bf16 %v3921_v10, %v3920_v60 }
0x2e4e   :  { %v3699_v51 = vadd.f32 %v3698_v46, %v3697_v11  ;;  %6265 = vmatpush3.bf16.msra.mxu0 %v6264_v38 }
0x2e4f   :  { %6266 = vmatprep.subr.bf16.mxu0 %v6663_v3 }
0x2e50   :  { %3701 = vrot.lane.b32.xlu0 %v3699_v51, %s6668_s5 }
0x2e52   :  { %6268 = vmatpush3.bf16.msra.mxu0 %v6267_v43 }
0x2e53   :  { %6269 = vmatprep.subr.bf16.mxu0 %v6663_v3 }
0x2e56   :  { %6271 = vmatpush3.bf16.msra.mxu0 %v6270_v45 }
0x2e57   :  { %6272 = vmatprep.subr.bf16.mxu0 %v6663_v3 }
0x2e5a   :  { %6274 = vmatpush3.bf16.msra.mxu0 %v6273_v42 }
0x2ec2   :  { %v7893_v53 = vpop.permute.xlu0 %3701 }
0x2ec3   :  { %v3704_v5 = vsel %vm92_vm1, %v3388_v47, %v7893_v53 }
0x2ec4   :  { %5776 = vmatmul.mubr.msk.f32.vlgmr.msra.gmra.mrb[8].mxu1 %vm1558_vm2, %v3704_v5 }
0x2ec5   :  { %6253 = vmatpush3.bf16.msra.mxu1 %v6252_v17  ;;  %5786 = vmatprep.mubr.msk.f32.mxu1 %vm6664_vm0, %v6665_v8 }
0x2ec6   :  { %6254 = vmatprep.subr.bf16.mxu1 %v6663_v3 }
0x2ec9   :  { %6256 = vmatpush3.bf16.msra.mxu1 %v6255_v39 }
0x2ecc   :  { %5787 = vmatmul.mubr.msk.f32.vlgmr.msra.gmra.mrb[10].mxu1 %vm92_vm1, %v7736_v27 }
0x2f97   :  { %v3789_v15 = vpop.f32.mrb[8].mxu1 }
0x2f98   :  { %v5777_v18 = vpop.f32.mrb[9].mxu1  ;;  %v3790_v9 = vadd.f32 %v4850_v23, %v3789_v15 }
0x2f99   :  { %v4859_v18 = vld [vmem:[%s8239_s20 + $0x20] sm:$0xff] (!%p4858_p11) }
0x2f9a   :  { %4011 = vst.msk [vmem:[#allocation3] sm:$0xff] (!%p4858_p11), %vm92_vm1, %v4859_v18 }
0x2f9f   :  { %v3870_v20 = vpop.f32.mrb[10].mxu1 }
0x2fa0   :  { %v3871_v7 = vadd.f32 %v4852_v19, %v3870_v20  ;;  %v5788_v21 = vpop.f32.mrb[11].mxu1 }
0x2fa2   :  { %3882 = vrot.lane.b32.xlu0 %v3871_v7, %s6666_s24  ;;  %v3874_v24 = vadd.f32 %v3871_v7, %v3790_v9 }
0x2fa4   :  { %v4854_v26 = vmul.f32 -1.442695, %v3874_v24 }
0x2fa6   :  { %6578 = vpow2.f32 %v4854_v26 }
0x2fb0   :  { %v6579_v27 = vpop.eup %6578 }
0x2fb1   :  { %v3878_v40 = vadd.f32 1.0, %v6579_v27 }
0x2fb3   :  { %6580 = vrcp.f32 %v3878_v40 }
0x2fbd   :  { %v6581_v28 = vpop.eup %6580 }
0x2fbe   :  { %v3892_v11 = vsub.f32 1.0, %v6581_v28  ;;  %v3898_v52 = vmul.f32 %v6581_v28, %v7732_v25  ;;  %v4855_v25 = vld [vmem:[%s8226_s16] ss:$0 sm:$0xff] }
0x3014   :  { %v3883_v48 = vpop.permute.xlu0 %3882 }
0x3015   :  { %v3885_v29 = vmul.f32 %v6581_v28, %v3883_v48 }
0x3017   :  { %3887 = vrot.lane.b32.xlu1 %v3885_v29, %s6666_s24 }
0x3089   :  { %v3888_v16 = vpop.permute.xlu1 %3887 }
0x308a   :  { %v3890_v30 = vadd.f32 %v3888_v16, %v3790_v9 }
0x308c   :  { %6582 = vtanh.f32 %v3890_v30 }
0x3096   :  { %v6583_v49 = vpop.eup %6582 }
0x3097   :  { %3894 = vrot.lane.b32.xlu1 %v6583_v49, %s6667_s6 }
0x309b   :  { %3905 = vrot.lane.b32.xlu1 %v3388_v47, %s6666_s24 }
0x3109   :  { %v3895_v46 = vpop.permute.xlu1 %3894 }
0x310a   :  { %v3897_v51 = vmul.f32 %v3895_v46, %v3892_v11 }
0x310c   :  { %v7961_v12 = vadd.f32 %v3898_v52, %v3897_v51 }
0x310d   :  { %v3906_v47 = vpop.permute.xlu1 %3905 }
0x310e   :  { %3901 = vrot.lane.b32.xlu0 %v7961_v12, %s6667_s6 }
0x3180   :  { %v7965_v17 = vpop.permute.xlu0 %3901 }
0x3181   :  { %v3908_v54 = vsel %vm92_vm1, %v7965_v17, %v7893_v53 }
0x3182   :  { %v3909_v55 = vsel %vm1558_vm2, %v3908_v54, %v3906_v47 }
0x3183   :  { %5814 = vmatmul.mubr.msk.f32.vlgmr.msra.gmra.mrb[2].mxu0 %vm1768_vm3, %v3909_v55 }
0x3253   :  { %4008 = sbr.rel (%p4858_p11) target bundleno = 12890 (0x325a), region = 105 }
0x3256   :  { %v3998_v5 = vpop.f32.mrb[2].mxu0 }
0x3257   :  { %v3999_v39 = vadd.f32 %v4855_v25, %v3998_v5  ;;  %v5815_v15 = vpop.f32.mrb[3].mxu0 }
0x3259   :  { %4003 = vst [vmem:[#allocation7 + $0x20] sm:$0xff] %v3999_v39 }
0x325a PF:  { %p4860_p12 = scmp.ne.s32.totalorder %s4857_s30, 0 }
0x325b   :  { %4016 = vmax.index.xlane.f32.xlu0 (!%p4860_p12), %v3999_v39  ;;  %v4021_v53 = vld [vmem:[%s8227_s17] sm:$0xff] (!%p4860_p12)  ;;  %v4022_v19 = vld [vmem:[%s8227_s17 + $0x8] sm:$0xff] (!%p4860_p12)  ;;  %v4023_v20 = vld [vmem:[%s8227_s17 + $0x10] sm:$0xff] (!%p4860_p12)  ;;  %v6681_v7 = vmov (!%p4860_p12), 0.0|0.0   ;;  %vm6682_vm10 = vmmov (!%p4860_p12), 0   ;;  %v6683_v30 = vmov (!%p4860_p12), 0.0  }
0x325c   :  { %4015 = sbr.rel (%p4860_p12) target bundleno = 13247 (0x33bf), region = 109  ;;  %6275 = vmatprep.subr.bf16.mxu0 (!%p4860_p12), %v6681_v7  ;;  %v6276_v21 = vpack.c.bf16 (!%p4860_p12), %v4022_v19, %v4021_v53  ;;  %v4024_v23 = vld [vmem:[%s8227_s17 + $0x18] sm:$0xff] (!%p4860_p12)  ;;  %v4025_v24 = vld [vmem:[%s8227_s17 + $0x20] sm:$0xff] (!%p4860_p12)  ;;  %v4026_v26 = vld [vmem:[%s8227_s17 + $0x28] sm:$0xff] (!%p4860_p12)  ;;  %5848 = vmatprep.mubr.msk.f32.mxu0 (!%p4860_p12), %vm6682_vm10, %v6683_v30  ;;  %v6684_v58 = vmov (!%p4860_p12), 1.0  }
0x325d   :  { %v6279_v9 = vpack.c.bf16 (!%p4860_p12), %v4024_v23, %v4023_v20  ;;  %v6282_v27 = vpack.c.bf16 (!%p4860_p12), %v4026_v26, %v4025_v24  ;;  %v4027_v40 = vld [vmem:[%s8227_s17 + $0x30] sm:$0xff] (!%p4860_p12)  ;;  %v4028_v28 = vld [vmem:[%s8227_s17 + $0x38] sm:$0xff] (!%p4860_p12)  ;;  %v4029_v29 = vld [vmem:[%s8227_s17 + $0x40] sm:$0xff] (!%p4860_p12) }
0x325e   :  { %6277 = vmatpush3.bf16.msra.mxu0 (!%p4860_p12), %v6276_v21  ;;  %v6285_v48 = vpack.c.bf16 (!%p4860_p12), %v4028_v28, %v4027_v40  ;;  %v4030_v16 = vld [vmem:[%s8227_s17 + $0x48] sm:$0xff] (!%p4860_p12)  ;;  %v4031_v14 = vld [vmem:[%s8227_s17 + $0x50] sm:$0xff] (!%p4860_p12)  ;;  %v4032_v6 = vld [vmem:[%s8227_s17 + $0x58] sm:$0xff] (!%p4860_p12) }
0x325f   :  { %6278 = vmatprep.subr.bf16.mxu0 (!%p4860_p12), %v6681_v7  ;;  %v6288_v22 = vpack.c.bf16 (!%p4860_p12), %v4030_v16, %v4029_v29  ;;  %v6291_v31 = vpack.c.bf16 (!%p4860_p12), %v4032_v6, %v4031_v14  ;;  %v4033_v34 = vld [vmem:[%s8227_s17 + $0x60] sm:$0xff] (!%p4860_p12)  ;;  %v4034_v35 = vld [vmem:[%s8227_s17 + $0x68] sm:$0xff] (!%p4860_p12)  ;;  %v4035_v37 = vld [vmem:[%s8227_s17 + $0x70] sm:$0xff] (!%p4860_p12) }
0x3260   :  { %v6294_v36 = vpack.c.bf16 (!%p4860_p12), %v4034_v35, %v4033_v34  ;;  %v4036_v38 = vld [vmem:[%s8227_s17 + $0x78] sm:$0xff] (!%p4860_p12) }
0x3261   :  { %v6297_v49 = vpack.c.bf16 (!%p4860_p12), %v4036_v38, %v4035_v37 }
0x3262   :  { %6280 = vmatpush3.bf16.msra.mxu0 (!%p4860_p12), %v6279_v9 }
0x3263   :  { %6281 = vmatprep.subr.bf16.mxu0 %v6681_v7 }
0x3266   :  { %6283 = vmatpush3.bf16.msra.mxu0 %v6282_v27 }
0x3267   :  { %6284 = vmatprep.subr.bf16.mxu0 %v6681_v7 }
0x326a   :  { %6286 = vmatpush3.bf16.msra.mxu0 %v6285_v48 }
0x326b   :  { %6287 = vmatprep.subr.bf16.mxu0 %v6681_v7 }
0x326e   :  { %6289 = vmatpush3.bf16.msra.mxu0 %v6288_v22 }
0x326f   :  { %6290 = vmatprep.subr.bf16.mxu0 %v6681_v7 }
0x3272   :  { %6292 = vmatpush3.bf16.msra.mxu0 %v6291_v31 }
0x3273   :  { %6293 = vmatprep.subr.bf16.mxu0 %v6681_v7 }
0x3276   :  { %6295 = vmatpush3.bf16.msra.mxu0 %v6294_v36 }
0x3277   :  { %6296 = vmatprep.subr.bf16.mxu0 %v6681_v7 }
0x327a   :  { %6298 = vmatpush3.bf16.msra.mxu0 %v6297_v49 }
0x32e8   :  { %v4017_v57 = vpop.xlane.xlu0 %4016 }
0x32e9   :  { %vm4018_vm11 = vcmp.eq.s32.totalorder %v7048_v32, %v4017_v57 }
0x32ea   :  { %5849 = vmatmul.mubr.msk.f32.vlgmr.msra.gmra.mrb[0].mxu0 %vm4018_vm11, %v6684_v58 }
0x33bd   :  { %v4103_v43 = vpop.f32.mrb[0].mxu0 }
0x33be   :  { %4107 = vst.msk [vmem:[#allocation3] sm:$0xff] %vm92_vm1, %v4103_v43  ;;  %v5850_v41 = vpop.f32.mrb[1].mxu0 }
0x33bf PF:  { %6299 = vmatprep.subr.bf16.mxu0 %v6663_v3  ;;  %5859 = vmatprep.mubr.msk.f32.mxu0 %vm6664_vm0, %v6665_v8  ;;  %v4425_v11 = vld [vmem:[%s8221_s11] sm:$0xff]  ;;  %v4426_v46 = vld [vmem:[%s8221_s11 + $0x8] sm:$0xff]  ;;  %v4427_v51 = vld [vmem:[%s8221_s11 + $0x10] sm:$0xff]  ;;  %s6685_s29 = smov [#allocation7]  }
0x33c0   :  { %6301 = vmatpush3.bf16.msra.mxu0 %v7043_v4  ;;  %6306 = vmatprep.subr.bf16.mxu1 %v7078_v50  ;;  %v6314_v52 = vpack.c.bf16 %v4426_v46, %v4425_v11  ;;  %v4428_v47 = vld [vmem:[%s8221_s11 + $0x18] sm:$0xff]  ;;  %v4429_v55 = vld [vmem:[%s8221_s11 + $0x20] sm:$0xff]  ;;  %v4430_v25 = vld [vmem:[%s8221_s11 + $0x28] sm:$0xff]  ;;  %s4729_s30 = sshll.u32 %s6685_s29, 4  ;;  %s4730_s30 = int_to_ptr.vmem [resolvable:$true] %s4729_s30 }
0x33c1   :  { %6302 = vmatprep.subr.bf16.mxu0 %v6663_v3  ;;  %6308 = vmatpush3.bf16.msra.mxu1 %v7078_v50  ;;  %v6317_v54 = vpack.c.bf16 %v4428_v47, %v4427_v51  ;;  %v6320_v5 = vpack.c.bf16 %v4430_v25, %v4429_v55  ;;  %v4431_v39 = vld [vmem:[%s8221_s11 + $0x30] sm:$0xff]  ;;  %v4432_v15 = vld [vmem:[%s8221_s11 + $0x38] sm:$0xff]  ;;  %p6641_p0 = scmp.lt.s32.totalorder %s4730_s30, %s4730_s30 }
0x33c2   :  { %6310 = vmatprep.subr.bf16.mxu1 %v7088_v59  ;;  %v6323_v18 = vpack.c.bf16 %v4432_v15, %v4431_v39 }
0x33c4   :  { %6304 = vmatpush3.bf16.msra.mxu0 %v7051_v33 }
0x33c5   :  { %6312 = vmatpush3.bf16.msra.mxu1 %v7088_v59  ;;  %6331 = vmatprep.subr.bf16.mxu0 %v6663_v3 }
0x33c6   :  { %6313 = vmatprep.subr.bf16.mxu1 %v6663_v3 }
0x33c7   :  { %5860 = vmatmul.mubr.msk.f32.vlgmr.msra.gmra.mrb[0].mxu0 %vm92_vm1, %v7965_v17 }
0x33c8   :  { %5936 = vmatprep.mubr.msk.f32.mxu0 %vm6664_vm0, %v6665_v8 }
0x349a   :  { %v4177_v4 = vpop.f32.mrb[0].mxu0 }
0x349b   :  { %v5861_v32 = vpop.f32.mrb[1].mxu0  ;;  %v4182_v50 = vadd.f32 %v4177_v4, %v7097_v61  ;;  %v4181_v44 = vadd.f32 %v4177_v4, %v7100_v62  ;;  %v4183_v33 = vadd.f32 %v4177_v4, %v7106_v0  ;;  %v4184_v59 = vadd.f32 %v4177_v4, %v7103_v63 }
0x349c   :  { %v4185_v45 = vadd.f32 %v4177_v4, %v7112_v2  ;;  %v4186_v60 = vadd.f32 %v4177_v4, %v7109_v1  ;;  %v4187_v10 = vadd.f32 %v4177_v4, %v7122_v13  ;;  %v4188_v61 = vadd.f32 %v4177_v4, %v7120_v56 }
0x349d   :  { %6584 = vtanh.f32 %v4182_v50 }
0x349e   :  { %6586 = vtanh.f32 %v4181_v44 }
0x349f   :  { %6588 = vtanh.f32 %v4183_v33 }
0x34a0   :  { %6590 = vtanh.f32 %v4184_v59 }
0x34a1   :  { %6592 = vtanh.f32 %v4185_v45 }
0x34a2   :  { %6594 = vtanh.f32 %v4186_v60 }
0x34a3   :  { %6596 = vtanh.f32 %v4187_v10 }
0x34a4   :  { %6598 = vtanh.f32 %v4188_v61 }
0x34a7   :  { %v6585_v42 = vpop.eup %6584 }
0x34a8   :  { %v6587_v62 = vpop.eup %6586 }
0x34a9   :  { %5870 = vmatprep.mubr.msk.f32.mxu1 %vm92_vm1, %v6587_v62  ;;  %v6589_v0 = vpop.eup %6588 }
0x34aa   :  { %5871 = vmatmul.mubr.msk.f32.vlgmr.msra.gmra.mrb[0].mxu1 %vm92_vm1, %v6585_v42  ;;  %v6591_v63 = vpop.eup %6590 }
0x34ab   :  { %5873 = vmatprep.mubr.msk.f32.mxu1 %vm92_vm1, %v6589_v0  ;;  %v6593_v1 = vpop.eup %6592  ;;  %6315 = vmatpush3.bf16.msra.mxu1 %v6314_v52 }
0x34ac   :  { %v6595_v2 = vpop.eup %6594  ;;  %6316 = vmatprep.subr.bf16.mxu1 %v6663_v3 }
0x34ad   :  { %v6597_v13 = vpop.eup %6596 }
0x34ae   :  { %5874 = vmatmul.mubr.msk.f32.gmra.mrb[2].mxu1 %vm92_vm1, %v6591_v63  ;;  %v6599_v56 = vpop.eup %6598 }
0x34af   :  { %5876 = vmatprep.mubr.msk.f32.mxu1 %vm92_vm1, %v6593_v1  ;;  %6318 = vmatpush3.bf16.msra.mxu1 %v6317_v54 }
0x34b0   :  { %6319 = vmatprep.subr.bf16.mxu1 %v6663_v3 }
0x34b2   :  { %5877 = vmatmul.mubr.msk.f32.gmra.mrb[4].mxu1 %vm92_vm1, %v6595_v2 }
0x34b3   :  { %5879 = vmatprep.mubr.msk.f32.mxu1 %vm92_vm1, %v6597_v13  ;;  %6321 = vmatpush3.bf16.msra.mxu1 %v6320_v5 }
0x34b4   :  { %6322 = vmatprep.subr.bf16.mxu1 %v6663_v3 }
0x34b6   :  { %5880 = vmatmul.mubr.msk.f32.gmra.mrb[6].mxu1 %vm92_vm1, %v6599_v56 }
0x34b7   :  { %5898 = vmatprep.mubr.msk.f32.mxu1 %vm6664_vm0, %v6665_v8  ;;  %6324 = vmatpush3.bf16.msra.mxu1 %v6323_v18 }
0x34b8   :  { %6325 = vmatprep.subr.bf16.mxu1 %v6663_v3 }
0x357d   :  { %v5872_v53 = vpop.f32.mrb[0].mxu1 }
0x357e   :  { %v4287_v19 = vpop.f32.mrb[1].mxu1  ;;  %v4327_v23 = vsel %vm92_vm1, %v5872_v53, -inf }
0x357f   :  { %v4326_v26 = vsel %vm92_vm1, %v4287_v19, -inf }
0x3581   :  { %v5875_v20 = vpop.f32.mrb[2].mxu1 }
0x3582   :  { %v4297_v7 = vpop.f32.mrb[3].mxu1  ;;  %v4329_v29 = vsel %vm92_vm1, %v5875_v20, -inf }
0x3583   :  { %v4328_v14 = vsel %vm92_vm1, %v4297_v7, -inf }
0x3585   :  { %v5878_v21 = vpop.f32.mrb[4].mxu1 }
0x3586   :  { %v4332_v9 = vsel %vm92_vm1, %v5878_v21, -inf  ;;  %v4307_v24 = vpop.f32.mrb[5].mxu1 }
0x3587   :  { %v4333_v27 = vmax.f32 %v4327_v23, %v4332_v9  ;;  %v4330_v40 = vsel %vm92_vm1, %v4307_v24, -inf  ;;  %v4391_v23 = vld [vmem:[#allocation2 + $0x10] sm:$0xff] }
0x3588   :  { %v4331_v28 = vmax.f32 %v4326_v26, %v4330_v40 }
0x3589   :  { %v5881_v48 = vpop.f32.mrb[6].mxu1 }
0x358a   :  { %v4338_v16 = vmax.f32 %v4331_v28, %v4333_v27  ;;  %v4336_v30 = vsel %vm92_vm1, %v5881_v48, -inf  ;;  %v4317_v22 = vpop.f32.mrb[7].mxu1 }
0x358b   :  { %v4337_v6 = vmax.f32 %v4329_v29, %v4336_v30  ;;  %v4334_v31 = vsel %vm92_vm1, %v4317_v22, -inf }
0x358c   :  { %v4335_v34 = vmax.f32 %v4328_v14, %v4334_v31 }
0x358e   :  { %v4339_v35 = vmax.f32 %v4335_v34, %v4337_v6  ;;  %v4393_v6 = vld [vmem:[#allocation2 + $0x20] sm:$0xff] }
0x3590   :  { %v4340_v36 = vmax.f32 %v4338_v16, %v4339_v35  ;;  %v4392_v16 = vld [vmem:[#allocation2 + $0x18] sm:$0xff] }
0x3592   :  { %v4341_v37 = vsub.f32 %v4287_v19, %v4340_v36  ;;  %v4342_v38 = vsub.f32 %v5872_v53, %v4340_v36  ;;  %v4343_v49 = vsub.f32 %v4297_v7, %v4340_v36  ;;  %v4344_v57 = vsub.f32 %v5875_v20, %v4340_v36  ;;  %v4389_v7 = vld [vmem:[#allocation2] sm:$0xff] }
0x3593   :  { %v4345_v58 = vsub.f32 %v4307_v24, %v4340_v36  ;;  %v4346_v43 = vsub.f32 %v5878_v21, %v4340_v36  ;;  %v4347_v41 = vsub.f32 %v4317_v22, %v4340_v36  ;;  %v4348_v4 = vsub.f32 %v5881_v48, %v4340_v36  ;;  %v4390_v21 = vld [vmem:[#allocation2 + $0x8] sm:$0xff] }
0x3594   :  { %v4349_v32 = vmul.f32 1.442695, %v4341_v37  ;;  %v4351_v50 = vmul.f32 1.442695, %v4342_v38  ;;  %v4353_v44 = vmul.f32 1.442695, %v4343_v49 }
0x3595   :  { %v4355_v33 = vmul.f32 1.442695, %v4344_v57  ;;  %v4357_v59 = vmul.f32 1.442695, %v4345_v58  ;;  %v4359_v45 = vmul.f32 1.442695, %v4346_v43 }
0x3596   :  { %6600 = vpow2.f32 %v4349_v32  ;;  %v4361_v60 = vmul.f32 1.442695, %v4347_v41  ;;  %v4363_v10 = vmul.f32 1.442695, %v4348_v4  ;;  %v4394_v36 = vld [vmem:[#allocation2 + $0x28] sm:$0xff]  ;;  %v4395_v57 = vld [vmem:[#allocation2 + $0x30] sm:$0xff] }
0x3597   :  { %6602 = vpow2.f32 %v4351_v50  ;;  %v4396_v4 = vld [vmem:[#allocation2 + $0x38] sm:$0xff] }
0x3598   :  { %6604 = vpow2.f32 %v4353_v44 }
0x3599   :  { %6606 = vpow2.f32 %v4355_v33 }
0x359a   :  { %6608 = vpow2.f32 %v4357_v59 }
0x359b   :  { %6610 = vpow2.f32 %v4359_v45 }
0x359c   :  { %6612 = vpow2.f32 %v4361_v60 }
0x359d   :  { %6614 = vpow2.f32 %v4363_v10 }
0x35a0   :  { %v6601_v42 = vpop.eup %6600 }
0x35a1   :  { %v6603_v61 = vpop.eup %6602  ;;  %v4365_v62 = vsel %vm92_vm1, %v6601_v42, 0.0 }
0x35a2   :  { %v6605_v0 = vpop.eup %6604  ;;  %v4366_v63 = vsel %vm92_vm1, %v6603_v61, 0.0 }
0x35a3   :  { %v6607_v1 = vpop.eup %6606  ;;  %v4367_v2 = vadd.f32 %v4366_v63, %v4365_v62  ;;  %v4368_v13 = vsel %vm92_vm1, %v6605_v0, 0.0  ;;  %v4514_v63 = vld [vmem:[%s8222_s12 + $0x8] sm:$0xff] }
0x35a4   :  { %v6609_v56 = vpop.eup %6608  ;;  %v4370_v46 = vsel %vm92_vm1, %v6607_v1, 0.0 }
0x35a5   :  { %v4369_v11 = vadd.f32 %v4368_v13, %v4367_v2  ;;  %v6611_v51 = vpop.eup %6610  ;;  %v4372_v47 = vsel %vm92_vm1, %v6609_v56, 0.0 }
0x35a6   :  { %v6613_v54 = vpop.eup %6612  ;;  %v4374_v25 = vsel %vm92_vm1, %v6611_v51, 0.0 }
0x35a7   :  { %v4371_v52 = vadd.f32 %v4370_v46, %v4369_v11  ;;  %v6615_v5 = vpop.eup %6614  ;;  %v4376_v15 = vsel %vm92_vm1, %v6613_v54, 0.0  ;;  %v4516_v11 = vld [vmem:[%s8222_s12 + $0x18] sm:$0xff] }
0x35a8   :  { %v4378_v53 = vsel %vm92_vm1, %v6615_v5, 0.0 }
0x35a9   :  { %v4373_v55 = vadd.f32 %v4372_v47, %v4371_v52 }
0x35ab   :  { %v4375_v39 = vadd.f32 %v4374_v25, %v4373_v55 }
0x35ad   :  { %v4377_v18 = vadd.f32 %v4376_v15, %v4375_v39 }
0x35af   :  { %v4379_v19 = vadd.f32 %v4378_v53, %v4377_v18 }
0x35b1   :  { %6616 = vrcp.f32 %v4379_v19 }
0x35bb   :  { %v6617_v20 = vpop.eup %6616 }
0x35bc   :  { %v4381_v9 = vmul.f32 %v6617_v20, %v6601_v42  ;;  %v4382_v24 = vmul.f32 %v6617_v20, %v6603_v61  ;;  %v4383_v26 = vmul.f32 %v6617_v20, %v6605_v0  ;;  %v4384_v27 = vmul.f32 %v6617_v20, %v6607_v1  ;;  %v4513_v0 = vld [vmem:[%s8222_s12] sm:$0xff] }
0x35bd   :  { %v4385_v40 = vmul.f32 %v6617_v20, %v6609_v56  ;;  %v4386_v28 = vmul.f32 %v6617_v20, %v6611_v51  ;;  %v4387_v48 = vmul.f32 %v6617_v20, %v6613_v54  ;;  %v4388_v29 = vmul.f32 %v6617_v20, %v6615_v5  ;;  %v4108_v1 = vld [vmem:[#allocation3] sm:$0xff]  ;;  %v4515_v56 = vld [vmem:[%s8222_s12 + $0x10] sm:$0xff] }
0x35be   :  { %v4397_v30 = vmul.f32 %v4389_v7, %v4381_v9  ;;  %v4398_v22 = vmul.f32 %v4390_v21, %v4382_v24  ;;  %v4399_v14 = vmul.f32 %v4391_v23, %v4383_v26  ;;  %v4400_v31 = vmul.f32 %v4392_v16, %v4384_v27  ;;  %v4874_v54 = vld [vmem:[%s8224_s14] ss:$0 sm:$0xff]  ;;  %v4631_v24 = vld [vmem:[%s8225_s15 + $0x8] sm:$0xff]  ;;  %v4632_v26 = vld [vmem:[%s8225_s15 + $0x10] sm:$0xff] }
0x35bf   :  { %v4401_v38 = vmul.f32 %v4393_v6, %v4385_v40  ;;  %v4402_v43 = vmul.f32 %v4394_v36, %v4386_v28  ;;  %v4403_v50 = vmul.f32 %v4395_v57, %v4387_v48  ;;  %v4404_v59 = vmul.f32 %v4396_v4, %v4388_v29  ;;  %v4630_v9 = vld [vmem:[%s8225_s15] sm:$0xff]  ;;  %v4633_v40 = vld [vmem:[%s8225_s15 + $0x18] sm:$0xff]  ;;  %v4635_v29 = vld [vmem:[%s8225_s15 + $0x28] sm:$0xff] }
0x35c0   :  { %v4405_v34 = vsel %vm92_vm1, %v4397_v30, 0.0  ;;  %v4406_v35 = vsel %vm92_vm1, %v4398_v22, 0.0  ;;  %v4408_v49 = vsel %vm92_vm1, %v4399_v14, 0.0  ;;  %v4410_v41 = vsel %vm92_vm1, %v4400_v31, 0.0  ;;  %v4634_v48 = vld [vmem:[%s8225_s15 + $0x20] sm:$0xff]  ;;  %v4636_v22 = vld [vmem:[%s8225_s15 + $0x30] sm:$0xff] }
0x35c1   :  { %v4407_v37 = vadd.f32 %v4406_v35, %v4405_v34  ;;  %v4412_v44 = vsel %vm92_vm1, %v4401_v38, 0.0  ;;  %v4414_v45 = vsel %vm92_vm1, %v4402_v43, 0.0  ;;  %v4416_v10 = vsel %vm92_vm1, %v4403_v50, 0.0  ;;  %v4637_v14 = vld [vmem:[%s8225_s15 + $0x38] sm:$0xff]  ;;  %v4638_v31 = vld [vmem:[%s8225_s15 + $0x40] sm:$0xff]  ;;  %v4639_v34 = vld [vmem:[%s8225_s15 + $0x48] sm:$0xff] }
0x35c2   :  { %v4418_v61 = vsel %vm92_vm1, %v4404_v59, 0.0  ;;  %v6326_v2 = vpack.c.bf16 %v4514_v63, %v4513_v0  ;;  %v6329_v51 = vpack.c.bf16 %v4516_v11, %v4515_v56  ;;  %v6332_v27 = vpack.c.bf16 %v4631_v24, %v4630_v9  ;;  %v4640_v36 = vld [vmem:[%s8225_s15 + $0x50] sm:$0xff] }
0x35c3   :  { %v4409_v58 = vadd.f32 %v4408_v49, %v4407_v37  ;;  %v6335_v28 = vpack.c.bf16 %v4633_v40, %v4632_v26  ;;  %v6338_v16 = vpack.c.bf16 %v4635_v29, %v4634_v48  ;;  %v6341_v6 = vpack.c.bf16 %v4637_v14, %v4636_v22  ;;  %v4641_v37 = vld [vmem:[%s8225_s15 + $0x58] sm:$0xff] }
0x35c4   :  { %6333 = vmatpush3.bf16.msra.mxu0 %v6332_v27  ;;  %v6344_v35 = vpack.c.bf16 %v4639_v34, %v4638_v31  ;;  %v6347_v38 = vpack.c.bf16 %v4641_v37, %v4640_v36 }
0x35c5   :  { %v4411_v32 = vadd.f32 %v4410_v41, %v4409_v58  ;;  %6334 = vmatprep.subr.bf16.mxu0 %v6663_v3 }
0x35c7   :  { %v4413_v33 = vadd.f32 %v4412_v44, %v4411_v32 }
0x35c8   :  { %6336 = vmatpush3.bf16.msra.mxu0 %v6335_v28 }
0x35c9   :  { %v4415_v60 = vadd.f32 %v4414_v45, %v4413_v33  ;;  %6337 = vmatprep.subr.bf16.mxu0 %v6663_v3 }
0x35cb   :  { %v4417_v42 = vadd.f32 %v4416_v10, %v4415_v60 }
0x35cc   :  { %6339 = vmatpush3.bf16.msra.mxu0 %v6338_v16 }
0x35cd   :  { %v4419_v62 = vadd.f32 %v4418_v61, %v4417_v42  ;;  %6340 = vmatprep.subr.bf16.mxu0 %v6663_v3 }
0x35cf   :  { %4421 = vrot.lane.b32.xlu0 %v4419_v62, %s6668_s5 }
0x35d0   :  { %6342 = vmatpush3.bf16.msra.mxu0 %v6341_v6 }
0x35d1   :  { %6343 = vmatprep.subr.bf16.mxu0 %v6663_v3 }
0x35d4   :  { %6345 = vmatpush3.bf16.msra.mxu0 %v6344_v35 }
0x35d5   :  { %6346 = vmatprep.subr.bf16.mxu0 %v6663_v3 }
0x35d8   :  { %6348 = vmatpush3.bf16.msra.mxu0 %v6347_v38 }
0x3641   :  { %v8122_v13 = vpop.permute.xlu0 %4421 }
0x3642   :  { %v4424_v46 = vsel %vm92_vm1, %v4108_v1, %v8122_v13 }
0x3643   :  { %5899 = vmatmul.mubr.msk.f32.vlgmr.msra.gmra.mrb[8].mxu1 %vm1558_vm2, %v4424_v46 }
0x3644   :  { %6327 = vmatpush3.bf16.msra.mxu1 %v6326_v2  ;;  %5909 = vmatprep.mubr.msk.f32.mxu1 %vm6664_vm0, %v6665_v8  ;;  %v4872_v8 = vld [vmem:[%s8223_s13] ss:$0 sm:$0xff] }
0x3645   :  { %6328 = vmatprep.subr.bf16.mxu1 %v6663_v3  ;;  %v4877_v3 = vld [vmem:[%s8226_s16] ss:$0 sm:$0xff] }
0x3648   :  { %6330 = vmatpush3.bf16.msra.mxu1 %v6329_v51 }
0x364b   :  { %5910 = vmatmul.mubr.msk.f32.vlgmr.msra.gmra.mrb[10].mxu1 %vm92_vm1, %v7965_v17 }
0x3716   :  { %v4509_v52 = vpop.f32.mrb[8].mxu1 }
0x3717   :  { %v5900_v47 = vpop.f32.mrb[9].mxu1  ;;  %v4510_v39 = vadd.f32 %v4872_v8, %v4509_v52 }
0x371e   :  { %v4590_v55 = vpop.f32.mrb[10].mxu1 }
0x371f   :  { %v4591_v25 = vadd.f32 %v4874_v54, %v4590_v55  ;;  %v5911_v5 = vpop.f32.mrb[11].mxu1 }
0x3721   :  { %4602 = vrot.lane.b32.xlu0 %v4591_v25, %s6666_s24  ;;  %v4594_v15 = vadd.f32 %v4591_v25, %v4510_v39 }
0x3723   :  { %v4876_v18 = vmul.f32 -1.442695, %v4594_v15 }
0x3725   :  { %6618 = vpow2.f32 %v4876_v18 }
0x372f   :  { %v6619_v17 = vpop.eup %6618 }
0x3730   :  { %v4598_v53 = vadd.f32 1.0, %v6619_v17 }
0x3732   :  { %6620 = vrcp.f32 %v4598_v53 }
0x373c   :  { %v6621_v19 = vpop.eup %6620 }
0x373d   :  { %v4612_v49 = vsub.f32 1.0, %v6621_v19  ;;  %v4618_v43 = vmul.f32 %v6621_v19, %v7961_v12 }
0x3793   :  { %v4603_v20 = vpop.permute.xlu0 %4602 }
0x3794   :  { %v4605_v7 = vmul.f32 %v6621_v19, %v4603_v20 }
0x3796   :  { %4607 = vrot.lane.b32.xlu1 %v4605_v7, %s6666_s24 }
0x3808   :  { %v4608_v21 = vpop.permute.xlu1 %4607 }
0x3809   :  { %v4610_v23 = vadd.f32 %v4608_v21, %v4510_v39 }
0x380b   :  { %6622 = vtanh.f32 %v4610_v23 }
0x3815   :  { %v6623_v30 = vpop.eup %6622 }
0x3816   :  { %4614 = vrot.lane.b32.xlu1 %v6623_v30, %s6667_s6 }
0x381a   :  { %4625 = vrot.lane.b32.xlu1 %v4108_v1, %s6666_s24 }
0x3888   :  { %v4615_v57 = vpop.permute.xlu1 %4614 }
0x3889   :  { %v4617_v58 = vmul.f32 %v4615_v57, %v4612_v49 }
0x388b   :  { %v4619_v41 = vadd.f32 %v4618_v43, %v4617_v58 }
0x388c   :  { %v4626_v4 = vpop.permute.xlu1 %4625 }
0x388d   :  { %4621 = vrot.lane.b32.xlu0 %v4619_v41, %s6667_s6  ;;  %s6636_s6 = scalar_lea.vmem %s4730_s30, 768 }
0x388e   :  { %p6637_p13 = scmp.ne.s32.totalorder %s4730_s30, %s6636_s6  ;;  %p6642_p1 = scmp.lt.s32.totalorder %s6636_s6, %s6636_s6 }
0x3890   :  { %p6643_p2 = por %p6642_p1, %p6641_p0 }
0x3892   :  { %p6644_p3 = pnand %p6643_p2, %p6637_p13 }
0x38ff   :  { %v4622_v32 = vpop.permute.xlu0 %4621 }
0x3900   :  { %v4628_v50 = vsel %vm92_vm1, %v4622_v32, %v8122_v13 }
0x3901   :  { %v4629_v44 = vsel %vm1558_vm2, %v4628_v50, %v4626_v4 }
0x3902   :  { %5937 = vmatmul.mubr.msk.f32.vlgmr.msra.gmra.mrb[2].mxu0 %vm1768_vm3, %v4629_v44 }
0x39d5   :  { %v4718_v33 = vpop.f32.mrb[2].mxu0 }
0x39d6   :  { %v4719_v12 = vadd.f32 %v4877_v3, %v4718_v33  ;;  %v5938_v59 = vpop.f32.mrb[3].mxu0 }
0x39d8   :  { %4723 = vst [vmem:[#allocation7 + $0x28] sm:$0xff] %v4719_v12 }
0x39d9   :  { %6647 = shalt.err (!%p6644_p3)
}
0x39da   :  { %s6648_s13 = scalar_lea.hbm %s8228_s18, 768 }
0x39db   :  { %p6649_p4 = scmp.ne.s32.totalorder %s8228_s18, %s6648_s13  ;;  %p6652_p5 = scmp.lt.u32.totalorder %s6648_s13, %s8228_s18 }
0x39dd   :  { %p6654_p6 = pnand %p6652_p5, %p6649_p4 }
0x39df   :  { %6657 = shalt.err (!%p6654_p6)
}
0x39e0   :  { %s6686_s20 = smov 128   ;;  %s6687_s7 = smov 8  }
0x39e1   :  { %4735 = dma.vmem_to_hbm [thread:$0]  %s4730_s30, 768, %s8228_s18, [#allocation5], %s6686_s20, %s6686_s20, %s6687_s7  }
0x39e2   :  { %6660 = dma.done.wait [#allocation5], 768  }
0x39e3   :  { %6661 = vsyncadd [#allocation5], 4294966528 }
0x39e4   :  { %4739 = vsyncpa [#allocation5], 1 }
0x39e5   :  { %4740 = vsyncpa [#allocation6], 1 }

</bundles_post_ra>
